<compile_context>
chip_gen: v7x
topology: tpu7x:2x2x1
jax: 0.10.0
libtpu: 0.0.40
codegen_flags: <defaults>
</compile_context>

<pallas_src>
import functools

import jax
import jax.numpy as jnp
from jax.experimental import pallas as pl
from jax.experimental.pallas import tpu as pltpu

IGNORE_LABEL = -1
LOSS_PPC_WEIGHT = 0.01
LOSS_PPD_WEIGHT = 0.001


def _vmem_params():
    """Per-generation VMEM sizing: (per-tile working-set budget, scoped limit)."""
    try:
        cap = int(pltpu.get_tpu_info().vmem_capacity_bytes)
    except Exception:
        cap = 64 * 1024 * 1024           # v7x has the smallest VMEM; be safe
    budget = min(max(cap // 5, 8 * 1024 * 1024), 24 * 1024 * 1024)
    limit = min((cap * 3) // 4, 96 * 1024 * 1024)
    return budget, limit


# ----------------------------------------------------------------------------
# Contrast path: fused masked cross-entropy (PPC) + prototype distance (PPD)
# ----------------------------------------------------------------------------
def ce_ppd_kernel(logits_ref, tgt_ref, out_ref, *, n_rows):
    """One [T, K] row tile.

    out_ref (SMEM, (1,3) f32, resident across the grid):
      [0,0] += sum over valid rows of -log_softmax(logits)[target]
      [0,1] += sum over valid rows of (1 - logits[target])^2
      [0,2] += number of valid rows
    """
    i = pl.program_id(0)

    @pl.when(i == 0)
    def _():
        out_ref[0, 0] = jnp.float32(0.0)
        out_ref[0, 1] = jnp.float32(0.0)
        out_ref[0, 2] = jnp.float32(0.0)

    logits = logits_ref[...].astype(jnp.float32)              # [T, K]
    tgt = tgt_ref[...]                                        # [T, 1] int32
    T, K = logits.shape

    # Ragged tail: rows >= n_rows were never in the input -> mask them out.
    row = jax.lax.broadcasted_iota(jnp.int32, (T, 1), 0) + i * T
    valid = jnp.logical_and(tgt != IGNORE_LABEL, row < n_rows)  # [T, 1]
    tgt_c = jnp.clip(tgt, 0, K - 1)                             # safe gather index

    # log-sum-exp over the class (lane) axis; no full log-softmax matrix.
    m = jnp.max(logits, axis=-1, keepdims=True)                           # [T, 1]
    lse = jnp.log(jnp.sum(jnp.exp(logits - m), axis=-1, keepdims=True))   # [T, 1]

    # Target gather without materializing a one-hot matrix.
    cls = jax.lax.broadcasted_iota(jnp.int32, (T, K), 1)
    gathered = jnp.sum(jnp.where(cls == tgt_c, logits, 0.0),
                       axis=-1, keepdims=True)                            # [T, 1]
    nll = m + lse - gathered                                              # [T, 1]

    # where-masking (not multiply) so NaN/Inf in invalid rows never leaks.
    out_ref[0, 0] += jnp.sum(jnp.where(valid, nll, 0.0))
    out_ref[0, 1] += jnp.sum(jnp.where(valid, (1.0 - gathered) ** 2, 0.0))
    out_ref[0, 2] += jnp.sum(valid.astype(jnp.float32))


def _ce_ppd_sums(logits, target, vmem_budget, vmem_limit):
    """Tiled reduction over [N, K]. Returns (ce_sum, ppd_sum, valid_count)."""
    N, K = logits.shape
    in_bytes = jnp.dtype(logits.dtype).itemsize

    # Tile rows from the VMEM budget: 2 double-buffered input blocks in their
    # native dtype + ~5 live [T, K] f32 temporaries inside the kernel.
    per_row = K * (2 * in_bytes + 5 * 4) + 64
    tile = int(vmem_budget // max(per_row, 1))
    tile = min(tile, 32768)
    if tile >= N:
        tile, n_tiles = N, 1                 # single full block (full-dim exempt)
    else:
        tile = max(16, (tile // 16) * 16)    # bf16-safe sublane multiple
        n_tiles = -(-N // tile)

    tgt2 = target.reshape(N, 1).astype(jnp.int32)

    out = pl.pallas_call(
        functools.partial(ce_ppd_kernel, n_rows=N),
        out_shape=jax.ShapeDtypeStruct((1, 3), jnp.float32),
        grid_spec=pltpu.PrefetchScalarGridSpec(
            num_scalar_prefetch=0,
            grid=(n_tiles,),
            in_specs=[
                pl.BlockSpec((tile, K), lambda i: (i, 0)),
                pl.BlockSpec((tile, 1), lambda i: (i, 0)),
            ],
            out_specs=pl.BlockSpec((1, 3), lambda i: (0, 0),
                                   memory_space=pltpu.MemorySpace.SMEM),
        ),
        compiler_params=pltpu.CompilerParams(
            dimension_semantics=("arbitrary",),
            vmem_limit_bytes=vmem_limit,
        ),
    )(logits, tgt2)
    return out[0, 0], out[0, 1], out[0, 2]


# ----------------------------------------------------------------------------
# Seg path: fused bilinear upsample (align_corners=True) + masked cross-entropy
# ----------------------------------------------------------------------------
def _interp_matrix(out_size, in_size):
    """Interpolation matrix A [out, in] for bilinear, align_corners=True."""
    if out_size > 1:
        pos = jnp.arange(out_size, dtype=jnp.float32) * (in_size - 1) / (out_size - 1)
    else:
        pos = jnp.zeros((out_size,), jnp.float32)
    i0 = jnp.floor(pos).astype(jnp.int32)
    i1 = jnp.minimum(i0 + 1, in_size - 1)
    w = pos - i0.astype(jnp.float32)
    cols = jnp.arange(in_size, dtype=jnp.int32)[None, :]
    return ((1.0 - w)[:, None] * (cols == i0[:, None]).astype(jnp.float32)
            + w[:, None] * (cols == i1[:, None]).astype(jnp.float32))


def seg_ce_kernel(seg_ref, ay_ref, axT_ref, tgt_ref, out_ref, *, h):
    """One (batch b, output-row band) step.

    seg_ref: [C, Hs, Ws]  native dtype (full pre-upsample image of batch b)
    ay_ref:  [Ty, Hs]     f32 row-interp slice for this band
    axT_ref: [Ws, w]      f32 column-interp matrix (transposed)
    tgt_ref: [Ty, w]      int32 labels for this band
    out_ref: [2, w]       f32 VMEM, resident across the whole grid:
             row 0 += per-lane partial CE sums, row 1 += per-lane valid counts
    """
    b = pl.program_id(0)
    band = pl.program_id(1)

    @pl.when(jnp.logical_and(b == 0, band == 0))
    def _():
        out_ref[...] = jnp.zeros_like(out_ref)

    ay = ay_ref[...]                      # [Ty, Hs]
    axT = axT_ref[...]                    # [Ws, w]
    tgt = tgt_ref[...]                    # [Ty, w]
    C = seg_ref.shape[0]
    Ty, w = tgt.shape

    # Fused upsample: per class, two small MXU matmuls -> lane-dense [Ty, w] slab.
    slabs = []
    for c in range(C):
        seg_c = seg_ref[c].astype(jnp.float32)                            # [Hs, Ws]
        tmp = jnp.dot(ay, seg_c, preferred_element_type=jnp.float32)      # [Ty, Ws]
        slabs.append(jnp.dot(tmp, axT, preferred_element_type=jnp.float32))  # [Ty, w]

    tgt_c = jnp.clip(tgt, 0, C - 1)
    # Cross-class reductions as running ops over C lane-dense slabs (no XLU).
    m = slabs[0]
    for c in range(1, C):
        m = jnp.maximum(m, slabs[c])
    sumexp = jnp.zeros_like(m)
    gathered = jnp.zeros_like(m)
    for c in range(C):
        sumexp = sumexp + jnp.exp(slabs[c] - m)
        gathered = gathered + jnp.where(tgt_c == c, slabs[c], 0.0)
    lse = jnp.log(sumexp)

    # Mask: ignore label and padded rows of the last band (y >= h).
    y_idx = jax.lax.broadcasted_iota(jnp.int32, (Ty, w), 0) + band * Ty
    valid = jnp.logical_and(tgt != IGNORE_LABEL, y_idx < h)

    ce_row = jnp.sum(jnp.where(valid, m + lse - gathered, 0.0),
                     axis=0, keepdims=True)                               # [1, w]
    cnt_row = jnp.sum(valid.astype(jnp.float32), axis=0, keepdims=True)   # [1, w]
    out_ref[...] += jnp.concatenate([ce_row, cnt_row], axis=0)            # [2, w]


def _seg_ce_sums(seg, target, vmem_budget, vmem_limit):
    """Fused upsample + masked CE. Returns (ce_sum, valid_count)."""
    B, C, Hs, Ws = seg.shape
    _, h, w = target.shape

    # Row-band size from the VMEM budget: C prediction slabs + ~6 live [Ty, w]
    # f32 temporaries per band (interp matrices / target blocks are small).
    per_row = (C + 6) * w * 4 + 2 * Hs * 4 + 2 * w * 4
    ty = int(vmem_budget // max(per_row, 1))
    ty = max(8, min(ty, 4096))
    if ty >= h:
        ty, n_bands = h, 1
    else:
        ty = (ty // 8) * 8
        n_bands = -(-h // ty)
    h_pad = ty * n_bands

    ay = _interp_matrix(h, Hs)                         # [h, Hs]
    if h_pad > h:
        ay = jnp.pad(ay, ((0, h_pad - h), (0, 0)))     # zero rows: finite & masked
    axT = _interp_matrix(w, Ws).T                      # [Ws, w]
    tgt = target.astype(jnp.int32)

    out = pl.pallas_call(
        functools.partial(seg_ce_kernel, h=h),
        out_shape=jax.ShapeDtypeStruct((2, w), jnp.float32),
        grid_spec=pltpu.PrefetchScalarGridSpec(
            num_scalar_prefetch=0,
            grid=(B, n_bands),
            in_specs=[
                pl.BlockSpec((None, C, Hs, Ws), lambda b, t: (b, 0, 0, 0)),
                pl.BlockSpec((ty, Hs), lambda b, t: (t, 0)),
                pl.BlockSpec((Ws, w), lambda b, t: (0, 0)),
                pl.BlockSpec((None, ty, w), lambda b, t: (b, t, 0)),
            ],
            out_specs=pl.BlockSpec((2, w), lambda b, t: (0, 0)),
        ),
        compiler_params=pltpu.CompilerParams(
            dimension_semantics=("arbitrary", "arbitrary"),
            vmem_limit_bytes=vmem_limit,
        ),
    )(seg, ay, axT, tgt)
    return jnp.sum(out[0]), jnp.sum(out[1])


# ----------------------------------------------------------------------------
# Top-level loss
# ----------------------------------------------------------------------------
@jax.jit
def pixel_prototype_ce_loss(seg, contrast_logits, contrast_target, target):
    """Forward pass of PixelPrototypeCELoss.

    seg:             [B, C, Hs, Ws] float (NCHW, pre-upsample seg logits)
    contrast_logits: [N, K] float
    contrast_target: [N]    int (values in [0, K) or -1)
    target:          [B, H, W] int (values in [0, C) or -1)
    """
    budget, limit = _vmem_params()

    # PPC (masked CE) and PPD (prototype distance) on the contrast logits.
    ce_sum, ppd_sum, cnt = _ce_ppd_sums(contrast_logits, contrast_target,
                                        budget, limit)
    cnt = jnp.maximum(cnt, 1.0)            # guard: all-ignored batch
    loss_ppc = ce_sum / cnt
    loss_ppd = ppd_sum / cnt

    # Seg loss: bilinear upsample (align_corners=True) fused with masked CE.
    # TODO(synk): FSCELoss(configer) per-class weights / custom reduction are not
    # modeled; configer=None reduces to plain CE with ignore_index=-1 (implemented).
    seg_ce_sum, seg_cnt = _seg_ce_sums(seg, target, budget, limit)
    seg_loss = seg_ce_sum / jnp.maximum(seg_cnt, 1.0)

    return LOSS_PPC_WEIGHT * loss_ppc + LOSS_PPD_WEIGHT * loss_ppd + seg_loss


if __name__ == "__main__":
    key = jax.random.PRNGKey(0)
    k1, k2, k3, k4 = jax.random.split(key, 4)

    B, C = 2, 4            # batch, segmentation classes
    Hs, Ws = 8, 8          # seg logits spatial size (pre-upsample)
    H, W = 16, 16          # target spatial size
    K = 16                 # prototype logits width (num_classes * num_prototypes)
    N = B * H * W          # number of contrastive samples

    seg = jax.random.normal(k1, (B, C, Hs, Ws), dtype=jnp.float32)
    contrast_logits = jax.random.normal(k2, (N, K), dtype=jnp.float32)
    contrast_target = jax.random.randint(k3, (N,), -1, K, dtype=jnp.int32)
    target = jax.random.randint(k4, (B, H, W), -1, C, dtype=jnp.int32)

    loss = pixel_prototype_ce_loss(seg, contrast_logits, contrast_target, target)
    jax.block_until_ready(loss)
    assert jnp.isfinite(loss)
    print("KERNEL_OK")
</pallas_src>

<mosaic_0001>
module attributes {stable_mosaic.version = 11 : i64} {
  func.func @ce_ppd_kernel(%arg0: i32, %arg1: memref<512x16xf32, #tpu.memory_space<vmem>>, %arg2: memref<512x1xi32, #tpu.memory_space<vmem>>, %arg3: memref<1x3xf32, #tpu.memory_space<smem>>) attributes {dimension_semantics = [#tpu.dimension_semantics<arbitrary>], iteration_bounds = array<i64: 1>, scalar_prefetch = 0 : i64, scratch_operands = 0 : i64, tpu.core_type = #tpu.core_type<tc>, window_params = [{transform_indices = @transform_0, window_bounds = array<i64: 512, 16>}, {transform_indices = @transform_1, window_bounds = array<i64: 512, 1>}, {transform_indices = @transform_2, window_bounds = array<i64: 1, 3>}]} {
    %c0_i32 = arith.constant 0 : i32
    %0 = arith.cmpi eq, %arg0, %c0_i32 : i32
    %1 = arith.extui %0 : i1 to i32
    %c0_i32_0 = arith.constant 0 : i32
    %2 = arith.cmpi ne, %1, %c0_i32_0 : i32
    scf.if %2 {
      %cst_25 = arith.constant 0.000000e+00 : f32
      %c0_26 = arith.constant 0 : index
      %c0_27 = arith.constant 0 : index
      %65 = memref.load %arg3[%c0_26, %c0_27] : memref<1x3xf32, #tpu.memory_space<smem>>
      memref.store %cst_25, %arg3[%c0_26, %c0_27] : memref<1x3xf32, #tpu.memory_space<smem>>
      %cst_28 = arith.constant 0.000000e+00 : f32
      %c0_29 = arith.constant 0 : index
      %c1_30 = arith.constant 1 : index
      %66 = memref.load %arg3[%c0_29, %c1_30] : memref<1x3xf32, #tpu.memory_space<smem>>
      memref.store %cst_28, %arg3[%c0_29, %c1_30] : memref<1x3xf32, #tpu.memory_space<smem>>
      %cst_31 = arith.constant 0.000000e+00 : f32
      %c0_32 = arith.constant 0 : index
      %c2_33 = arith.constant 2 : index
      %67 = memref.load %arg3[%c0_32, %c2_33] : memref<1x3xf32, #tpu.memory_space<smem>>
      memref.store %cst_31, %arg3[%c0_32, %c2_33] : memref<1x3xf32, #tpu.memory_space<smem>>
    } else {
    }
    %c0 = arith.constant 0 : index
    %c0_1 = arith.constant 0 : index
    %3 = vector.load %arg1[%c0, %c0_1] : memref<512x16xf32, #tpu.memory_space<vmem>>, vector<512x16xf32>
    %c0_2 = arith.constant 0 : index
    %c0_3 = arith.constant 0 : index
    %4 = vector.load %arg2[%c0_2, %c0_3] : memref<512x1xi32, #tpu.memory_space<vmem>>, vector<512x1xi32>
    %5 = tpu.iota {dimensions = array<i32: 0>} : vector<512x1xi32>
    %c512_i32 = arith.constant 512 : i32
    %6 = arith.muli %arg0, %c512_i32 : i32
    %7 = vector.broadcast %6 : i32 to vector<512x1xi32>
    %8 = arith.addi %5, %7 : vector<512x1xi32>
    %c-1_i32 = arith.constant -1 : i32
    %9 = vector.broadcast %c-1_i32 : i32 to vector<512x1xi32>
    %10 = arith.cmpi ne, %4, %9 : vector<512x1xi32>
    %c512_i32_4 = arith.constant 512 : i32
    %11 = vector.broadcast %c512_i32_4 : i32 to vector<512x1xi32>
    %12 = arith.cmpi slt, %8, %11 : vector<512x1xi32>
    %13 = arith.andi %10, %12 : vector<512x1xi1>
    %c0_i32_5 = arith.constant 0 : i32
    %c15_i32 = arith.constant 15 : i32
    %14 = vector.broadcast %c0_i32_5 : i32 to vector<512x1xi32>
    %15 = arith.maxsi %14, %4 : vector<512x1xi32>
    %16 = vector.broadcast %c15_i32 : i32 to vector<512x1xi32>
    %17 = arith.minsi %16, %15 : vector<512x1xi32>
    %cst = arith.constant dense<0xFF800000> : vector<512xf32>
    %18 = vector.multi_reduction <maximumf>, %3, %cst [1] : vector<512x16xf32> to vector<512xf32>
    %19 = vector.shape_cast %18 : vector<512xf32> to vector<512x1xf32>
    %20 = vector.broadcast %19 : vector<512x1xf32> to vector<512x16xf32>
    %21 = arith.subf %3, %20 : vector<512x16xf32>
    %22 = math.exp %21 : vector<512x16xf32>
    %cst_6 = arith.constant dense<0.000000e+00> : vector<512xf32>
    %23 = vector.multi_reduction <add>, %22, %cst_6 [1] : vector<512x16xf32> to vector<512xf32>
    %24 = vector.shape_cast %23 : vector<512xf32> to vector<512x1xf32>
    %25 = math.log %24 : vector<512x1xf32>
    %26 = tpu.iota {dimensions = array<i32: 1>} : vector<512x16xi32>
    %27 = vector.broadcast %17 : vector<512x1xi32> to vector<512x16xi32>
    %28 = arith.cmpi eq, %26, %27 : vector<512x16xi32>
    %cst_7 = arith.constant 0.000000e+00 : f32
    %29 = vector.broadcast %cst_7 : f32 to vector<512x16xf32>
    %30 = arith.select %28, %3, %29 : vector<512x16xi1>, vector<512x16xf32>
    %cst_8 = arith.constant dense<0.000000e+00> : vector<512xf32>
    %31 = vector.multi_reduction <add>, %30, %cst_8 [1] : vector<512x16xf32> to vector<512xf32>
    %32 = vector.shape_cast %31 : vector<512xf32> to vector<512x1xf32>
    %33 = arith.addf %19, %25 : vector<512x1xf32>
    %34 = arith.subf %33, %32 : vector<512x1xf32>
    %c0_9 = arith.constant 0 : index
    %c0_10 = arith.constant 0 : index
    %35 = memref.load %arg3[%c0_9, %c0_10] : memref<1x3xf32, #tpu.memory_space<smem>>
    %cst_11 = arith.constant 0.000000e+00 : f32
    %36 = vector.broadcast %cst_11 : f32 to vector<512x1xf32>
    %37 = arith.select %13, %34, %36 : vector<512x1xi1>, vector<512x1xf32>
    %38 = vector.shape_cast %37 : vector<512x1xf32> to vector<1x512x1xf32>
    %cst_12 = arith.constant dense<0.000000e+00> : vector<1xf32>
    %39 = vector.multi_reduction <add>, %38, %cst_12 [1, 2] : vector<1x512x1xf32> to vector<1xf32>
    %40 = vector.shape_cast %39 : vector<1xf32> to vector<1x1x1xf32>
    %41 = vector.extract %40[0, 0, 0] : f32 from vector<1x1x1xf32>
    %42 = arith.addf %35, %41 : f32
    %c0_13 = arith.constant 0 : index
    %c0_14 = arith.constant 0 : index
    %43 = memref.load %arg3[%c0_13, %c0_14] : memref<1x3xf32, #tpu.memory_space<smem>>
    memref.store %42, %arg3[%c0_13, %c0_14] : memref<1x3xf32, #tpu.memory_space<smem>>
    %c0_15 = arith.constant 0 : index
    %c1 = arith.constant 1 : index
    %44 = memref.load %arg3[%c0_15, %c1] : memref<1x3xf32, #tpu.memory_space<smem>>
    %cst_16 = arith.constant 1.000000e+00 : f32
    %45 = vector.broadcast %cst_16 : f32 to vector<512x1xf32>
    %46 = arith.subf %45, %32 : vector<512x1xf32>
    %47 = arith.mulf %46, %46 : vector<512x1xf32>
    %cst_17 = arith.constant 0.000000e+00 : f32
    %48 = vector.broadcast %cst_17 : f32 to vector<512x1xf32>
    %49 = arith.select %13, %47, %48 : vector<512x1xi1>, vector<512x1xf32>
    %50 = vector.shape_cast %49 : vector<512x1xf32> to vector<1x512x1xf32>
    %cst_18 = arith.constant dense<0.000000e+00> : vector<1xf32>
    %51 = vector.multi_reduction <add>, %50, %cst_18 [1, 2] : vector<1x512x1xf32> to vector<1xf32>
    %52 = vector.shape_cast %51 : vector<1xf32> to vector<1x1x1xf32>
    %53 = vector.extract %52[0, 0, 0] : f32 from vector<1x1x1xf32>
    %54 = arith.addf %44, %53 : f32
    %c0_19 = arith.constant 0 : index
    %c1_20 = arith.constant 1 : index
    %55 = memref.load %arg3[%c0_19, %c1_20] : memref<1x3xf32, #tpu.memory_space<smem>>
    memref.store %54, %arg3[%c0_19, %c1_20] : memref<1x3xf32, #tpu.memory_space<smem>>
    %c0_21 = arith.constant 0 : index
    %c2 = arith.constant 2 : index
    %56 = memref.load %arg3[%c0_21, %c2] : memref<1x3xf32, #tpu.memory_space<smem>>
    %57 = arith.extui %13 : vector<512x1xi1> to vector<512x1xi32>
    %58 = arith.sitofp %57 : vector<512x1xi32> to vector<512x1xf32>
    %59 = vector.shape_cast %58 : vector<512x1xf32> to vector<1x512x1xf32>
    %cst_22 = arith.constant dense<0.000000e+00> : vector<1xf32>
    %60 = vector.multi_reduction <add>, %59, %cst_22 [1, 2] : vector<1x512x1xf32> to vector<1xf32>
    %61 = vector.shape_cast %60 : vector<1xf32> to vector<1x1x1xf32>
    %62 = vector.extract %61[0, 0, 0] : f32 from vector<1x1x1xf32>
    %63 = arith.addf %56, %62 : f32
    %c0_23 = arith.constant 0 : index
    %c2_24 = arith.constant 2 : index
    %64 = memref.load %arg3[%c0_23, %c2_24] : memref<1x3xf32, #tpu.memory_space<smem>>
    memref.store %63, %arg3[%c0_23, %c2_24] : memref<1x3xf32, #tpu.memory_space<smem>>
    return
  }
  func.func @transform_0(%arg0: i32) -> (i32, i32) {
    %c0_i32 = arith.constant 0 : i32
    %c0_i32_0 = arith.constant 0 : i32
    return %arg0, %c0_i32 : i32, i32
  }
  func.func @transform_1(%arg0: i32) -> (i32, i32) {
    %c0_i32 = arith.constant 0 : i32
    %c0_i32_0 = arith.constant 0 : i32
    return %arg0, %c0_i32 : i32, i32
  }
  func.func @transform_2(%arg0: i32) -> (i32, i32) {
    %c0_i32 = arith.constant 0 : i32
    %c0_i32_0 = arith.constant 0 : i32
    %c0_i32_1 = arith.constant 0 : i32
    return %c0_i32, %c0_i32_0 : i32, i32
  }
}

module attributes {stable_mosaic.version = 11 : i64} {
  func.func @seg_ce_kernel(%arg0: i32, %arg1: i32, %arg2: memref<1x4x8x8xf32, #tpu.memory_space<vmem>>, %arg3: memref<16x8xf32, #tpu.memory_space<vmem>>, %arg4: memref<8x16xf32, #tpu.memory_space<vmem>>, %arg5: memref<1x16x16xi32, #tpu.memory_space<vmem>>, %arg6: memref<2x16xf32, #tpu.memory_space<vmem>>) attributes {dimension_semantics = [#tpu.dimension_semantics<arbitrary>, #tpu.dimension_semantics<arbitrary>], iteration_bounds = array<i64: 2, 1>, scalar_prefetch = 0 : i64, scratch_operands = 0 : i64, tpu.core_type = #tpu.core_type<tc>, window_params = [{transform_indices = @transform_0, window_bounds = array<i64: 1, 4, 8, 8>}, {transform_indices = @transform_1, window_bounds = array<i64: 16, 8>}, {pipeline_mode = #tpu.pipeline_mode<synchronous>, transform_indices = @transform_2, window_bounds = array<i64: 8, 16>}, {transform_indices = @transform_3, window_bounds = array<i64: 1, 16, 16>}, {pipeline_mode = #tpu.pipeline_mode<synchronous>, transform_indices = @transform_4, window_bounds = array<i64: 2, 16>}]} {
    %c0_i32 = arith.constant 0 : i32
    %0 = arith.cmpi eq, %arg0, %c0_i32 : i32
    %c0_i32_0 = arith.constant 0 : i32
    %1 = arith.cmpi eq, %arg1, %c0_i32_0 : i32
    %2 = arith.andi %0, %1 : i1
    %3 = arith.extui %2 : i1 to i32
    %c0_i32_1 = arith.constant 0 : i32
    %4 = arith.cmpi ne, %3, %c0_i32_1 : i32
    scf.if %4 {
      %cst_45 = arith.constant 0.000000e+00 : f32
      %90 = vector.broadcast %cst_45 : f32 to vector<2x16xf32>
      %c0_46 = arith.constant 0 : index
      %c0_47 = arith.constant 0 : index
      %91 = vector.load %arg6[%c0_46, %c0_47] : memref<2x16xf32, #tpu.memory_space<vmem>>, vector<2x16xf32>
      tpu.vector_store %arg6[%c0_46, %c0_47], %90 {strides = array<i32>} : memref<2x16xf32, #tpu.memory_space<vmem>>, vector<2x16xf32>,
    } else {
    }
    %c0 = arith.constant 0 : index
    %c0_2 = arith.constant 0 : index
    %5 = vector.load %arg3[%c0, %c0_2] : memref<16x8xf32, #tpu.memory_space<vmem>>, vector<16x8xf32>
    %c0_3 = arith.constant 0 : index
    %c0_4 = arith.constant 0 : index
    %6 = vector.load %arg4[%c0_3, %c0_4] : memref<8x16xf32, #tpu.memory_space<vmem>>, vector<8x16xf32>
    %c0_5 = arith.constant 0 : index
    %c0_6 = arith.constant 0 : index
    %c0_7 = arith.constant 0 : index
    %7 = vector.load %arg5[%c0_5, %c0_6, %c0_7] : memref<1x16x16xi32, #tpu.memory_space<vmem>>, vector<1x16x16xi32>
    %8 = vector.shape_cast %7 : vector<1x16x16xi32> to vector<16x16xi32>
    %c0_8 = arith.constant 0 : index
    %c0_9 = arith.constant 0 : index
    %c0_10 = arith.constant 0 : index
    %c0_11 = arith.constant 0 : index
    %9 = vector.load %arg2[%c0_8, %c0_9, %c0_10, %c0_11] : memref<1x4x8x8xf32, #tpu.memory_space<vmem>>, vector<1x1x8x8xf32>
    %10 = vector.shape_cast %9 : vector<1x1x8x8xf32> to vector<8x8xf32>
    %cst = arith.constant dense<0.000000e+00> : vector<16x8xf32>
    %11 = tpu.matmul %5, %10, %cst {dimension_numbers = #tpu.dot_dimension_numbers<[1], [0], [0], [1], [0, 0, 1, 1], [], []>} : vector<16x8xf32>, vector<8x8xf32>, vector<16x8xf32> -> vector<16x8xf32>
    %cst_12 = arith.constant dense<0.000000e+00> : vector<16x16xf32>
    %12 = tpu.matmul %11, %6, %cst_12 {dimension_numbers = #tpu.dot_dimension_numbers<[1], [0], [0], [1], [0, 0, 1, 1], [], []>} : vector<16x8xf32>, vector<8x16xf32>, vector<16x16xf32> -> vector<16x16xf32>
    %c0_13 = arith.constant 0 : index
    %c1 = arith.constant 1 : index
    %c0_14 = arith.constant 0 : index
    %c0_15 = arith.constant 0 : index
    %13 = vector.load %arg2[%c0_13, %c1, %c0_14, %c0_15] : memref<1x4x8x8xf32, #tpu.memory_space<vmem>>, vector<1x1x8x8xf32>
    %14 = vector.shape_cast %13 : vector<1x1x8x8xf32> to vector<8x8xf32>
    %cst_16 = arith.constant dense<0.000000e+00> : vector<16x8xf32>
    %15 = tpu.matmul %5, %14, %cst_16 {dimension_numbers = #tpu.dot_dimension_numbers<[1], [0], [0], [1], [0, 0, 1, 1], [], []>} : vector<16x8xf32>, vector<8x8xf32>, vector<16x8xf32> -> vector<16x8xf32>
    %cst_17 = arith.constant dense<0.000000e+00> : vector<16x16xf32>
    %16 = tpu.matmul %15, %6, %cst_17 {dimension_numbers = #tpu.dot_dimension_numbers<[1], [0], [0], [1], [0, 0, 1, 1], [], []>} : vector<16x8xf32>, vector<8x16xf32>, vector<16x16xf32> -> vector<16x16xf32>
    %c0_18 = arith.constant 0 : index
    %c2 = arith.constant 2 : index
    %c0_19 = arith.constant 0 : index
    %c0_20 = arith.constant 0 : index
    %17 = vector.load %arg2[%c0_18, %c2, %c0_19, %c0_20] : memref<1x4x8x8xf32, #tpu.memory_space<vmem>>, vector<1x1x8x8xf32>
    %18 = vector.shape_cast %17 : vector<1x1x8x8xf32> to vector<8x8xf32>
    %cst_21 = arith.constant dense<0.000000e+00> : vector<16x8xf32>
    %19 = tpu.matmul %5, %18, %cst_21 {dimension_numbers = #tpu.dot_dimension_numbers<[1], [0], [0], [1], [0, 0, 1, 1], [], []>} : vector<16x8xf32>, vector<8x8xf32>, vector<16x8xf32> -> vector<16x8xf32>
    %cst_22 = arith.constant dense<0.000000e+00> : vector<16x16xf32>
    %20 = tpu.matmul %19, %6, %cst_22 {dimension_numbers = #tpu.dot_dimension_numbers<[1], [0], [0], [1], [0, 0, 1, 1], [], []>} : vector<16x8xf32>, vector<8x16xf32>, vector<16x16xf32> -> vector<16x16xf32>
    %c0_23 = arith.constant 0 : index
    %c3 = arith.constant 3 : index
    %c0_24 = arith.constant 0 : index
    %c0_25 = arith.constant 0 : index
    %21 = vector.load %arg2[%c0_23, %c3, %c0_24, %c0_25] : memref<1x4x8x8xf32, #tpu.memory_space<vmem>>, vector<1x1x8x8xf32>
    %22 = vector.shape_cast %21 : vector<1x1x8x8xf32> to vector<8x8xf32>
    %cst_26 = arith.constant dense<0.000000e+00> : vector<16x8xf32>
    %23 = tpu.matmul %5, %22, %cst_26 {dimension_numbers = #tpu.dot_dimension_numbers<[1], [0], [0], [1], [0, 0, 1, 1], [], []>} : vector<16x8xf32>, vector<8x8xf32>, vector<16x8xf32> -> vector<16x8xf32>
    %cst_27 = arith.constant dense<0.000000e+00> : vector<16x16xf32>
    %24 = tpu.matmul %23, %6, %cst_27 {dimension_numbers = #tpu.dot_dimension_numbers<[1], [0], [0], [1], [0, 0, 1, 1], [], []>} : vector<16x8xf32>, vector<8x16xf32>, vector<16x16xf32> -> vector<16x16xf32>
    %c0_i32_28 = arith.constant 0 : i32
    %c3_i32 = arith.constant 3 : i32
    %25 = vector.broadcast %c0_i32_28 : i32 to vector<16x16xi32>
    %26 = arith.maxsi %25, %8 : vector<16x16xi32>
    %27 = vector.broadcast %c3_i32 : i32 to vector<16x16xi32>
    %28 = arith.minsi %27, %26 : vector<16x16xi32>
    %29 = arith.maximumf %12, %16 : vector<16x16xf32>
    %30 = arith.maximumf %29, %20 : vector<16x16xf32>
    %31 = arith.maximumf %30, %24 : vector<16x16xf32>
    %cst_29 = arith.constant 0.000000e+00 : f32
    %32 = vector.broadcast %cst_29 : f32 to vector<16x16xf32>
    %cst_30 = arith.constant 0.000000e+00 : f32
    %33 = vector.broadcast %cst_30 : f32 to vector<16x16xf32>
    %34 = arith.subf %12, %31 : vector<16x16xf32>
    %35 = math.exp %34 : vector<16x16xf32>
    %36 = arith.addf %32, %35 : vector<16x16xf32>
    %c0_i32_31 = arith.constant 0 : i32
    %37 = vector.broadcast %c0_i32_31 : i32 to vector<16x16xi32>
    %38 = arith.cmpi eq, %28, %37 : vector<16x16xi32>
    %cst_32 = arith.constant 0.000000e+00 : f32
    %39 = vector.broadcast %cst_32 : f32 to vector<16x16xf32>
    %40 = arith.select %38, %12, %39 : vector<16x16xi1>, vector<16x16xf32>
    %41 = arith.addf %33, %40 : vector<16x16xf32>
    %42 = arith.subf %16, %31 : vector<16x16xf32>
    %43 = math.exp %42 : vector<16x16xf32>
    %44 = arith.addf %36, %43 : vector<16x16xf32>
    %c1_i32 = arith.constant 1 : i32
    %45 = vector.broadcast %c1_i32 : i32 to vector<16x16xi32>
    %46 = arith.cmpi eq, %28, %45 : vector<16x16xi32>
    %cst_33 = arith.constant 0.000000e+00 : f32
    %47 = vector.broadcast %cst_33 : f32 to vector<16x16xf32>
    %48 = arith.select %46, %16, %47 : vector<16x16xi1>, vector<16x16xf32>
    %49 = arith.addf %41, %48 : vector<16x16xf32>
    %50 = arith.subf %20, %31 : vector<16x16xf32>
    %51 = math.exp %50 : vector<16x16xf32>
    %52 = arith.addf %44, %51 : vector<16x16xf32>
    %c2_i32 = arith.constant 2 : i32
    %53 = vector.broadcast %c2_i32 : i32 to vector<16x16xi32>
    %54 = arith.cmpi eq, %28, %53 : vector<16x16xi32>
    %cst_34 = arith.constant 0.000000e+00 : f32
    %55 = vector.broadcast %cst_34 : f32 to vector<16x16xf32>
    %56 = arith.select %54, %20, %55 : vector<16x16xi1>, vector<16x16xf32>
    %57 = arith.addf %49, %56 : vector<16x16xf32>
    %58 = arith.subf %24, %31 : vector<16x16xf32>
    %59 = math.exp %58 : vector<16x16xf32>
    %60 = arith.addf %52, %59 : vector<16x16xf32>
    %c3_i32_35 = arith.constant 3 : i32
    %61 = vector.broadcast %c3_i32_35 : i32 to vector<16x16xi32>
    %62 = arith.cmpi eq, %28, %61 : vector<16x16xi32>
    %cst_36 = arith.constant 0.000000e+00 : f32
    %63 = vector.broadcast %cst_36 : f32 to vector<16x16xf32>
    %64 = arith.select %62, %24, %63 : vector<16x16xi1>, vector<16x16xf32>
    %65 = arith.addf %57, %64 : vector<16x16xf32>
    %66 = math.log %60 : vector<16x16xf32>
    %67 = tpu.iota {dimensions = array<i32: 0>} : vector<16x16xi32>
    %c16_i32 = arith.constant 16 : i32
    %68 = arith.muli %arg1, %c16_i32 : i32
    %69 = vector.broadcast %68 : i32 to vector<16x16xi32>
    %70 = arith.addi %67, %69 : vector<16x16xi32>
    %c-1_i32 = arith.constant -1 : i32
    %71 = vector.broadcast %c-1_i32 : i32 to vector<16x16xi32>
    %72 = arith.cmpi ne, %8, %71 : vector<16x16xi32>
    %c16_i32_37 = arith.constant 16 : i32
    %73 = vector.broadcast %c16_i32_37 : i32 to vector<16x16xi32>
    %74 = arith.cmpi slt, %70, %73 : vector<16x16xi32>
    %75 = arith.andi %72, %74 : vector<16x16xi1>
    %76 = arith.addf %31, %66 : vector<16x16xf32>
    %77 = arith.subf %76, %65 : vector<16x16xf32>
    %cst_38 = arith.constant 0.000000e+00 : f32
    %78 = vector.broadcast %cst_38 : f32 to vector<16x16xf32>
    %79 = arith.select %75, %77, %78 : vector<16x16xi1>, vector<16x16xf32>
    %cst_39 = arith.constant dense<0.000000e+00> : vector<16xf32>
    %80 = vector.multi_reduction <add>, %79, %cst_39 [0] : vector<16x16xf32> to vector<16xf32>
    %81 = vector.shape_cast %80 : vector<16xf32> to vector<1x16xf32>
    %82 = arith.extui %75 : vector<16x16xi1> to vector<16x16xi32>
    %83 = arith.sitofp %82 : vector<16x16xi32> to vector<16x16xf32>
    %cst_40 = arith.constant dense<0.000000e+00> : vector<16xf32>
    %84 = vector.multi_reduction <add>, %83, %cst_40 [0] : vector<16x16xf32> to vector<16xf32>
    %85 = vector.shape_cast %84 : vector<16xf32> to vector<1x16xf32>
    %c0_41 = arith.constant 0 : index
    %c0_42 = arith.constant 0 : index
    %86 = vector.load %arg6[%c0_41, %c0_42] : memref<2x16xf32, #tpu.memory_space<vmem>>, vector<2x16xf32>
    %87 = tpu.concatenate %81, %85 in 0 : vector<1x16xf32>, vector<1x16xf32> -> vector<2x16xf32>
    %88 = arith.addf %86, %87 : vector<2x16xf32>
    %c0_43 = arith.constant 0 : index
    %c0_44 = arith.constant 0 : index
    %89 = vector.load %arg6[%c0_43, %c0_44] : memref<2x16xf32, #tpu.memory_space<vmem>>, vector<2x16xf32>
    tpu.vector_store %arg6[%c0_43, %c0_44], %88 {strides = array<i32>} : memref<2x16xf32, #tpu.memory_space<vmem>>, vector<2x16xf32>,
    return
  }
  func.func @transform_0(%arg0: i32, %arg1: i32) -> (i32, i32, i32, i32) {
    %c0_i32 = arith.constant 0 : i32
    %c0_i32_0 = arith.constant 0 : i32
    %c0_i32_1 = arith.constant 0 : i32
    %c0_i32_2 = arith.constant 0 : i32
    return %arg0, %c0_i32, %c0_i32_0, %c0_i32_1 : i32, i32, i32, i32
  }
  func.func @transform_1(%arg0: i32, %arg1: i32) -> (i32, i32) {
    %c0_i32 = arith.constant 0 : i32
    %c0_i32_0 = arith.constant 0 : i32
    return %arg1, %c0_i32 : i32, i32
  }
  func.func @transform_2(%arg0: i32, %arg1: i32) -> (i32, i32) {
    %c0_i32 = arith.constant 0 : i32
    %c0_i32_0 = arith.constant 0 : i32
    %c0_i32_1 = arith.constant 0 : i32
    return %c0_i32, %c0_i32_0 : i32, i32
  }
  func.func @transform_3(%arg0: i32, %arg1: i32) -> (i32, i32, i32) {
    %c0_i32 = arith.constant 0 : i32
    %c0_i32_0 = arith.constant 0 : i32
    return %arg0, %arg1, %c0_i32 : i32, i32, i32
  }
  func.func @transform_4(%arg0: i32, %arg1: i32) -> (i32, i32) {
    %c0_i32 = arith.constant 0 : i32
    %c0_i32_0 = arith.constant 0 : i32
    %c0_i32_1 = arith.constant 0 : i32
    return %c0_i32, %c0_i32_0 : i32, i32
  }
}

</mosaic_0001>

<bundles_post_ra>
// kernel: pixel_prototype_ce_loss.3
= control target key start
LH: loop header
LB: loop body
LE: loop exit
PB: predicated region body
PF: predicated region fallthrough
CT: control target
= control target key end

     0   :  { %s1293_s15 = smov 0   ;;  %s1295_s16 = smov 0   ;;  %s1386_s0 = inlined_call_operand.vmem [shape: f32[2,4,8,8], index: 0, kind: input, shape index: {}]   ;;  %s1387_s1 = inlined_call_operand.vmem [shape: f32[16,8], index: 1, kind: input, shape index: {}]   ;;  %s1388_s2 = inlined_call_operand.vmem [shape: f32[8,16], index: 2, kind: input, shape index: {}]   ;;  %s1389_s3 = inlined_call_operand.vmem [shape: s32[2,16,16], index: 3, kind: input, shape index: {}]   ;;  %s1390_s4 = inlined_call_operand.vmem [shape: f32[2,16], index: 4, kind: output, shape index: {}]  }
   0x1   :  { %s1297_s17 = smov 0  }
   0x2 LB: > { %s26_s18 = sadd.s32 1, %s1260_s16  ;;  %p1100_p0 = scmp.ge.s32.totalorder %s1264_s17, 1  ;;  %s1264_s17 = sphi %s1297_s17, %s14_s17   ;;  %s1260_s16 = sphi %s1295_s16, %s1392_s16   ;;  %s1256_s15 = sphi %s1293_s15, %s1391_s15  }
   0x3   : > { %p28_p1 = scmp.ge.s32.totalorder %s26_s18, 2  ;;  %p197_p2 = scmp.lt.s32.totalorder %s1264_s17, 3 }
   0x5   : > { %s1394_s18 = smov (%p28_p1, %s26_s18), 0  ;;  %p198_p3 = pnand %p1100_p0, %p197_p2 }
   0x6   : > { %p232_p4 = scmp.lt.s32.totalorder (!%p198_p3), %s1256_s15, 1  ;;  %p253_p5 = scmp.eq.s32.totalorder (!%p198_p3), %s1256_s15, 0 }
   0x7   : > { %201 = sbr.rel (%p198_p3) target bundleno = 527 (0x20f), region = 36 }
   0xe   : > { %s1396_s15 = smov (!%p232_p4, %s1256_s15), 1  ;;  %258 = sbr.rel (!%p253_p5) target bundleno = 21 (0x15), region = 40 }
   0xf   : > { %s1129_s19 = sshll.u32 %s1396_s15, 5  ;;  %s1130_s20 = sshll.u32 %s1396_s15, 4  ;;  %vm259_vm0 = vcmask (%p253_p5), 123904   ;;  %v1266_v0 = vmov (%p253_p5), 0.0  }
  0x10   : > { %s236_s23 = scalar_lea.vmem %s1386_s0, %s1129_s19  ;;  %s1317_s26 = scalar_lea.vmem %s1389_s3, %s1130_s20  ;;  %260 = vst.msk [vmem:[%s1390_s4] sm:$0x3] (%p253_p5), %vm259_vm0, %v1266_v0 }
  0x15 PF: > { %v266_v1 = vld [vmem:[%s236_s23] sm:$0xff]  ;;  %vm267_vm1 = vcmask 64512   ;;  %v262_v3 = vld [vmem:[%s1387_s1 + $0x8] sm:$0xff]  ;;  %v1115_v5 = vld [vmem:[%s236_s23 + $0x10] sm:$0xff]  ;;  %vm997_vm0 = vcmask 130048  }
  0x16   : > { %v261_v2 = vld [vmem:[%s1387_s1] sm:$0xff]  ;;  %1156 = vmatprep.subr.mxu0 %v266_v1  ;;  %v1110_v4 = vld [vmem:[%s236_s23 + $0x8] sm:$0xff]  ;;  %v1120_v6 = vld [vmem:[%s236_s23 + $0x18] sm:$0xff] }
  0x17   : > { %1158 = vmatprep.mubr.msk.f32.mxu0 %vm267_vm1, %v261_v2  ;;  %1157 = vmatpush3.msra.mxu0 %v266_v1  ;;  %v263_v7 = vld [vmem:[%s1388_s2] sm:$0xff]  ;;  %v1348_v16 = vld [vmem:[%s1317_s26 + $0x8] sm:$0xff] }
  0x18   : > { %1159 = vmatmul.mubr.msk.f32.vlgmr.msra.gmra.mrb[0].mxu0 %vm267_vm1, %v262_v3  ;;  %1166 = vmatprep.subr.mxu0 %v1110_v4  ;;  %v1351_v17 = vld [vmem:[%s1317_s26] sm:$0xff]  ;;  %vm906_vm2 = vcmp.gt.s32.totalorder %v1348_v16, 0  ;;  %vm986_vm14 = vcmp.ne.s32.totalorder %v1348_v16, 4294967295 }
  0x19   : > { %1167 = vmatpush3.msra.mxu0 %v1110_v4  ;;  %1168 = vmatprep.mubr.msk.f32.mxu0 %vm267_vm1, %v261_v2  ;;  %vm904_vm3 = vcmp.gt.s32.totalorder %v1351_v17, 0  ;;  %v907_v18 = vsel %vm906_vm2, %v1348_v16, 0  ;;  %vm985_vm15 = vcmp.ne.s32.totalorder %v1351_v17, 4294967295  ;;  %vm1024_vm2 = vcmask 123904  }
  0x1a   : > { %1176 = vmatprep.subr.mxu0 %v1115_v5  ;;  %1161 = vmatprep.subr.mxu1 %v263_v7  ;;  %v905_v19 = vsel %vm904_vm3, %v1351_v17, 0  ;;  %vm910_vm4 = vcmp.lt.s32.totalorder %v907_v18, 3 }
  0x1b   : > { %1162 = vmatpush3.msra.mxu1 %v263_v7  ;;  %vm908_vm5 = vcmp.lt.s32.totalorder %v905_v19, 3  ;;  %v911_v20 = vsel %vm910_vm4, %v907_v18, 3  ;;  %v1267_v18 = vmov 0.0  }
  0x1c   : > { %1169 = vmatmul.mubr.msk.f32.vlgmr.msra.gmra.mrb[2].mxu0 %vm267_vm1, %v262_v3  ;;  %1171 = vmatprep.subr.mxu1 %v263_v7  ;;  %v909_v22 = vsel %vm908_vm5, %v905_v19, 3  ;;  %vm927_vm6 = vcmp.eq.s32.totalorder %v911_v20, 0  ;;  %vm941_vm7 = vcmp.eq.s32.totalorder %v911_v20, 1  ;;  %vm955_vm10 = vcmp.eq.s32.totalorder %v911_v20, 2 }
  0x1d   : > { %1177 = vmatpush3.msra.mxu0 %v1115_v5  ;;  %1178 = vmatprep.mubr.msk.f32.mxu0 %vm267_vm1, %v261_v2  ;;  %vm926_vm8 = vcmp.eq.s32.totalorder %v909_v22, 0  ;;  %vm940_vm9 = vcmp.eq.s32.totalorder %v909_v22, 1  ;;  %vm954_vm11 = vcmp.eq.s32.totalorder %v909_v22, 2  ;;  %vm969_vm12 = vcmp.eq.s32.totalorder %v911_v20, 3 }
  0x1e   : > { %1186 = vmatprep.subr.mxu0 %v1120_v6  ;;  %vm968_vm13 = vcmp.eq.s32.totalorder %v909_v22, 3  ;;  %v1125_v19 = vsel %vm985_vm15, 1.0, %v1267_v18  ;;  %v1126_v20 = vsel %vm986_vm14, 1.0, %v1267_v18 }
  0x1f   : > { %v1012_v22 = vsel %vm997_vm0, %v1126_v20, 0.0 }
  0x20   : > { %1179 = vmatmul.mubr.msk.f32.vlgmr.msra.gmra.mrb[4].mxu0 %vm267_vm1, %v262_v3 }
  0x21   : > { %1187 = vmatpush3.msra.mxu0 %v1120_v6  ;;  %1188 = vmatprep.mubr.msk.f32.mxu0 %vm267_vm1, %v261_v2 }
  0x24   : > { %1189 = vmatmul.mubr.msk.f32.vlgmr.msra.gmra.mrb[6].mxu0 %vm267_vm1, %v262_v3 }
  0xeb   : > { %v1160_v8 = vpop.f32.mrb[0].mxu0 }
  0xec   : > { %v340_v9 = vpop.f32.mrb[1].mxu0 }
  0xed   : > { %1163 = vmatprep.mubr.msk.f32.mxu1 %vm267_vm1, %v340_v9 }
  0xee   : > { %1164 = vmatmul.mubr.msk.f32.vlgmr.msra.gmra.mrb[0].mxu1 %vm267_vm1, %v1160_v8 }
  0xef   : > { %v1170_v10 = vpop.f32.mrb[2].mxu0  ;;  %1172 = vmatpush3.msra.mxu1 %v263_v7 }
  0xf0   : > { %v498_v11 = vpop.f32.mrb[3].mxu0  ;;  %1181 = vmatprep.subr.mxu1 %v263_v7 }
  0xf1   : > { %1173 = vmatprep.mubr.msk.f32.mxu1 %vm267_vm1, %v498_v11 }
  0xf2   : > { %1174 = vmatmul.mubr.msk.f32.vlgmr.msra.gmra.mrb[2].mxu1 %vm267_vm1, %v1170_v10 }
  0xf3   : > { %v1180_v12 = vpop.f32.mrb[4].mxu0  ;;  %1182 = vmatpush3.msra.mxu1 %v263_v7 }
  0xf4   : > { %v656_v13 = vpop.f32.mrb[5].mxu0  ;;  %1191 = vmatprep.subr.mxu1 %v263_v7 }
  0xf5   : > { %1183 = vmatprep.mubr.msk.f32.mxu1 %vm267_vm1, %v656_v13 }
  0xf6   : > { %1184 = vmatmul.mubr.msk.f32.vlgmr.msra.gmra.mrb[4].mxu1 %vm267_vm1, %v1180_v12 }
  0xf7   : > { %v1190_v14 = vpop.f32.mrb[6].mxu0  ;;  %1192 = vmatpush3.msra.mxu1 %v263_v7 }
  0xf8   : > { %v814_v15 = vpop.f32.mrb[7].mxu0 }
  0xf9   : > { %1193 = vmatprep.mubr.msk.f32.mxu1 %vm267_vm1, %v814_v15 }
  0xfa   : > { %1194 = vmatmul.mubr.msk.f32.vlgmr.msra.gmra.mrb[6].mxu1 %vm267_vm1, %v1190_v14  ;;  %vm1021_vm1 = vcmask 1040384  }
 0x1c1   : > { %v1165_v21 = vpop.f32.mrb[0].mxu1 }
 0x1c2   : > { %v421_v23 = vpop.f32.mrb[1].mxu1  ;;  %v929_v25 = vsel %vm927_vm6, %v1165_v21, 0.0 }
 0x1c3   : > { %v928_v29 = vsel %vm926_vm8, %v421_v23, 0.0 }
 0x1c5   : > { %v1175_v24 = vpop.f32.mrb[2].mxu1 }
 0x1c6   : > { %v913_v26 = vmax.f32 %v1165_v21, %v1175_v24  ;;  %v943_v27 = vsel %vm941_vm7, %v1175_v24, 0.0  ;;  %v579_v28 = vpop.f32.mrb[3].mxu1 }
 0x1c7   : > { %v945_v30 = vadd.f32 %v943_v27, %v929_v25  ;;  %v912_v31 = vmax.f32 %v421_v23, %v579_v28  ;;  %v942_v32 = vsel %vm940_vm9, %v579_v28, 0.0 }
 0x1c8   : > { %v944_v33 = vadd.f32 %v942_v32, %v928_v29 }
 0x1c9   : > { %v1185_v34 = vpop.f32.mrb[4].mxu1 }
 0x1ca   : > { %v915_v35 = vmax.f32 %v913_v26, %v1185_v34  ;;  %v957_v36 = vsel %vm955_vm10, %v1185_v34, 0.0  ;;  %v737_v37 = vpop.f32.mrb[5].mxu1 }
 0x1cb   : > { %v959_v38 = vadd.f32 %v957_v36, %v945_v30  ;;  %v914_v39 = vmax.f32 %v912_v31, %v737_v37  ;;  %v956_v40 = vsel %vm954_vm11, %v737_v37, 0.0 }
 0x1cc   : > { %v958_v41 = vadd.f32 %v956_v40, %v944_v33 }
 0x1cd   : > { %v1195_v42 = vpop.f32.mrb[6].mxu1 }
 0x1ce   : > { %v917_v43 = vmax.f32 %v915_v35, %v1195_v42  ;;  %v971_v44 = vsel %vm969_vm12, %v1195_v42, 0.0  ;;  %v895_v45 = vpop.f32.mrb[7].mxu1 }
 0x1cf   : > { %v973_v46 = vadd.f32 %v971_v44, %v959_v38  ;;  %v916_v47 = vmax.f32 %v914_v39, %v895_v45  ;;  %v970_v48 = vsel %vm968_vm13, %v895_v45, 0.0 }
 0x1d0   : > { %v919_v49 = vsub.f32 %v1165_v21, %v917_v43  ;;  %v933_v50 = vsub.f32 %v1175_v24, %v917_v43  ;;  %v947_v51 = vsub.f32 %v1185_v34, %v917_v43  ;;  %v961_v52 = vsub.f32 %v1195_v42, %v917_v43 }
 0x1d1   : > { %v918_v53 = vsub.f32 %v421_v23, %v916_v47  ;;  %v932_v54 = vsub.f32 %v579_v28, %v916_v47  ;;  %v946_v55 = vsub.f32 %v737_v37, %v916_v47  ;;  %v960_v56 = vsub.f32 %v895_v45, %v916_v47 }
 0x1d2   : > { %v922_v57 = vmul.f32 1.442695, %v919_v49  ;;  %v936_v58 = vmul.f32 1.442695, %v933_v50  ;;  %v950_v59 = vmul.f32 1.442695, %v947_v51  ;;  %v972_v60 = vadd.f32 %v970_v48, %v958_v41 }
 0x1d3   : > { %v964_v61 = vmul.f32 1.442695, %v961_v52  ;;  %v920_v62 = vmul.f32 1.442695, %v918_v53  ;;  %v934_v63 = vmul.f32 1.442695, %v932_v54 }
 0x1d4   : > { %1222 = vpow2.f32 %v922_v57  ;;  %v948_v0 = vmul.f32 1.442695, %v946_v55  ;;  %v962_v1 = vmul.f32 1.442695, %v960_v56  ;;  %v1011_v21 = vsel %vm997_vm0, %v1125_v19, 0.0 }
 0x1d5   : > { %1224 = vpow2.f32 %v936_v58  ;;  %v1013_v23 = vadd.f32 %v1012_v22, %v1011_v21  ;;  %v1020_v48 = vld [vmem:[%s1390_s4] sm:$0x3] }
 0x1d6   : > { %1226 = vpow2.f32 %v950_v59 }
 0x1d7   : > { %1228 = vpow2.f32 %v964_v61  ;;  %v1014_v27 = vrot.slane %v1013_v23, 4 }
 0x1d8   : > { %1230 = vpow2.f32 %v920_v62 }
 0x1d9   : > { %1232 = vpow2.f32 %v934_v63  ;;  %v1015_v33 = vadd.f32 %v1014_v27, %v1013_v23 }
 0x1da   : > { %1234 = vpow2.f32 %v948_v0 }
 0x1db   : > { %1236 = vpow2.f32 %v962_v1  ;;  %v1016_v37 = vrot.slane %v1015_v33, 2 }
 0x1dd   : > { %v1017_v41 = vadd.f32 %v1016_v37, %v1015_v33 }
 0x1de   : > { %v1223_v2 = vpop.eup %1222 }
 0x1df   : > { %v1225_v3 = vpop.eup %1224  ;;  %v1018_v44 = vrot.slane %v1017_v41, 1 }
 0x1e0   : > { %v1227_v4 = vpop.eup %1226  ;;  %v939_v5 = vadd.f32 %v1225_v3, %v1223_v2 }
 0x1e1   : > { %v1229_v6 = vpop.eup %1228 }
 0x1e2   : > { %v1231_v7 = vpop.eup %1230  ;;  %v953_v8 = vadd.f32 %v1227_v4, %v939_v5 }
 0x1e3   : > { %v1233_v9 = vpop.eup %1232 }
 0x1e4   : > { %v967_v10 = vadd.f32 %v1229_v6, %v953_v8  ;;  %v938_v11 = vadd.f32 %v1233_v9, %v1231_v7  ;;  %v1235_v12 = vpop.eup %1234 }
 0x1e5   : > { %v1237_v14 = vpop.eup %1236 }
 0x1e6   : > { %1238 = vlog2.f32 %v967_v10  ;;  %v952_v13 = vadd.f32 %v1235_v12, %v938_v11 }
 0x1e8   : > { %v966_v15 = vadd.f32 %v1237_v14, %v952_v13 }
 0x1ea   : > { %1240 = vlog2.f32 %v966_v15 }
 0x1f0   : > { %v1239_v24 = vpop.eup %1238 }
 0x1f1   : > { %v977_v25 = vmul.f32 0.6931472, %v1239_v24 }
 0x1f3   : > { %v992_v26 = vadd.f32 %v977_v25, %v917_v43 }
 0x1f4   : > { %v1241_v28 = vpop.eup %1240 }
 0x1f5   : > { %v994_v29 = vsub.f32 %v992_v26, %v973_v46  ;;  %v975_v30 = vmul.f32 0.6931472, %v1241_v28  ;;  %v1019_v46 = vadd.f32 %v1018_v44, %v1017_v41 }
 0x1f7   : > { %v996_v31 = vsel %vm986_vm14, %v994_v29, 0.0  ;;  %v991_v32 = vadd.f32 %v975_v30, %v916_v47 }
 0x1f8   : > { %v999_v35 = vsel %vm997_vm0, %v996_v31, 0.0 }
 0x1f9   : > { %v993_v34 = vsub.f32 %v991_v32, %v972_v60 }
 0x1fb   : > { %v995_v36 = vsel %vm985_vm15, %v993_v34, 0.0 }
 0x1fc   : > { %v998_v38 = vsel %vm997_vm0, %v995_v36, 0.0 }
 0x1fd   : > { %v1000_v39 = vadd.f32 %v999_v35, %v998_v38 }
 0x1ff   : > { %v1001_v40 = vrot.slane %v1000_v39, 4 }
 0x201   : > { %v1002_v42 = vadd.f32 %v1001_v40, %v1000_v39 }
 0x203   : > { %v1003_v43 = vrot.slane %v1002_v42, 2 }
 0x205   : > { %v1004_v45 = vadd.f32 %v1003_v43, %v1002_v42 }
 0x207   : > { %v1005_v16 = vrot.slane %v1004_v45, 1 }
 0x209   : > { %v1006_v47 = vadd.f32 %v1005_v16, %v1004_v45 }
 0x20b   : > { %v1022_v17 = vsel %vm1021_vm1, %v1006_v47, %v1019_v46 }
 0x20c   : > { %v1023_v49 = vadd.f32 %v1022_v17, %v1020_v48 }
 0x20e   : > { %1025 = vst.msk [vmem:[%s1390_s4] sm:$0x3] %vm1024_vm2, %v1023_v49 }
 0x20f PF: > { %s14_s17 = sadd.s32 1, %s1264_s17   ;;  %s1391_s15 = smov %s1260_s16 }
 0x210   : > { %p11_p6 = scmp.ge.s32.totalorder %s14_s17, 4   ;;  %s1392_s16 = smov %s1394_s18 }
 0x212   :  { %13 = sbr.rel (!%p11_p6) target bundleno = 2 (0x2), region = 75 }

// kernel: pixel_prototype_ce_loss.2
= control target key start
LH: loop header
LB: loop body
LE: loop exit
PB: predicated region body
PF: predicated region fallthrough
CT: control target
= control target key end

     0   :  { %vm729_vm0 = vcmask 130048   ;;  %s6477_s0 = inlined_call_operand.vmem [shape: f32[512,16], index: 0, kind: input, shape index: {}]   ;;  %s6478_s1 = inlined_call_operand.vmem [shape: s32[512,1], index: 1, kind: input, shape index: {}]   ;;  %s6479_s2 = inlined_call_operand.vmem [shape: f32[1,3], index: 2, kind: output, shape index: {}]  }
   0x1   :  { %v3374_v0 = vld [vmem:[%s6477_s0] sm:$0xff]  ;;  %v3379_v1 = vld [vmem:[%s6477_s0 + $0x10] sm:$0xff]  ;;  %v3384_v2 = vld [vmem:[%s6477_s0 + $0x8] sm:$0xff] }
   0x2   :  { %v730_v3 = vsel %vm729_vm0, %v3374_v0, -inf  ;;  %v736_v4 = vsel %vm729_vm0, %v3379_v1, -inf  ;;  %v3393_v5 = vld [vmem:[%s6477_s0 + $0x18] sm:$0xff]  ;;  %v733_v6 = vsel %vm729_vm0, %v3384_v2, -inf  ;;  %v3402_v8 = vld [vmem:[%s6477_s0 + $0x20] sm:$0xff]  ;;  %v3407_v9 = vld [vmem:[%s6477_s0 + $0x28] sm:$0xff] }
   0x3   :  { %731 = vmax.xlane.f32.xlu0 %v730_v3  ;;  %737 = vmax.xlane.f32.xlu1 %v736_v4  ;;  %v739_v7 = vsel %vm729_vm0, %v3393_v5, -inf  ;;  %v742_v10 = vsel %vm729_vm0, %v3402_v8, -inf  ;;  %v745_v11 = vsel %vm729_vm0, %v3407_v9, -inf  ;;  %v3416_v12 = vld [vmem:[%s6477_s0 + $0x30] sm:$0xff]  ;;  %v3421_v13 = vld [vmem:[%s6477_s0 + $0x38] sm:$0xff]  ;;  %v3430_v16 = vld [vmem:[%s6477_s0 + $0x40] sm:$0xff] }
   0x4   :  { %v748_v14 = vsel %vm729_vm0, %v3416_v12, -inf  ;;  %v751_v15 = vsel %vm729_vm0, %v3421_v13, -inf  ;;  %v3435_v17 = vld [vmem:[%s6477_s0 + $0x48] sm:$0xff]  ;;  %v754_v18 = vsel %vm729_vm0, %v3430_v16, -inf  ;;  %v3444_v20 = vld [vmem:[%s6477_s0 + $0x50] sm:$0xff]  ;;  %v3449_v21 = vld [vmem:[%s6477_s0 + $0x58] sm:$0xff] }
   0x5   :  { %v757_v19 = vsel %vm729_vm0, %v3435_v17, -inf  ;;  %v760_v22 = vsel %vm729_vm0, %v3444_v20, -inf  ;;  %v763_v23 = vsel %vm729_vm0, %v3449_v21, -inf  ;;  %v3458_v24 = vld [vmem:[%s6477_s0 + $0x60] sm:$0xff]  ;;  %v3463_v25 = vld [vmem:[%s6477_s0 + $0x68] sm:$0xff] }
   0x7   :  { %734 = vmax.xlane.f32.xlu0 %v733_v6  ;;  %740 = vmax.xlane.f32.xlu1 %v739_v7 }
   0xb   :  { %743 = vmax.xlane.f32.xlu0 %v742_v10  ;;  %746 = vmax.xlane.f32.xlu1 %v745_v11 }
   0xf   :  { %749 = vmax.xlane.f32.xlu0 %v748_v14  ;;  %752 = vmax.xlane.f32.xlu1 %v751_v15 }
  0x13   :  { %755 = vmax.xlane.f32.xlu0 %v754_v18  ;;  %758 = vmax.xlane.f32.xlu1 %v757_v19 }
  0x14   :  { %7 = vsyncpa [#allocation3], 0  ;;  %v766_v26 = vsel %vm729_vm0, %v3458_v24, -inf  ;;  %v769_v27 = vsel %vm729_vm0, %v3463_v25, -inf  ;;  %v3472_v28 = vld [vmem:[%s6477_s0 + $0x70] sm:$0xff]  ;;  %v3477_v29 = vld [vmem:[%s6477_s0 + $0x78] sm:$0xff] }
  0x15   :  { %v772_v30 = vsel %vm729_vm0, %v3472_v28, -inf  ;;  %v775_v31 = vsel %vm729_vm0, %v3477_v29, -inf  ;;  %v3486_v32 = vld [vmem:[%s6477_s0 + $0x80] sm:$0xff]  ;;  %v3491_v33 = vld [vmem:[%s6477_s0 + $0x88] sm:$0xff]  ;;  %v3500_v36 = vld [vmem:[%s6477_s0 + $0x90] sm:$0xff]  ;;  %s2887_s8 = sshll.u32 %s6479_s2, 4  ;;  %s2888_s8 = int_to_ptr.vmem [resolvable:$true] %s2887_s8 }
  0x16   :  { %v778_v34 = vsel %vm729_vm0, %v3486_v32, -inf  ;;  %v781_v35 = vsel %vm729_vm0, %v3491_v33, -inf  ;;  %v3505_v37 = vld [vmem:[%s6477_s0 + $0x98] sm:$0xff]  ;;  %v784_v38 = vsel %vm729_vm0, %v3500_v36, -inf  ;;  %v3514_v40 = vld [vmem:[%s6477_s0 + $0xa0] sm:$0xff]  ;;  %v3519_v41 = vld [vmem:[%s6477_s0 + $0xa8] sm:$0xff]  ;;  %p3344_p1 = scmp.lt.s32.totalorder %s2888_s8, %s2888_s8 }
  0x17   :  { %761 = vmax.xlane.f32.xlu0 %v760_v22  ;;  %764 = vmax.xlane.f32.xlu1 %v763_v23  ;;  %v787_v39 = vsel %vm729_vm0, %v3505_v37, -inf  ;;  %v790_v42 = vsel %vm729_vm0, %v3514_v40, -inf  ;;  %v793_v43 = vsel %vm729_vm0, %v3519_v41, -inf  ;;  %v3528_v44 = vld [vmem:[%s6477_s0 + $0xb0] sm:$0xff]  ;;  %v3533_v45 = vld [vmem:[%s6477_s0 + $0xb8] sm:$0xff]  ;;  %v3542_v48 = vld [vmem:[%s6477_s0 + $0xc0] sm:$0xff] }
  0x18   :  { %v796_v46 = vsel %vm729_vm0, %v3528_v44, -inf  ;;  %v799_v47 = vsel %vm729_vm0, %v3533_v45, -inf  ;;  %v3547_v49 = vld [vmem:[%s6477_s0 + $0xc8] sm:$0xff]  ;;  %v802_v50 = vsel %vm729_vm0, %v3542_v48, -inf  ;;  %v3556_v52 = vld [vmem:[%s6477_s0 + $0xd0] sm:$0xff]  ;;  %v3561_v53 = vld [vmem:[%s6477_s0 + $0xd8] sm:$0xff] }
  0x19   :  { %v805_v51 = vsel %vm729_vm0, %v3547_v49, -inf  ;;  %v808_v54 = vsel %vm729_vm0, %v3556_v52, -inf  ;;  %v811_v55 = vsel %vm729_vm0, %v3561_v53, -inf  ;;  %v3570_v56 = vld [vmem:[%s6477_s0 + $0xe0] sm:$0xff]  ;;  %v3575_v57 = vld [vmem:[%s6477_s0 + $0xe8] sm:$0xff]  ;;  %v3584_v60 = vld [vmem:[%s6477_s0 + $0xf0] sm:$0xff] }
  0x1a   :  { %v814_v58 = vsel %vm729_vm0, %v3570_v56, -inf  ;;  %v817_v59 = vsel %vm729_vm0, %v3575_v57, -inf  ;;  %v3589_v61 = vld [vmem:[%s6477_s0 + $0xf8] sm:$0xff]  ;;  %v820_v62 = vsel %vm729_vm0, %v3584_v60, -inf  ;;  %v3598_v3 = vld [vmem:[%s6477_s0 + $0x100] sm:$0xff]  ;;  %v3603_v4 = vld [vmem:[%s6477_s0 + $0x108] sm:$0xff] }
  0x1b   :  { %767 = vmax.xlane.f32.xlu0 %v766_v26  ;;  %770 = vmax.xlane.f32.xlu1 %v769_v27  ;;  %v823_v63 = vsel %vm729_vm0, %v3589_v61, -inf  ;;  %v826_v6 = vsel %vm729_vm0, %v3598_v3, -inf  ;;  %v829_v7 = vsel %vm729_vm0, %v3603_v4, -inf  ;;  %v3612_v10 = vld [vmem:[%s6477_s0 + $0x110] sm:$0xff]  ;;  %v3617_v11 = vld [vmem:[%s6477_s0 + $0x118] sm:$0xff]  ;;  %v3626_v18 = vld [vmem:[%s6477_s0 + $0x120] sm:$0xff] }
  0x1c   :  { %v832_v14 = vsel %vm729_vm0, %v3612_v10, -inf  ;;  %v835_v15 = vsel %vm729_vm0, %v3617_v11, -inf  ;;  %v3631_v19 = vld [vmem:[%s6477_s0 + $0x128] sm:$0xff]  ;;  %v838_v22 = vsel %vm729_vm0, %v3626_v18, -inf  ;;  %v3640_v26 = vld [vmem:[%s6477_s0 + $0x130] sm:$0xff]  ;;  %v3645_v27 = vld [vmem:[%s6477_s0 + $0x138] sm:$0xff] }
  0x1d   :  { %v841_v23 = vsel %vm729_vm0, %v3631_v19, -inf  ;;  %s3339_s10 = scalar_lea.vmem %s2888_s8, 16 }
  0x1e   :  { %p3340_p0 = scmp.ne.s32.totalorder %s2888_s8, %s3339_s10  ;;  %p3345_p2 = scmp.lt.s32.totalorder %s3339_s10, %s3339_s10 }
  0x1f   :  { %773 = vmax.xlane.f32.xlu0 %v772_v30  ;;  %776 = vmax.xlane.f32.xlu1 %v775_v31  ;;  %v844_v30 = vsel %vm729_vm0, %v3640_v26, -inf  ;;  %v847_v31 = vsel %vm729_vm0, %v3645_v27, -inf }
  0x20   :  { %p3346_p3 = por %p3345_p2, %p3344_p1 }
  0x22   :  { %p3347_p4 = pnand %p3346_p3, %p3340_p0 }
  0x23   :  { %779 = vmax.xlane.f32.xlu0 %v778_v34  ;;  %782 = vmax.xlane.f32.xlu1 %v781_v35  ;;  %v3654_v34 = vld [vmem:[%s6477_s0 + $0x140] sm:$0xff]  ;;  %v3659_v35 = vld [vmem:[%s6477_s0 + $0x148] sm:$0xff] }
  0x27   :  { %785 = vmax.xlane.f32.xlu0 %v784_v38  ;;  %788 = vmax.xlane.f32.xlu1 %v787_v39  ;;  %v850_v38 = vsel %vm729_vm0, %v3654_v34, -inf  ;;  %v853_v39 = vsel %vm729_vm0, %v3659_v35, -inf }
  0x2b   :  { %791 = vmax.xlane.f32.xlu0 %v790_v42  ;;  %794 = vmax.xlane.f32.xlu1 %v793_v43  ;;  %v3668_v42 = vld [vmem:[%s6477_s0 + $0x150] sm:$0xff]  ;;  %v3673_v43 = vld [vmem:[%s6477_s0 + $0x158] sm:$0xff] }
  0x2f   :  { %797 = vmax.xlane.f32.xlu0 %v796_v46  ;;  %800 = vmax.xlane.f32.xlu1 %v799_v47  ;;  %v856_v46 = vsel %vm729_vm0, %v3668_v42, -inf  ;;  %v859_v47 = vsel %vm729_vm0, %v3673_v43, -inf }
  0x33   :  { %803 = vmax.xlane.f32.xlu0 %v802_v50  ;;  %806 = vmax.xlane.f32.xlu1 %v805_v51  ;;  %v3682_v50 = vld [vmem:[%s6477_s0 + $0x160] sm:$0xff]  ;;  %v3687_v51 = vld [vmem:[%s6477_s0 + $0x168] sm:$0xff] }
  0x37   :  { %809 = vmax.xlane.f32.xlu0 %v808_v54  ;;  %812 = vmax.xlane.f32.xlu1 %v811_v55  ;;  %v862_v54 = vsel %vm729_vm0, %v3682_v50, -inf  ;;  %v865_v55 = vsel %vm729_vm0, %v3687_v51, -inf }
  0x3b   :  { %815 = vmax.xlane.f32.xlu0 %v814_v58  ;;  %818 = vmax.xlane.f32.xlu1 %v817_v59  ;;  %v3696_v58 = vld [vmem:[%s6477_s0 + $0x170] sm:$0xff]  ;;  %v3701_v59 = vld [vmem:[%s6477_s0 + $0x178] sm:$0xff] }
  0x3f   :  { %821 = vmax.xlane.f32.xlu0 %v820_v62  ;;  %824 = vmax.xlane.f32.xlu1 %v823_v63  ;;  %v868_v62 = vsel %vm729_vm0, %v3696_v58, -inf  ;;  %v871_v63 = vsel %vm729_vm0, %v3701_v59, -inf }
  0x43   :  { %827 = vmax.xlane.f32.xlu0 %v826_v6  ;;  %830 = vmax.xlane.f32.xlu1 %v829_v7  ;;  %v3710_v6 = vld [vmem:[%s6477_s0 + $0x180] sm:$0xff]  ;;  %v3715_v7 = vld [vmem:[%s6477_s0 + $0x188] sm:$0xff] }
  0x47   :  { %833 = vmax.xlane.f32.xlu0 %v832_v14  ;;  %836 = vmax.xlane.f32.xlu1 %v835_v15  ;;  %v874_v14 = vsel %vm729_vm0, %v3710_v6, -inf  ;;  %v877_v15 = vsel %vm729_vm0, %v3715_v7, -inf }
  0x4b   :  { %839 = vmax.xlane.f32.xlu0 %v838_v22  ;;  %842 = vmax.xlane.f32.xlu1 %v841_v23  ;;  %v3724_v22 = vld [vmem:[%s6477_s0 + $0x190] sm:$0xff]  ;;  %v3729_v23 = vld [vmem:[%s6477_s0 + $0x198] sm:$0xff] }
  0x4f   :  { %845 = vmax.xlane.f32.xlu0 %v844_v30  ;;  %848 = vmax.xlane.f32.xlu1 %v847_v31  ;;  %v880_v30 = vsel %vm729_vm0, %v3724_v22, -inf  ;;  %v883_v31 = vsel %vm729_vm0, %v3729_v23, -inf }
  0x53   :  { %851 = vmax.xlane.f32.xlu0 %v850_v38  ;;  %854 = vmax.xlane.f32.xlu1 %v853_v39  ;;  %v3738_v38 = vld [vmem:[%s6477_s0 + $0x1a0] sm:$0xff]  ;;  %v3743_v39 = vld [vmem:[%s6477_s0 + $0x1a8] sm:$0xff] }
  0x54   :  { %6678 = vst [vmem:[#allocation5_spill] sm:$0xff] %v3738_v38  ;;  %6679 = vst [vmem:[#allocation6_spill] sm:$0xff] %v3743_v39 }
  0x57   :  { %857 = vmax.xlane.f32.xlu0 %v856_v46  ;;  %860 = vmax.xlane.f32.xlu1 %v859_v47  ;;  %v886_v46 = vsel %vm729_vm0, %v3738_v38, -inf  ;;  %v889_v47 = vsel %vm729_vm0, %v3743_v39, -inf }
  0x5b   :  { %863 = vmax.xlane.f32.xlu0 %v862_v54  ;;  %866 = vmax.xlane.f32.xlu1 %v865_v55  ;;  %v3752_v54 = vld [vmem:[%s6477_s0 + $0x1b0] sm:$0xff]  ;;  %v3757_v55 = vld [vmem:[%s6477_s0 + $0x1b8] sm:$0xff] }
  0x5c   :  { %6680 = vst [vmem:[#allocation7_spill] sm:$0xff] %v3752_v54  ;;  %6681 = vst [vmem:[#allocation8_spill] sm:$0xff] %v3757_v55 }
  0x5f   :  { %869 = vmax.xlane.f32.xlu0 %v868_v62  ;;  %872 = vmax.xlane.f32.xlu1 %v871_v63  ;;  %v892_v62 = vsel %vm729_vm0, %v3752_v54, -inf  ;;  %v895_v63 = vsel %vm729_vm0, %v3757_v55, -inf }
  0x63   :  { %875 = vmax.xlane.f32.xlu0 %v874_v14  ;;  %878 = vmax.xlane.f32.xlu1 %v877_v15  ;;  %v3766_v14 = vld [vmem:[%s6477_s0 + $0x1c0] sm:$0xff]  ;;  %v3771_v15 = vld [vmem:[%s6477_s0 + $0x1c8] sm:$0xff] }
  0x64   :  { %6682 = vst [vmem:[#allocation9_spill] sm:$0xff] %v3766_v14  ;;  %6683 = vst [vmem:[#allocation10_spill] sm:$0xff] %v3771_v15 }
  0x67   :  { %881 = vmax.xlane.f32.xlu0 %v880_v30  ;;  %884 = vmax.xlane.f32.xlu1 %v883_v31  ;;  %v898_v30 = vsel %vm729_vm0, %v3766_v14, -inf  ;;  %v901_v31 = vsel %vm729_vm0, %v3771_v15, -inf  ;;  %v3794_v15 = vld [vmem:[%s6477_s0 + $0x1e0] sm:$0xff]  ;;  %v3799_v14 = vld [vmem:[%s6477_s0 + $0x1e8] sm:$0xff] }
  0x68   :  { %6686 = vst [vmem:[#allocation13_spill] sm:$0xff] %v3794_v15  ;;  %6687 = vst [vmem:[#allocation14_spill] sm:$0xff] %v3799_v14 }
  0x6b   :  { %887 = vmax.xlane.f32.xlu0 %v886_v46  ;;  %890 = vmax.xlane.f32.xlu1 %v889_v47  ;;  %v3780_v46 = vld [vmem:[%s6477_s0 + $0x1d0] sm:$0xff]  ;;  %v3785_v47 = vld [vmem:[%s6477_s0 + $0x1d8] sm:$0xff] }
  0x6c   :  { %6684 = vst [vmem:[#allocation11_spill] sm:$0xff] %v3780_v46  ;;  %6685 = vst [vmem:[#allocation12_spill] sm:$0xff] %v3785_v47 }
  0x6f   :  { %893 = vmax.xlane.f32.xlu0 %v892_v62  ;;  %896 = vmax.xlane.f32.xlu1 %v895_v63  ;;  %v904_v62 = vsel %vm729_vm0, %v3780_v46, -inf  ;;  %v907_v63 = vsel %vm729_vm0, %v3785_v47, -inf  ;;  %v3808_v47 = vld [vmem:[%s6477_s0 + $0x1f0] sm:$0xff]  ;;  %v3813_v46 = vld [vmem:[%s6477_s0 + $0x1f8] sm:$0xff] }
  0x70   :  { %6688 = vst [vmem:[#allocation15_spill] sm:$0xff] %v3808_v47  ;;  %6689 = vst [vmem:[#allocation16_spill] sm:$0xff] %v3813_v46 }
  0x73   :  { %899 = vmax.xlane.f32.xlu0 %v898_v30  ;;  %902 = vmax.xlane.f32.xlu1 %v901_v31  ;;  %v910_v30 = vsel %vm729_vm0, %v3794_v15, -inf  ;;  %v913_v31 = vsel %vm729_vm0, %v3799_v14, -inf }
  0x77   :  { %905 = vmax.xlane.f32.xlu0 %v904_v62  ;;  %908 = vmax.xlane.f32.xlu1 %v907_v63  ;;  %v916_v62 = vsel %vm729_vm0, %v3808_v47, -inf  ;;  %v919_v63 = vsel %vm729_vm0, %v3813_v46, -inf }
  0x7b   :  { %911 = vmax.xlane.f32.xlu0 %v910_v30  ;;  %914 = vmax.xlane.f32.xlu1 %v913_v31 }
  0x7f   :  { %917 = vmax.xlane.f32.xlu0 %v916_v62  ;;  %920 = vmax.xlane.f32.xlu1 %v919_v63 }
  0x90   :  { %v3819_v14 = vpop.xlane.xlu0 %731  ;;  %v3821_v15 = vpop.xlane.xlu1 %737 }
  0x91   :  { %6690 = vst [vmem:[#allocation17_spill] sm:$0xff] %v3819_v14  ;;  %v922_v55 = vsub.f32 %v3374_v0, %v3819_v14  ;;  %v924_v54 = vsub.f32 %v3379_v1, %v3821_v15 }
  0x93   :  { %v986_v30 = vmul.f32 1.442695, %v922_v55  ;;  %v990_v31 = vmul.f32 1.442695, %v924_v54 }
  0x94   :  { %v3827_v39 = vpop.xlane.xlu0 %734  ;;  %v3829_v47 = vpop.xlane.xlu1 %740 }
  0x95   :  { %2974 = vpow2.f32 %v986_v30  ;;  %v923_v62 = vsub.f32 %v3384_v2, %v3827_v39  ;;  %v925_v63 = vsub.f32 %v3393_v5, %v3829_v47 }
  0x96   :  { %2976 = vpow2.f32 %v990_v31 }
  0x97   :  { %v988_v46 = vmul.f32 1.442695, %v923_v62  ;;  %v992_v38 = vmul.f32 1.442695, %v925_v63 }
  0x98   :  { %v3835_v0 = vpop.xlane.xlu0 %743  ;;  %v3837_v14 = vpop.xlane.xlu1 %746 }
  0x99   :  { %6691 = vst [vmem:[#allocation18_spill] sm:$0xff] %v3835_v0  ;;  %2978 = vpow2.f32 %v988_v46  ;;  %v926_v1 = vsub.f32 %v3402_v8, %v3835_v0  ;;  %v927_v54 = vsub.f32 %v3407_v9, %v3837_v14 }
  0x9a   :  { %2980 = vpow2.f32 %v992_v38 }
  0x9b   :  { %v994_v55 = vmul.f32 1.442695, %v926_v1  ;;  %v996_v2 = vmul.f32 1.442695, %v927_v54 }
  0x9c   :  { %v3843_v30 = vpop.xlane.xlu0 %749  ;;  %v3845_v5 = vpop.xlane.xlu1 %752 }
  0x9d   :  { %6692 = vst [vmem:[#allocation19_spill] sm:$0xff] %v3843_v30  ;;  %6693 = vst [vmem:[#allocation20_spill] sm:$0xff] %v3845_v5  ;;  %2982 = vpow2.f32 %v994_v55  ;;  %v928_v31 = vsub.f32 %v3416_v12, %v3843_v30  ;;  %v929_v46 = vsub.f32 %v3421_v13, %v3845_v5 }
  0x9e   :  { %2984 = vpow2.f32 %v996_v2 }
  0x9f   :  { %v2975_v62 = vpop.eup %2974  ;;  %v998_v8 = vmul.f32 1.442695, %v928_v31  ;;  %v1000_v63 = vmul.f32 1.442695, %v929_v46 }
  0xa0   :  { %v2977_v0 = vpop.eup %2976  ;;  %v3851_v9 = vpop.xlane.xlu0 %755  ;;  %v1114_v38 = vsel %vm729_vm0, %v2975_v62, 0.0 }
  0xa1   :  { %v3854_v1 = vpop.xlane.xlu1 %758  ;;  %2986 = vpow2.f32 %v998_v8  ;;  %v930_v54 = vsub.f32 %v3430_v16, %v3851_v9  ;;  %1115 = vadd.xlane.f32.xlu0 %v1114_v38  ;;  %v1120_v13 = vsel %vm729_vm0, %v2977_v0, 0.0 }
  0xa2   :  { %v931_v12 = vsub.f32 %v3435_v17, %v3854_v1  ;;  %2988 = vpow2.f32 %v1000_v63 }
  0xa3   :  { %v2979_v55 = vpop.eup %2978  ;;  %v1002_v2 = vmul.f32 1.442695, %v930_v54 }
  0xa4   :  { %v1004_v31 = vmul.f32 1.442695, %v931_v12  ;;  %v2981_v46 = vpop.eup %2980  ;;  %v3861_v5 = vpop.xlane.xlu0 %761  ;;  %v1117_v62 = vsel %vm729_vm0, %v2979_v55, 0.0 }
  0xa5   :  { %v3864_v30 = vpop.xlane.xlu1 %764  ;;  %2990 = vpow2.f32 %v1002_v2  ;;  %v932_v16 = vsub.f32 %v3444_v20, %v3861_v5  ;;  %1121 = vadd.xlane.f32.xlu0 %v1120_v13  ;;  %1118 = vadd.xlane.f32.xlu1 %v1117_v62  ;;  %v1123_v0 = vsel %vm729_vm0, %v2981_v46, 0.0 }
  0xa6   :  { %6694 = vst [vmem:[#allocation21_spill] sm:$0xff] %v3864_v30  ;;  %v933_v17 = vsub.f32 %v3449_v21, %v3864_v30  ;;  %2992 = vpow2.f32 %v1004_v31 }
  0xa7   :  { %v2983_v8 = vpop.eup %2982  ;;  %v1006_v63 = vmul.f32 1.442695, %v932_v16 }
  0xa8   :  { %v1008_v38 = vmul.f32 1.442695, %v933_v17  ;;  %v2985_v54 = vpop.eup %2984  ;;  %v3871_v12 = vpop.xlane.xlu0 %767  ;;  %v1126_v55 = vsel %vm729_vm0, %v2983_v8, 0.0 }
  0xa9   :  { %6695 = vst [vmem:[#allocation22_spill] sm:$0xff] %v3871_v12  ;;  %v3874_v2 = vpop.xlane.xlu1 %770  ;;  %2994 = vpow2.f32 %v1006_v63  ;;  %v934_v20 = vsub.f32 %v3458_v24, %v3871_v12  ;;  %1124 = vadd.xlane.f32.xlu1 %v1123_v0  ;;  %1127 = vadd.xlane.f32.xlu0 %v1126_v55  ;;  %v1129_v13 = vsel %vm729_vm0, %v2985_v54, 0.0  ;;  %v141_v12 = vld [vmem:[%s6478_s1 + $0x1b8] sm:$0xff] }
  0xaa   :  { %6696 = vst [vmem:[#allocation23_spill] sm:$0xff] %v3874_v2  ;;  %v935_v21 = vsub.f32 %v3463_v25, %v3874_v2  ;;  %2996 = vpow2.f32 %v1008_v38  ;;  %v140_v2 = vld [vmem:[%s6478_s1 + $0x1b0] sm:$0xff] }
  0xab   :  { %v2987_v31 = vpop.eup %2986  ;;  %v1010_v46 = vmul.f32 1.442695, %v934_v20 }
  0xac   :  { %v1012_v62 = vmul.f32 1.442695, %v935_v21  ;;  %v2989_v16 = vpop.eup %2988  ;;  %v3881_v17 = vpop.xlane.xlu0 %773  ;;  %v1132_v8 = vsel %vm729_vm0, %v2987_v31, 0.0 }
  0xad   :  { %6697 = vst [vmem:[#allocation24_spill] sm:$0xff] %v3881_v17  ;;  %v3884_v63 = vpop.xlane.xlu1 %776  ;;  %2998 = vpow2.f32 %v1010_v46  ;;  %v936_v24 = vsub.f32 %v3472_v28, %v3881_v17  ;;  %1130 = vadd.xlane.f32.xlu1 %v1129_v13  ;;  %1133 = vadd.xlane.f32.xlu0 %v1132_v8  ;;  %v1135_v0 = vsel %vm729_vm0, %v2989_v16, 0.0 }
  0xae   :  { %6698 = vst [vmem:[#allocation25_spill] sm:$0xff] %v3884_v63  ;;  %v937_v25 = vsub.f32 %v3477_v29, %v3884_v63  ;;  %3000 = vpow2.f32 %v1012_v62  ;;  %v3353_v62 = vmov 0  }
  0xaf   :  { %v2991_v38 = vpop.eup %2990  ;;  %v1014_v54 = vmul.f32 1.442695, %v936_v24  ;;  %2973 = vset.pattern.permute.xlu1 %v3353_v62  ;;  %2972 = vset.pattern.permute.xlu0 %v3353_v62 }
  0xb0   :  { %v1016_v55 = vmul.f32 1.442695, %v937_v25  ;;  %v2993_v20 = vpop.eup %2992  ;;  %v3891_v21 = vpop.xlane.xlu0 %779  ;;  %v1138_v31 = vsel %vm729_vm0, %v2991_v38, 0.0 }
  0xb1   :  { %6699 = vst [vmem:[#allocation26_spill] sm:$0xff] %v3891_v21  ;;  %v3894_v46 = vpop.xlane.xlu1 %782  ;;  %3002 = vpow2.f32 %v1014_v54  ;;  %v938_v28 = vsub.f32 %v3486_v32, %v3891_v21  ;;  %1136 = vadd.xlane.f32.xlu1 %v1135_v0  ;;  %1139 = vadd.xlane.f32.xlu0 %v1138_v31  ;;  %v1141_v13 = vsel %vm729_vm0, %v2993_v20, 0.0  ;;  %v104_v21 = vld [vmem:[%s6478_s1 + $0x90] sm:$0xff] }
  0xb2   :  { %6700 = vst [vmem:[#allocation27_spill] sm:$0xff] %v3894_v46  ;;  %v939_v29 = vsub.f32 %v3491_v33, %v3894_v46  ;;  %3004 = vpow2.f32 %v1016_v55  ;;  %v102_v46 = vld [vmem:[%s6478_s1 + $0x80] sm:$0xff] }
  0xb3   :  { %v2995_v16 = vpop.eup %2994  ;;  %v1018_v8 = vmul.f32 1.442695, %v938_v28 }
  0xb4   :  { %v1020_v24 = vmul.f32 1.442695, %v939_v29  ;;  %v2997_v25 = vpop.eup %2996  ;;  %v3901_v38 = vpop.xlane.xlu0 %785  ;;  %v1144_v54 = vsel %vm729_vm0, %v2995_v16, 0.0 }
  0xb5   :  { %6701 = vst [vmem:[#allocation28_spill] sm:$0xff] %v3901_v38  ;;  %v3904_v32 = vpop.xlane.xlu1 %788  ;;  %3006 = vpow2.f32 %v1018_v8  ;;  %v940_v33 = vsub.f32 %v3500_v36, %v3901_v38  ;;  %1142 = vadd.xlane.f32.xlu1 %v1141_v13  ;;  %1145 = vadd.xlane.f32.xlu0 %v1144_v54  ;;  %v1147_v55 = vsel %vm729_vm0, %v2997_v25, 0.0  ;;  %v4378_v38 = vld [vmem:[%s6478_s1 + $0x70] sm:$0xff] }
  0xb6   :  { %6702 = vst [vmem:[#allocation29_spill] sm:$0xff] %v3904_v32  ;;  %v941_v0 = vsub.f32 %v3505_v37, %v3904_v32  ;;  %3008 = vpow2.f32 %v1020_v24 }
  0xb7   :  { %v2999_v20 = vpop.eup %2998  ;;  %v1022_v31 = vmul.f32 1.442695, %v940_v33 }
  0xb8   :  { %v1024_v28 = vmul.f32 1.442695, %v941_v0  ;;  %v3001_v29 = vpop.eup %3000  ;;  %v3911_v62 = vpop.xlane.xlu0 %791  ;;  %v1150_v16 = vsel %vm729_vm0, %v2999_v20, 0.0 }
  0xb9   :  { %6703 = vst [vmem:[#allocation30_spill] sm:$0xff] %v3911_v62  ;;  %v3914_v8 = vpop.xlane.xlu1 %794  ;;  %3010 = vpow2.f32 %v1022_v31  ;;  %v942_v36 = vsub.f32 %v3514_v40, %v3911_v62  ;;  %1148 = vadd.xlane.f32.xlu1 %v1147_v55  ;;  %1151 = vadd.xlane.f32.xlu0 %v1150_v16  ;;  %v1153_v13 = vsel %vm729_vm0, %v3001_v29, 0.0 }
  0xba   :  { %6704 = vst [vmem:[#allocation31_spill] sm:$0xff] %v3914_v8  ;;  %v943_v37 = vsub.f32 %v3519_v41, %v3914_v8  ;;  %3012 = vpow2.f32 %v1024_v28 }
  0xbb   :  { %v3003_v24 = vpop.eup %3002  ;;  %v1026_v25 = vmul.f32 1.442695, %v942_v36 }
  0xbc   :  { %v1028_v54 = vmul.f32 1.442695, %v943_v37  ;;  %v3005_v33 = vpop.eup %3004  ;;  %v3921_v0 = vpop.xlane.xlu0 %797  ;;  %v1156_v20 = vsel %vm729_vm0, %v3003_v24, 0.0 }
  0xbd   :  { %6705 = vst [vmem:[#allocation32_spill] sm:$0xff] %v3921_v0  ;;  %v3924_v31 = vpop.xlane.xlu1 %800  ;;  %3014 = vpow2.f32 %v1026_v25  ;;  %v944_v40 = vsub.f32 %v3528_v44, %v3921_v0  ;;  %1154 = vadd.xlane.f32.xlu1 %v1153_v13  ;;  %1157 = vadd.xlane.f32.xlu0 %v1156_v20  ;;  %v1159_v55 = vsel %vm729_vm0, %v3005_v33, 0.0 }
  0xbe   :  { %6706 = vst [vmem:[#allocation33_spill] sm:$0xff] %v3924_v31  ;;  %v945_v41 = vsub.f32 %v3533_v45, %v3924_v31  ;;  %3016 = vpow2.f32 %v1028_v54 }
  0xbf   :  { %v3007_v28 = vpop.eup %3006  ;;  %v1030_v29 = vmul.f32 1.442695, %v944_v40 }
  0xc0   :  { %v1032_v16 = vmul.f32 1.442695, %v945_v41  ;;  %v3009_v36 = vpop.eup %3008  ;;  %v3931_v37 = vpop.xlane.xlu0 %803  ;;  %v1162_v24 = vsel %vm729_vm0, %v3007_v28, 0.0 }
  0xc1   :  { %6707 = vst [vmem:[#allocation34_spill] sm:$0xff] %v3931_v37  ;;  %v3934_v25 = vpop.xlane.xlu1 %806  ;;  %3018 = vpow2.f32 %v1030_v29  ;;  %v946_v44 = vsub.f32 %v3542_v48, %v3931_v37  ;;  %1160 = vadd.xlane.f32.xlu1 %v1159_v55  ;;  %1163 = vadd.xlane.f32.xlu0 %v1162_v24  ;;  %v1165_v13 = vsel %vm729_vm0, %v3009_v36, 0.0 }
  0xc2   :  { %6708 = vst [vmem:[#allocation35_spill] sm:$0xff] %v3934_v25  ;;  %v947_v45 = vsub.f32 %v3547_v49, %v3934_v25  ;;  %3020 = vpow2.f32 %v1032_v16 }
  0xc3   :  { %v3011_v54 = vpop.eup %3010  ;;  %v1034_v33 = vmul.f32 1.442695, %v946_v44 }
  0xc4   :  { %v1036_v20 = vmul.f32 1.442695, %v947_v45  ;;  %v3013_v40 = vpop.eup %3012  ;;  %v3941_v41 = vpop.xlane.xlu0 %809  ;;  %v1168_v28 = vsel %vm729_vm0, %v3011_v54, 0.0 }
  0xc5   :  { %6709 = vst [vmem:[#allocation36_spill] sm:$0xff] %v3941_v41  ;;  %v3944_v29 = vpop.xlane.xlu1 %812  ;;  %3022 = vpow2.f32 %v1034_v33  ;;  %v948_v48 = vsub.f32 %v3556_v52, %v3941_v41  ;;  %1166 = vadd.xlane.f32.xlu1 %v1165_v13  ;;  %1169 = vadd.xlane.f32.xlu0 %v1168_v28  ;;  %v1171_v55 = vsel %vm729_vm0, %v3013_v40, 0.0 }
  0xc6   :  { %6710 = vst [vmem:[#allocation37_spill] sm:$0xff] %v3944_v29  ;;  %v949_v49 = vsub.f32 %v3561_v53, %v3944_v29  ;;  %3024 = vpow2.f32 %v1036_v20 }
  0xc7   :  { %v3015_v16 = vpop.eup %3014  ;;  %v1038_v36 = vmul.f32 1.442695, %v948_v48 }
  0xc8   :  { %v1040_v24 = vmul.f32 1.442695, %v949_v49  ;;  %v3017_v44 = vpop.eup %3016  ;;  %v3951_v45 = vpop.xlane.xlu0 %815  ;;  %v1174_v54 = vsel %vm729_vm0, %v3015_v16, 0.0 }
  0xc9   :  { %6711 = vst [vmem:[#allocation38_spill] sm:$0xff] %v3951_v45  ;;  %v3954_v33 = vpop.xlane.xlu1 %818  ;;  %3026 = vpow2.f32 %v1038_v36  ;;  %v950_v52 = vsub.f32 %v3570_v56, %v3951_v45  ;;  %1172 = vadd.xlane.f32.xlu1 %v1171_v55  ;;  %1175 = vadd.xlane.f32.xlu0 %v1174_v54  ;;  %v1177_v13 = vsel %vm729_vm0, %v3017_v44, 0.0 }
  0xca   :  { %6712 = vst [vmem:[#allocation39_spill] sm:$0xff] %v3954_v33  ;;  %v951_v53 = vsub.f32 %v3575_v57, %v3954_v33  ;;  %3028 = vpow2.f32 %v1040_v24 }
  0xcb   :  { %v3019_v20 = vpop.eup %3018  ;;  %v1042_v40 = vmul.f32 1.442695, %v950_v52 }
  0xcc   :  { %v1044_v28 = vmul.f32 1.442695, %v951_v53  ;;  %v3021_v48 = vpop.eup %3020  ;;  %v3961_v49 = vpop.xlane.xlu0 %821  ;;  %v1180_v16 = vsel %vm729_vm0, %v3019_v20, 0.0 }
  0xcd   :  { %6713 = vst [vmem:[#allocation40_spill] sm:$0xff] %v3961_v49  ;;  %v3964_v36 = vpop.xlane.xlu1 %824  ;;  %3030 = vpow2.f32 %v1042_v40  ;;  %v952_v56 = vsub.f32 %v3584_v60, %v3961_v49  ;;  %1178 = vadd.xlane.f32.xlu1 %v1177_v13  ;;  %1181 = vadd.xlane.f32.xlu0 %v1180_v16  ;;  %v1183_v55 = vsel %vm729_vm0, %v3021_v48, 0.0 }
  0xce   :  { %6714 = vst [vmem:[#allocation41_spill] sm:$0xff] %v3964_v36  ;;  %v953_v57 = vsub.f32 %v3589_v61, %v3964_v36  ;;  %3032 = vpow2.f32 %v1044_v28 }
  0xcf   :  { %v3023_v24 = vpop.eup %3022  ;;  %v1046_v44 = vmul.f32 1.442695, %v952_v56 }
  0xd0   :  { %v1048_v54 = vmul.f32 1.442695, %v953_v57  ;;  %v3025_v52 = vpop.eup %3024  ;;  %v3971_v53 = vpop.xlane.xlu0 %827  ;;  %v1186_v20 = vsel %vm729_vm0, %v3023_v24, 0.0 }
  0xd1   :  { %6715 = vst [vmem:[#allocation42_spill] sm:$0xff] %v3971_v53  ;;  %v3974_v40 = vpop.xlane.xlu1 %830  ;;  %3034 = vpow2.f32 %v1046_v44  ;;  %v954_v60 = vsub.f32 %v3598_v3, %v3971_v53  ;;  %1184 = vadd.xlane.f32.xlu1 %v1183_v55  ;;  %1187 = vadd.xlane.f32.xlu0 %v1186_v20  ;;  %v1189_v13 = vsel %vm729_vm0, %v3025_v52, 0.0 }
  0xd2   :  { %6716 = vst [vmem:[#allocation43_spill] sm:$0xff] %v3974_v40  ;;  %v955_v61 = vsub.f32 %v3603_v4, %v3974_v40  ;;  %3036 = vpow2.f32 %v1048_v54 }
  0xd3   :  { %v3027_v28 = vpop.eup %3026  ;;  %v1050_v48 = vmul.f32 1.442695, %v954_v60 }
  0xd4   :  { %v1052_v16 = vmul.f32 1.442695, %v955_v61  ;;  %v3029_v56 = vpop.eup %3028  ;;  %v3981_v57 = vpop.xlane.xlu0 %833  ;;  %v1192_v24 = vsel %vm729_vm0, %v3027_v28, 0.0 }
  0xd5   :  { %6717 = vst [vmem:[#allocation44_spill] sm:$0xff] %v3981_v57  ;;  %v3984_v44 = vpop.xlane.xlu1 %836  ;;  %3038 = vpow2.f32 %v1050_v48  ;;  %v956_v3 = vsub.f32 %v3612_v10, %v3981_v57  ;;  %1190 = vadd.xlane.f32.xlu1 %v1189_v13  ;;  %1193 = vadd.xlane.f32.xlu0 %v1192_v24  ;;  %v1195_v55 = vsel %vm729_vm0, %v3029_v56, 0.0 }
  0xd6   :  { %6718 = vst [vmem:[#allocation45_spill] sm:$0xff] %v3984_v44  ;;  %v957_v4 = vsub.f32 %v3617_v11, %v3984_v44  ;;  %3040 = vpow2.f32 %v1052_v16 }
  0xd7   :  { %v3031_v54 = vpop.eup %3030  ;;  %v1054_v52 = vmul.f32 1.442695, %v956_v3 }
  0xd8   :  { %v1056_v20 = vmul.f32 1.442695, %v957_v4  ;;  %v3033_v60 = vpop.eup %3032  ;;  %v3991_v61 = vpop.xlane.xlu0 %839  ;;  %v1198_v28 = vsel %vm729_vm0, %v3031_v54, 0.0 }
  0xd9   :  { %6719 = vst [vmem:[#allocation46_spill] sm:$0xff] %v3991_v61  ;;  %v3994_v48 = vpop.xlane.xlu1 %842  ;;  %3042 = vpow2.f32 %v1054_v52  ;;  %v958_v10 = vsub.f32 %v3626_v18, %v3991_v61  ;;  %1196 = vadd.xlane.f32.xlu1 %v1195_v55  ;;  %1199 = vadd.xlane.f32.xlu0 %v1198_v28  ;;  %v1201_v13 = vsel %vm729_vm0, %v3033_v60, 0.0 }
  0xda   :  { %6720 = vst [vmem:[#allocation47_spill] sm:$0xff] %v3994_v48  ;;  %v959_v11 = vsub.f32 %v3631_v19, %v3994_v48  ;;  %3044 = vpow2.f32 %v1056_v20 }
  0xdb   :  { %v3035_v16 = vpop.eup %3034  ;;  %v1058_v56 = vmul.f32 1.442695, %v958_v10 }
  0xdc   :  { %v1060_v24 = vmul.f32 1.442695, %v959_v11  ;;  %v3037_v3 = vpop.eup %3036  ;;  %v4001_v4 = vpop.xlane.xlu0 %845  ;;  %v1204_v54 = vsel %vm729_vm0, %v3035_v16, 0.0 }
  0xdd   :  { %6721 = vst [vmem:[#allocation48_spill] sm:$0xff] %v4001_v4  ;;  %v4004_v52 = vpop.xlane.xlu1 %848  ;;  %3046 = vpow2.f32 %v1058_v56  ;;  %v960_v18 = vsub.f32 %v3640_v26, %v4001_v4  ;;  %1202 = vadd.xlane.f32.xlu1 %v1201_v13  ;;  %1205 = vadd.xlane.f32.xlu0 %v1204_v54  ;;  %v1207_v55 = vsel %vm729_vm0, %v3037_v3, 0.0 }
  0xde   :  { %6722 = vst [vmem:[#allocation49_spill] sm:$0xff] %v4004_v52  ;;  %v961_v19 = vsub.f32 %v3645_v27, %v4004_v52  ;;  %3048 = vpow2.f32 %v1060_v24 }
  0xdf   :  { %v3039_v20 = vpop.eup %3038  ;;  %v1062_v60 = vmul.f32 1.442695, %v960_v18 }
  0xe0   :  { %v1064_v28 = vmul.f32 1.442695, %v961_v19  ;;  %v3041_v10 = vpop.eup %3040  ;;  %v4011_v11 = vpop.xlane.xlu0 %851  ;;  %v1210_v16 = vsel %vm729_vm0, %v3039_v20, 0.0 }
  0xe1   :  { %6723 = vst [vmem:[#allocation50_spill] sm:$0xff] %v4011_v11  ;;  %v4014_v56 = vpop.xlane.xlu1 %854  ;;  %3050 = vpow2.f32 %v1062_v60  ;;  %v962_v26 = vsub.f32 %v3654_v34, %v4011_v11  ;;  %1208 = vadd.xlane.f32.xlu1 %v1207_v55  ;;  %1211 = vadd.xlane.f32.xlu0 %v1210_v16  ;;  %v1213_v13 = vsel %vm729_vm0, %v3041_v10, 0.0 }
  0xe2   :  { %6724 = vst [vmem:[#allocation51_spill] sm:$0xff] %v4014_v56  ;;  %v963_v27 = vsub.f32 %v3659_v35, %v4014_v56  ;;  %3052 = vpow2.f32 %v1064_v28 }
  0xe3   :  { %v3043_v24 = vpop.eup %3042  ;;  %v1066_v3 = vmul.f32 1.442695, %v962_v26 }
  0xe4   :  { %v1068_v54 = vmul.f32 1.442695, %v963_v27  ;;  %v3045_v18 = vpop.eup %3044  ;;  %v4021_v19 = vpop.xlane.xlu0 %857  ;;  %v1216_v20 = vsel %vm729_vm0, %v3043_v24, 0.0 }
  0xe5   :  { %6725 = vst [vmem:[#allocation52_spill] sm:$0xff] %v4021_v19  ;;  %v4024_v60 = vpop.xlane.xlu1 %860  ;;  %3054 = vpow2.f32 %v1066_v3  ;;  %v964_v34 = vsub.f32 %v3668_v42, %v4021_v19  ;;  %1214 = vadd.xlane.f32.xlu1 %v1213_v13  ;;  %1217 = vadd.xlane.f32.xlu0 %v1216_v20  ;;  %v1219_v55 = vsel %vm729_vm0, %v3045_v18, 0.0 }
  0xe6   :  { %6726 = vst [vmem:[#allocation53_spill] sm:$0xff] %v4024_v60  ;;  %v965_v35 = vsub.f32 %v3673_v43, %v4024_v60  ;;  %3056 = vpow2.f32 %v1068_v54 }
  0xe7   :  { %v3047_v28 = vpop.eup %3046  ;;  %v1070_v10 = vmul.f32 1.442695, %v964_v34 }
  0xe8   :  { %v1072_v16 = vmul.f32 1.442695, %v965_v35  ;;  %v3049_v26 = vpop.eup %3048  ;;  %v4031_v27 = vpop.xlane.xlu0 %863  ;;  %v1222_v24 = vsel %vm729_vm0, %v3047_v28, 0.0 }
  0xe9   :  { %6727 = vst [vmem:[#allocation54_spill] sm:$0xff] %v4031_v27  ;;  %v4034_v3 = vpop.xlane.xlu1 %866  ;;  %3058 = vpow2.f32 %v1070_v10  ;;  %v966_v42 = vsub.f32 %v3682_v50, %v4031_v27  ;;  %1220 = vadd.xlane.f32.xlu1 %v1219_v55  ;;  %1223 = vadd.xlane.f32.xlu0 %v1222_v24  ;;  %v1225_v13 = vsel %vm729_vm0, %v3049_v26, 0.0 }
  0xea   :  { %6728 = vst [vmem:[#allocation55_spill] sm:$0xff] %v4034_v3  ;;  %v967_v43 = vsub.f32 %v3687_v51, %v4034_v3  ;;  %3060 = vpow2.f32 %v1072_v16 }
  0xeb   :  { %v3051_v54 = vpop.eup %3050  ;;  %v1074_v18 = vmul.f32 1.442695, %v966_v42 }
  0xec   :  { %v1076_v20 = vmul.f32 1.442695, %v967_v43  ;;  %v3053_v34 = vpop.eup %3052  ;;  %v4041_v35 = vpop.xlane.xlu0 %869  ;;  %v1228_v28 = vsel %vm729_vm0, %v3051_v54, 0.0 }
  0xed   :  { %6729 = vst [vmem:[#allocation56_spill] sm:$0xff] %v4041_v35  ;;  %v4044_v10 = vpop.xlane.xlu1 %872  ;;  %3062 = vpow2.f32 %v1074_v18  ;;  %v968_v50 = vsub.f32 %v3696_v58, %v4041_v35  ;;  %1226 = vadd.xlane.f32.xlu1 %v1225_v13  ;;  %1229 = vadd.xlane.f32.xlu0 %v1228_v28  ;;  %v1231_v55 = vsel %vm729_vm0, %v3053_v34, 0.0 }
  0xee   :  { %6730 = vst [vmem:[#allocation57_spill] sm:$0xff] %v4044_v10  ;;  %v969_v51 = vsub.f32 %v3701_v59, %v4044_v10  ;;  %3064 = vpow2.f32 %v1076_v20 }
  0xef   :  { %v3055_v16 = vpop.eup %3054  ;;  %v1078_v26 = vmul.f32 1.442695, %v968_v50 }
  0xf0   :  { %v1080_v24 = vmul.f32 1.442695, %v969_v51  ;;  %v3057_v42 = vpop.eup %3056  ;;  %v4051_v43 = vpop.xlane.xlu0 %875  ;;  %v1234_v54 = vsel %vm729_vm0, %v3055_v16, 0.0 }
  0xf1   :  { %6731 = vst [vmem:[#allocation58_spill] sm:$0xff] %v4051_v43  ;;  %v4054_v18 = vpop.xlane.xlu1 %878  ;;  %3066 = vpow2.f32 %v1078_v26  ;;  %v970_v58 = vsub.f32 %v3710_v6, %v4051_v43  ;;  %1232 = vadd.xlane.f32.xlu1 %v1231_v55  ;;  %1235 = vadd.xlane.f32.xlu0 %v1234_v54  ;;  %v1237_v13 = vsel %vm729_vm0, %v3057_v42, 0.0 }
  0xf2   :  { %6732 = vst [vmem:[#allocation59_spill] sm:$0xff] %v4054_v18  ;;  %v971_v59 = vsub.f32 %v3715_v7, %v4054_v18  ;;  %3068 = vpow2.f32 %v1080_v24 }
  0xf3   :  { %v3059_v20 = vpop.eup %3058  ;;  %v1082_v34 = vmul.f32 1.442695, %v970_v58 }
  0xf4   :  { %v1084_v28 = vmul.f32 1.442695, %v971_v59  ;;  %v3061_v50 = vpop.eup %3060  ;;  %v4061_v51 = vpop.xlane.xlu0 %881  ;;  %v1240_v16 = vsel %vm729_vm0, %v3059_v20, 0.0 }
  0xf5   :  { %6733 = vst [vmem:[#allocation60_spill] sm:$0xff] %v4061_v51  ;;  %v4064_v26 = vpop.xlane.xlu1 %884  ;;  %3070 = vpow2.f32 %v1082_v34  ;;  %v972_v6 = vsub.f32 %v3724_v22, %v4061_v51  ;;  %1238 = vadd.xlane.f32.xlu1 %v1237_v13  ;;  %1241 = vadd.xlane.f32.xlu0 %v1240_v16  ;;  %v1243_v55 = vsel %vm729_vm0, %v3061_v50, 0.0  ;;  %v6737_v22 = vld [vmem:[#allocation5_spill] sm:$0xff] }
  0xf6   :  { %6734 = vst [vmem:[#allocation61_spill] sm:$0xff] %v4064_v26  ;;  %v973_v7 = vsub.f32 %v3729_v23, %v4064_v26  ;;  %3072 = vpow2.f32 %v1084_v28  ;;  %v6738_v23 = vld [vmem:[#allocation6_spill] sm:$0xff] }
  0xf7   :  { %v3063_v24 = vpop.eup %3062  ;;  %v1086_v42 = vmul.f32 1.442695, %v972_v6 }
  0xf8   :  { %v1088_v54 = vmul.f32 1.442695, %v973_v7  ;;  %v3065_v58 = vpop.eup %3064  ;;  %v4071_v59 = vpop.xlane.xlu0 %887  ;;  %v1246_v20 = vsel %vm729_vm0, %v3063_v24, 0.0 }
  0xf9   :  { %6735 = vst [vmem:[#allocation62_spill] sm:$0xff] %v4071_v59  ;;  %v4074_v34 = vpop.xlane.xlu1 %890  ;;  %3074 = vpow2.f32 %v1086_v42  ;;  %v974_v13 = vsub.f32 %v6737_v22, %v4071_v59  ;;  %1244 = vadd.xlane.f32.xlu1 %v1243_v55  ;;  %1247 = vadd.xlane.f32.xlu0 %v1246_v20  ;;  %v1249_v50 = vsel %vm729_vm0, %v3065_v58, 0.0  ;;  %v6741_v55 = vld [vmem:[#allocation7_spill] sm:$0xff] }
  0xfa   :  { %6736 = vst [vmem:[#allocation63_spill] sm:$0xff] %v4074_v34  ;;  %v975_v28 = vsub.f32 %v6738_v23, %v4074_v34  ;;  %3076 = vpow2.f32 %v1088_v54  ;;  %v6742_v54 = vld [vmem:[#allocation8_spill] sm:$0xff] }
  0xfb   :  { %v3067_v16 = vpop.eup %3066  ;;  %v1090_v6 = vmul.f32 1.442695, %v974_v13 }
  0xfc   :  { %v1092_v7 = vmul.f32 1.442695, %v975_v28  ;;  %v3069_v26 = vpop.eup %3068  ;;  %v4081_v51 = vpop.xlane.xlu0 %893  ;;  %v1252_v24 = vsel %vm729_vm0, %v3067_v16, 0.0 }
  0xfd   :  { %6739 = vst [vmem:[#allocation5_spill] sm:$0xff] %v4081_v51  ;;  %v4084_v42 = vpop.xlane.xlu1 %896  ;;  %3078 = vpow2.f32 %v1090_v6  ;;  %v976_v20 = vsub.f32 %v6741_v55, %v4081_v51  ;;  %1250 = vadd.xlane.f32.xlu1 %v1249_v50  ;;  %1253 = vadd.xlane.f32.xlu0 %v1252_v24  ;;  %v1255_v58 = vsel %vm729_vm0, %v3069_v26, 0.0  ;;  %v6745_v50 = vld [vmem:[#allocation9_spill] sm:$0xff] }
  0xfe   :  { %6740 = vst [vmem:[#allocation6_spill] sm:$0xff] %v4084_v42  ;;  %v977_v22 = vsub.f32 %v6742_v54, %v4084_v42  ;;  %3080 = vpow2.f32 %v1092_v7  ;;  %v6746_v7 = vld [vmem:[#allocation10_spill] sm:$0xff] }
  0xff   :  { %v3071_v13 = vpop.eup %3070  ;;  %v1094_v23 = vmul.f32 1.442695, %v976_v20 }
 0x100   :  { %v1096_v28 = vmul.f32 1.442695, %v977_v22  ;;  %v3073_v34 = vpop.eup %3072  ;;  %v4091_v59 = vpop.xlane.xlu0 %899  ;;  %v1258_v16 = vsel %vm729_vm0, %v3071_v13, 0.0 }
 0x101   :  { %6743 = vst [vmem:[#allocation7_spill] sm:$0xff] %v4091_v59  ;;  %v4094_v6 = vpop.xlane.xlu1 %902  ;;  %3082 = vpow2.f32 %v1094_v23  ;;  %v978_v24 = vsub.f32 %v6745_v50, %v4091_v59  ;;  %1256 = vadd.xlane.f32.xlu1 %v1255_v58  ;;  %1259 = vadd.xlane.f32.xlu0 %v1258_v16  ;;  %v1261_v26 = vsel %vm729_vm0, %v3073_v34, 0.0  ;;  %v6749_v58 = vld [vmem:[#allocation11_spill] sm:$0xff] }
 0x102   :  { %6744 = vst [vmem:[#allocation8_spill] sm:$0xff] %v4094_v6  ;;  %v979_v55 = vsub.f32 %v6746_v7, %v4094_v6  ;;  %3084 = vpow2.f32 %v1096_v28  ;;  %v6750_v28 = vld [vmem:[#allocation12_spill] sm:$0xff] }
 0x103   :  { %v3075_v20 = vpop.eup %3074  ;;  %v1098_v54 = vmul.f32 1.442695, %v978_v24 }
 0x104   :  { %v1100_v22 = vmul.f32 1.442695, %v979_v55  ;;  %v3077_v42 = vpop.eup %3076  ;;  %v4101_v51 = vpop.xlane.xlu0 %905  ;;  %v1264_v13 = vsel %vm729_vm0, %v3075_v20, 0.0 }
 0x105   :  { %6747 = vst [vmem:[#allocation9_spill] sm:$0xff] %v4101_v51  ;;  %v4104_v23 = vpop.xlane.xlu1 %908  ;;  %3086 = vpow2.f32 %v1098_v54  ;;  %v980_v16 = vsub.f32 %v6749_v58, %v4101_v51  ;;  %1262 = vadd.xlane.f32.xlu1 %v1261_v26  ;;  %1265 = vadd.xlane.f32.xlu0 %v1264_v13  ;;  %v1267_v34 = vsel %vm729_vm0, %v3077_v42, 0.0  ;;  %v6753_v26 = vld [vmem:[#allocation13_spill] sm:$0xff] }
 0x106   :  { %6748 = vst [vmem:[#allocation10_spill] sm:$0xff] %v4104_v23  ;;  %v981_v50 = vsub.f32 %v6750_v28, %v4104_v23  ;;  %3088 = vpow2.f32 %v1100_v22  ;;  %v6754_v22 = vld [vmem:[#allocation14_spill] sm:$0xff] }
 0x107   :  { %v3079_v24 = vpop.eup %3078  ;;  %v1102_v7 = vmul.f32 1.442695, %v980_v16 }
 0x108   :  { %v1104_v55 = vmul.f32 1.442695, %v981_v50  ;;  %v3081_v6 = vpop.eup %3080  ;;  %v4111_v59 = vpop.xlane.xlu0 %911  ;;  %v1270_v20 = vsel %vm729_vm0, %v3079_v24, 0.0 }
 0x109   :  { %6751 = vst [vmem:[#allocation11_spill] sm:$0xff] %v4111_v59  ;;  %v4114_v54 = vpop.xlane.xlu1 %914  ;;  %3090 = vpow2.f32 %v1102_v7  ;;  %v982_v13 = vsub.f32 %v6753_v26, %v4111_v59  ;;  %1268 = vadd.xlane.f32.xlu1 %v1267_v34  ;;  %1271 = vadd.xlane.f32.xlu0 %v1270_v20  ;;  %v1273_v42 = vsel %vm729_vm0, %v3081_v6, 0.0  ;;  %v6757_v34 = vld [vmem:[#allocation15_spill] sm:$0xff] }
 0x10a   :  { %6752 = vst [vmem:[#allocation12_spill] sm:$0xff] %v4114_v54  ;;  %v983_v58 = vsub.f32 %v6754_v22, %v4114_v54  ;;  %3092 = vpow2.f32 %v1104_v55  ;;  %v6758_v55 = vld [vmem:[#allocation16_spill] sm:$0xff] }
 0x10b   :  { %v3083_v16 = vpop.eup %3082  ;;  %v1106_v28 = vmul.f32 1.442695, %v982_v13 }
 0x10c   :  { %v1108_v50 = vmul.f32 1.442695, %v983_v58  ;;  %v3085_v23 = vpop.eup %3084  ;;  %v4121_v51 = vpop.xlane.xlu0 %917  ;;  %v1276_v24 = vsel %vm729_vm0, %v3083_v16, 0.0 }
 0x10d   :  { %6755 = vst [vmem:[#allocation13_spill] sm:$0xff] %v4121_v51  ;;  %v4124_v7 = vpop.xlane.xlu1 %920  ;;  %3094 = vpow2.f32 %v1106_v28  ;;  %v984_v20 = vsub.f32 %v6757_v34, %v4121_v51  ;;  %1274 = vadd.xlane.f32.xlu1 %v1273_v42  ;;  %1277 = vadd.xlane.f32.xlu0 %v1276_v24  ;;  %v1279_v6 = vsel %vm729_vm0, %v3085_v23, 0.0 }
 0x10e   :  { %6756 = vst [vmem:[#allocation14_spill] sm:$0xff] %v4124_v7  ;;  %v985_v26 = vsub.f32 %v6758_v55, %v4124_v7  ;;  %3096 = vpow2.f32 %v1108_v50 }
 0x10f   :  { %v3087_v13 = vpop.eup %3086  ;;  %v1110_v22 = vmul.f32 1.442695, %v984_v20 }
 0x110   :  { %v1112_v58 = vmul.f32 1.442695, %v985_v26  ;;  %v3089_v54 = vpop.eup %3088  ;;  %v1282_v16 = vsel %vm729_vm0, %v3087_v13, 0.0 }
 0x111   :  { %3098 = vpow2.f32 %v1110_v22  ;;  %1280 = vadd.xlane.f32.xlu1 %v1279_v6  ;;  %1283 = vadd.xlane.f32.xlu0 %v1282_v16  ;;  %v1285_v28 = vsel %vm729_vm0, %v3089_v54, 0.0  ;;  %v4147_v16 = vld [vmem:[%s6478_s1] sm:$0xff] }
 0x112   :  { %3100 = vpow2.f32 %v1112_v58  ;;  %v4142_v58 = vld [vmem:[%s6478_s1 + $0x8] sm:$0xff]  ;;  %6760 = vst [vmem:[#allocation16_spill] sm:$0xff] %v4147_v16  ;;  %vm473_vm2 = vcmp.gt.s32.totalorder %v4147_v16, 0 }
 0x113   :  { %v3091_v42 = vpop.eup %3090  ;;  %6759 = vst [vmem:[#allocation15_spill] sm:$0xff] %v4142_v58  ;;  %vm475_vm1 = vcmp.gt.s32.totalorder %v4142_v58, 0 }
 0x114   :  { %v3093_v24 = vpop.eup %3092  ;;  %v1288_v34 = vsel %vm729_vm0, %v3091_v42, 0.0  ;;  %v476_v42 = vsel %vm475_vm1, %v4142_v58, 0 }
 0x115   :  { %1286 = vadd.xlane.f32.xlu1 %v1285_v28  ;;  %1289 = vadd.xlane.f32.xlu0 %v1288_v34  ;;  %v1291_v23 = vsel %vm729_vm0, %v3093_v24, 0.0  ;;  %v4154_v28 = vld [vmem:[%s6478_s1 + $0x10] sm:$0xff]  ;;  %v474_v24 = vsel %vm473_vm2, %v4147_v16, 0  ;;  %v4162_v34 = vld [vmem:[%s6478_s1 + $0x18] sm:$0xff]  ;;  %vm603_vm4 = vcmp.lt.s32.totalorder %v476_v42, 15 }
 0x116   :  { %6761 = vst [vmem:[#allocation64_spill] sm:$0xff] %v4154_v28  ;;  %vm477_vm3 = vcmp.gt.s32.totalorder %v4154_v28, 0  ;;  %6762 = vst [vmem:[#allocation65_spill] sm:$0xff] %v4162_v34  ;;  %vm601_vm5 = vcmp.lt.s32.totalorder %v474_v24, 15  ;;  %vm479_vm6 = vcmp.gt.s32.totalorder %v4162_v34, 0 }
 0x117   :  { %v3095_v50 = vpop.eup %3094 }
 0x118   :  { %v3097_v20 = vpop.eup %3096  ;;  %v1294_v55 = vsel %vm729_vm0, %v3095_v50, 0.0 }
 0x119   :  { %1292 = vadd.xlane.f32.xlu1 %v1291_v23  ;;  %1295 = vadd.xlane.f32.xlu0 %v1294_v55  ;;  %v1297_v26 = vsel %vm729_vm0, %v3097_v20, 0.0  ;;  %v478_v23 = vsel %vm477_vm3, %v4154_v28, 0  ;;  %v604_v20 = vsel %vm603_vm4, %v476_v42, 15  ;;  %v4171_v55 = vld [vmem:[%s6478_s1 + $0x20] sm:$0xff]  ;;  %v4182_v42 = vld [vmem:[%s6478_s1 + $0x28] sm:$0xff] }
 0x11a   :  { %6763 = vst [vmem:[#allocation66_spill] sm:$0xff] %v4171_v55  ;;  %vm605_vm7 = vcmp.lt.s32.totalorder %v478_v23, 15  ;;  %vm481_vm8 = vcmp.gt.s32.totalorder %v4171_v55, 0  ;;  %6764 = vst [vmem:[#allocation67_spill] sm:$0xff] %v4182_v42  ;;  %vm483_vm10 = vcmp.gt.s32.totalorder %v4182_v42, 0 }
 0x11b   :  { %v3099_v6 = vpop.eup %3098 }
 0x11c   :  { %v3101_v13 = vpop.eup %3100  ;;  %v1300_v54 = vsel %vm729_vm0, %v3099_v6, 0.0  ;;  %v480_v6 = vsel %vm479_vm6, %v4162_v34, 0 }
 0x11d   :  { %1298 = vadd.xlane.f32.xlu1 %v1297_v26  ;;  %1301 = vadd.xlane.f32.xlu0 %v1300_v54  ;;  %v1303_v22 = vsel %vm729_vm0, %v3101_v13, 0.0  ;;  %v602_v26 = vsel %vm601_vm5, %v474_v24, 15  ;;  %vm607_vm9 = vcmp.lt.s32.totalorder %v480_v6, 15  ;;  %v482_v24 = vsel %vm481_vm8, %v4171_v55, 0 }
 0x11e   :  { %v608_v51 = vsel %vm607_vm9, %v480_v6, 15  ;;  %vm609_vm11 = vcmp.lt.s32.totalorder %v482_v24, 15 }
 0x11f   :  { %v610_v18 = vsel %vm609_vm11, %v482_v24, 15 }
 0x121   :  { %1304 = vadd.xlane.f32.xlu1 %v1303_v22  ;;  %v606_v22 = vsel %vm605_vm7, %v478_v23, 15 }
 0x12e   :  { %v4165_v50 = vpop.xlane.xlu0 %1115 }
 0x12f   :  { %3102 = vlog2.f32 %v4165_v50  ;;  %v3246_v50 = vld [vmem:[%s6477_s0 + $0x80] sm:$0xff] }
 0x132   :  { %1440 = vperm.xlu1 %2973, %v604_v20   ;;  %v4174_v13 = vpop.xlane.xlu1 %1118  ;;  %v4176_v54 = vpop.xlane.xlu0 %1121 }
 0x133   :  { %1437 = vperm.xlu0 %2972, %v602_v26   ;;  %v484_v26 = vsel %vm483_vm10, %v4182_v42, 0  ;;  %3104 = vlog2.f32 %v4174_v13 }
 0x134   :  { %vm611_vm12 = vcmp.lt.s32.totalorder %v484_v26, 15  ;;  %3106 = vlog2.f32 %v4176_v54 }
 0x135   :  { %v612_v10 = vsel %vm611_vm12, %v484_v26, 15 }
 0x136   :  { %1443 = vperm.xlu1 %2973, %v606_v22   ;;  %v4185_v7 = vpop.xlane.xlu1 %1124  ;;  %v4187_v20 = vpop.xlane.xlu0 %1127 }
 0x137   :  { %3108 = vlog2.f32 %v4185_v7 }
 0x138   :  { %3110 = vlog2.f32 %v4187_v20 }
 0x13a   :  { %1446 = vperm.xlu1 %2973, %v608_v51   ;;  %v4191_v23 = vpop.xlane.xlu1 %1130  ;;  %v4193_v59 = vpop.xlane.xlu0 %1133 }
 0x13b   :  { %3112 = vlog2.f32 %v4191_v23 }
 0x13c   :  { %3114 = vlog2.f32 %v4193_v59 }
 0x13e   :  { %1449 = vperm.xlu1 %2973, %v610_v18   ;;  %v4195_v43 = vpop.xlane.xlu1 %1136  ;;  %v4197_v22 = vpop.xlane.xlu0 %1139 }
 0x13f   :  { %3116 = vlog2.f32 %v4195_v43 }
 0x140   :  { %3118 = vlog2.f32 %v4197_v22  ;;  %v3249_v22 = vld [vmem:[%s6477_s0 + $0x98] sm:$0xff] }
 0x142   :  { %1452 = vperm.xlu1 %2973, %v612_v10   ;;  %v4199_v35 = vpop.xlane.xlu1 %1142  ;;  %v4201_v6 = vpop.xlane.xlu0 %1145 }
 0x143   :  { %3120 = vlog2.f32 %v4199_v35 }
 0x144   :  { %3122 = vlog2.f32 %v4201_v6 }
 0x146   :  { %v4203_v3 = vpop.xlane.xlu1 %1148  ;;  %v4205_v51 = vpop.xlane.xlu0 %1151 }
 0x147   :  { %3124 = vlog2.f32 %v4203_v3  ;;  %v3250_v3 = vld [vmem:[%s6477_s0 + $0xa0] sm:$0xff] }
 0x148   :  { %3126 = vlog2.f32 %v4205_v51 }
 0x14a   :  { %v4207_v27 = vpop.xlane.xlu1 %1154  ;;  %v4209_v19 = vpop.xlane.xlu0 %1157 }
 0x14b   :  { %3128 = vlog2.f32 %v4207_v27 }
 0x14c   :  { %3130 = vlog2.f32 %v4209_v19 }
 0x14e   :  { %v4211_v24 = vpop.xlane.xlu1 %1160  ;;  %v4213_v18 = vpop.xlane.xlu0 %1163 }
 0x14f   :  { %3132 = vlog2.f32 %v4211_v24  ;;  %v3254_v24 = vld [vmem:[%s6477_s0 + $0xb0] sm:$0xff] }
 0x152   :  { %v4215_v60 = vpop.xlane.xlu1 %1166  ;;  %v4217_v26 = vpop.xlane.xlu0 %1169 }
 0x156   :  { %v4219_v10 = vpop.xlane.xlu1 %1172  ;;  %v4221_v56 = vpop.xlane.xlu0 %1175 }
 0x15a   :  { %v4223_v11 = vpop.xlane.xlu1 %1178  ;;  %v4225_v52 = vpop.xlane.xlu0 %1181 }
 0x15b   :  { %6765 = vst [vmem:[#allocation68_spill] sm:$0xff] %v4223_v11  ;;  %6766 = vst [vmem:[#allocation69_spill] sm:$0xff] %v4225_v52  ;;  %v145_v11 = vld [vmem:[%s6478_s1 + $0x1d8] sm:$0xff] }
 0x15e   :  { %v4227_v4 = vpop.xlane.xlu1 %1184  ;;  %v4229_v48 = vpop.xlane.xlu0 %1187 }
 0x15f   :  { %6767 = vst [vmem:[#allocation70_spill] sm:$0xff] %v4227_v4  ;;  %6768 = vst [vmem:[#allocation71_spill] sm:$0xff] %v4229_v48  ;;  %v143_v4 = vld [vmem:[%s6478_s1 + $0x1c8] sm:$0xff] }
 0x162   :  { %v4231_v61 = vpop.xlane.xlu1 %1190  ;;  %v4233_v44 = vpop.xlane.xlu0 %1193 }
 0x163   :  { %6769 = vst [vmem:[#allocation72_spill] sm:$0xff] %v4231_v61  ;;  %6770 = vst [vmem:[#allocation73_spill] sm:$0xff] %v4233_v44  ;;  %v109_v44 = vld [vmem:[%s6478_s1 + $0xb8] sm:$0xff]  ;;  %v111_v61 = vld [vmem:[%s6478_s1 + $0xc8] sm:$0xff] }
 0x166   :  { %v4235_v57 = vpop.xlane.xlu1 %1196  ;;  %v4237_v40 = vpop.xlane.xlu0 %1199 }
 0x167   :  { %6771 = vst [vmem:[#allocation74_spill] sm:$0xff] %v4235_v57  ;;  %6772 = vst [vmem:[#allocation75_spill] sm:$0xff] %v4237_v40 }
 0x16a   :  { %v4239_v53 = vpop.xlane.xlu1 %1202  ;;  %v4241_v36 = vpop.xlane.xlu0 %1205 }
 0x16b   :  { %6773 = vst [vmem:[#allocation76_spill] sm:$0xff] %v4239_v53  ;;  %6774 = vst [vmem:[#allocation77_spill] sm:$0xff] %v4241_v36 }
 0x16e   :  { %v4243_v33 = vpop.xlane.xlu1 %1208  ;;  %v4245_v49 = vpop.xlane.xlu0 %1211 }
 0x16f   :  { %6775 = vst [vmem:[#allocation78_spill] sm:$0xff] %v4243_v33  ;;  %6776 = vst [vmem:[#allocation79_spill] sm:$0xff] %v4245_v49 }
 0x172   :  { %v4247_v45 = vpop.xlane.xlu1 %1214  ;;  %v4249_v29 = vpop.xlane.xlu0 %1217 }
 0x173   :  { %6777 = vst [vmem:[#allocation80_spill] sm:$0xff] %v4247_v45  ;;  %6778 = vst [vmem:[#allocation81_spill] sm:$0xff] %v4249_v29 }
 0x176   :  { %v4251_v41 = vpop.xlane.xlu1 %1220  ;;  %v4253_v25 = vpop.xlane.xlu0 %1223 }
 0x177   :  { %6779 = vst [vmem:[#allocation82_spill] sm:$0xff] %v4251_v41  ;;  %6780 = vst [vmem:[#allocation83_spill] sm:$0xff] %v4253_v25 }
 0x17a   :  { %v4255_v37 = vpop.xlane.xlu1 %1226  ;;  %v4257_v31 = vpop.xlane.xlu0 %1229 }
 0x17b   :  { %6781 = vst [vmem:[#allocation84_spill] sm:$0xff] %v4255_v37  ;;  %6782 = vst [vmem:[#allocation85_spill] sm:$0xff] %v4257_v31 }
 0x17e   :  { %v4259_v0 = vpop.xlane.xlu1 %1232  ;;  %v4261_v8 = vpop.xlane.xlu0 %1235 }
 0x17f   :  { %6783 = vst [vmem:[#allocation86_spill] sm:$0xff] %v4259_v0  ;;  %6784 = vst [vmem:[#allocation87_spill] sm:$0xff] %v4261_v8 }
 0x182   :  { %v4263_v62 = vpop.xlane.xlu1 %1238  ;;  %v4265_v32 = vpop.xlane.xlu0 %1241 }
 0x183   :  { %6785 = vst [vmem:[#allocation88_spill] sm:$0xff] %v4263_v62  ;;  %6786 = vst [vmem:[#allocation89_spill] sm:$0xff] %v4265_v32 }
 0x186   :  { %v4267_v49 = vpop.xlane.xlu1 %1244  ;;  %v4269_v45 = vpop.xlane.xlu0 %1247 }
 0x187   :  { %6787 = vst [vmem:[#allocation90_spill] sm:$0xff] %v4267_v49  ;;  %6788 = vst [vmem:[#allocation91_spill] sm:$0xff] %v4269_v45 }
 0x18a   :  { %v4271_v29 = vpop.xlane.xlu1 %1250  ;;  %v4273_v41 = vpop.xlane.xlu0 %1253 }
 0x18b   :  { %6789 = vst [vmem:[#allocation92_spill] sm:$0xff] %v4271_v29  ;;  %6790 = vst [vmem:[#allocation93_spill] sm:$0xff] %v4273_v41 }
 0x18e   :  { %v4275_v25 = vpop.xlane.xlu1 %1256  ;;  %v4277_v37 = vpop.xlane.xlu0 %1259 }
 0x18f   :  { %6791 = vst [vmem:[#allocation94_spill] sm:$0xff] %v4275_v25  ;;  %6792 = vst [vmem:[#allocation95_spill] sm:$0xff] %v4277_v37 }
 0x192   :  { %v4279_v31 = vpop.xlane.xlu1 %1262  ;;  %v4281_v0 = vpop.xlane.xlu0 %1265 }
 0x193   :  { %6793 = vst [vmem:[#allocation96_spill] sm:$0xff] %v4279_v31  ;;  %6794 = vst [vmem:[#allocation97_spill] sm:$0xff] %v4281_v0 }
 0x196   :  { %v4283_v8 = vpop.xlane.xlu1 %1268  ;;  %v4285_v62 = vpop.xlane.xlu0 %1271 }
 0x197   :  { %6795 = vst [vmem:[#allocation98_spill] sm:$0xff] %v4283_v8  ;;  %6796 = vst [vmem:[#allocation99_spill] sm:$0xff] %v4285_v62  ;;  %v1434_v8 = vlaneseq }
 0x19a   :  { %v4287_v32 = vpop.xlane.xlu1 %1274  ;;  %v4289_v49 = vpop.xlane.xlu0 %1277 }
 0x19b   :  { %6797 = vst [vmem:[#allocation100_spill] sm:$0xff] %v4287_v32  ;;  %6798 = vst [vmem:[#allocation101_spill] sm:$0xff] %v4289_v49  ;;  %v4309_v49 = vand.u32 127, %v1434_v8 }
 0x19e   :  { %v4291_v45 = vpop.xlane.xlu1 %1280  ;;  %v4293_v29 = vpop.xlane.xlu0 %1283 }
 0x19f   :  { %6799 = vst [vmem:[#allocation102_spill] sm:$0xff] %v4291_v45  ;;  %6800 = vst [vmem:[#allocation103_spill] sm:$0xff] %v4293_v29 }
 0x1a2   :  { %v4295_v41 = vpop.xlane.xlu1 %1286  ;;  %v4297_v25 = vpop.xlane.xlu0 %1289 }
 0x1a3   :  { %6801 = vst [vmem:[#allocation104_spill] sm:$0xff] %v4295_v41  ;;  %6802 = vst [vmem:[#allocation105_spill] sm:$0xff] %v4297_v25 }
 0x1a6   :  { %v4299_v37 = vpop.xlane.xlu1 %1292  ;;  %v4301_v31 = vpop.xlane.xlu0 %1295 }
 0x1a7   :  { %6803 = vst [vmem:[#allocation106_spill] sm:$0xff] %v4299_v37  ;;  %6804 = vst [vmem:[#allocation107_spill] sm:$0xff] %v4301_v31  ;;  %v3230_v37 = vld [vmem:[%s6477_s0 + $0x8] sm:$0xff] }
 0x1aa   :  { %v4303_v0 = vpop.xlane.xlu1 %1298  ;;  %v4305_v62 = vpop.xlane.xlu0 %1301 }
 0x1ab   :  { %6805 = vst [vmem:[#allocation108_spill] sm:$0xff] %v4303_v0  ;;  %6806 = vst [vmem:[#allocation109_spill] sm:$0xff] %v4305_v62  ;;  %v3231_v0 = vld [vmem:[%s6477_s0] sm:$0xff] }
 0x1ae   :  { %v4307_v32 = vpop.xlane.xlu1 %1304 }
 0x1af   :  { %6807 = vst [vmem:[#allocation110_spill] sm:$0xff] %v4307_v32 }
 0x1b2   :  { %v1441_v45 = vpop.permute.xlu1 %1440  ;;  %v1438_v33 = vpop.permute.xlu0 %1437 }
 0x1b3   :  { %vm1629_vm13 = vcmp.eq.s32.totalorder %v4309_v49, %v1441_v45  ;;  %vm1628_vm14 = vcmp.eq.s32.totalorder %v4309_v49, %v1438_v33  ;;  %v3232_v45 = vld [vmem:[%s6477_s0 + $0x10] sm:$0xff] }
 0x1b4   :  { %v1693_v31 = vsel %vm1629_vm13, %v3230_v37, 0.0  ;;  %v1692_v62 = vsel %vm1628_vm14, %v3231_v0, 0.0  ;;  %vm501_vm13 = vcmp.gt.s32.totalorder %v4378_v38, 0 }
 0x1b5   :  { %v1759_v32 = vsel %vm729_vm0, %v1693_v31, 0.0  ;;  %v1756_v8 = vsel %vm729_vm0, %v1692_v62, 0.0  ;;  %v3233_v62 = vld [vmem:[%s6477_s0 + $0x18] sm:$0xff] }
 0x1b6   :  { %v1444_v25 = vpop.permute.xlu1 %1443  ;;  %1760 = vadd.xlane.f32.xlu0 %v1759_v32  ;;  %1757 = vadd.xlane.f32.xlu1 %v1756_v8 }
 0x1b7   :  { %vm1630_vm15 = vcmp.eq.s32.totalorder %v4309_v49, %v1444_v25  ;;  %v3234_v25 = vld [vmem:[%s6477_s0 + $0x20] sm:$0xff] }
 0x1b8   :  { %v1694_v33 = vsel %vm1630_vm15, %v3232_v45, 0.0  ;;  %vm505_vm15 = vcmp.gt.s32.totalorder %v102_v46, 0 }
 0x1b9   :  { %v1762_v37 = vsel %vm729_vm0, %v1694_v33, 0.0  ;;  %v506_v63 = vsel %vm505_vm15, %v102_v46, 0 }
 0x1ba   :  { %v1447_v41 = vpop.permute.xlu1 %1446  ;;  %1763 = vadd.xlane.f32.xlu1 %v1762_v37 }
 0x1bb   :  { %vm1631_vm1 = vcmp.eq.s32.totalorder %v4309_v49, %v1447_v41  ;;  %v3235_v41 = vld [vmem:[%s6477_s0 + $0x28] sm:$0xff] }
 0x1bc   :  { %v1695_v0 = vsel %vm1631_vm1, %v3233_v62, 0.0 }
 0x1bd   :  { %v1765_v32 = vsel %vm729_vm0, %v1695_v0, 0.0  ;;  %v4344_v0 = vld [vmem:[%s6478_s1 + $0x30] sm:$0xff] }
 0x1be   :  { %v1450_v31 = vpop.permute.xlu1 %1449  ;;  %1766 = vadd.xlane.f32.xlu0 %v1765_v32  ;;  %vm485_vm4 = vcmp.gt.s32.totalorder %v4344_v0, 0  ;;  %v4350_v32 = vld [vmem:[%s6478_s1 + $0x38] sm:$0xff] }
 0x1bf   :  { %vm1632_vm2 = vcmp.eq.s32.totalorder %v4309_v49, %v1450_v31  ;;  %v486_v31 = vsel %vm485_vm4, %v4344_v0, 0  ;;  %vm487_vm5 = vcmp.gt.s32.totalorder %v4350_v32, 0 }
 0x1c0   :  { %v1696_v8 = vsel %vm1632_vm2, %v3234_v25, 0.0  ;;  %v4357_v25 = vld [vmem:[%s6478_s1 + $0x40] sm:$0xff]  ;;  %vm613_vm6 = vcmp.lt.s32.totalorder %v486_v31, 15  ;;  %vm509_vm2 = vcmp.gt.s32.totalorder %v104_v21, 0 }
 0x1c1   :  { %v1768_v45 = vsel %vm729_vm0, %v1696_v8, 0.0  ;;  %v488_v8 = vsel %vm487_vm5, %v4350_v32, 0  ;;  %vm489_vm7 = vcmp.gt.s32.totalorder %v4357_v25, 0  ;;  %v510_v36 = vsel %vm509_vm2, %v104_v21, 0 }
 0x1c2   :  { %v1453_v33 = vpop.permute.xlu1 %1452  ;;  %1769 = vadd.xlane.f32.xlu1 %v1768_v45  ;;  %v614_v45 = vsel %vm613_vm6, %v486_v31, 15  ;;  %vm615_vm8 = vcmp.lt.s32.totalorder %v488_v8, 15  ;;  %vm637_vm5 = vcmp.lt.s32.totalorder %v510_v36, 15 }
 0x1c3   :  { %vm1633_vm3 = vcmp.eq.s32.totalorder %v4309_v49, %v1453_v33  ;;  %v4364_v33 = vld [vmem:[%s6478_s1 + $0x50] sm:$0xff]  ;;  %v638_v46 = vsel %vm637_vm5, %v510_v36, 15  ;;  %v114_v36 = vld [vmem:[%s6478_s1 + $0xe0] sm:$0xff] }
 0x1c4   :  { %v1697_v37 = vsel %vm1633_vm3, %v3235_v41, 0.0  ;;  %v490_v41 = vsel %vm489_vm7, %v4357_v25, 0  ;;  %vm493_vm9 = vcmp.gt.s32.totalorder %v4364_v33, 0  ;;  %vm633_vm3 = vcmp.lt.s32.totalorder %v506_v63, 15 }
 0x1c5   :  { %v1771_v62 = vsel %vm729_vm0, %v1697_v37, 0.0  ;;  %v616_v37 = vsel %vm615_vm8, %v488_v8, 15  ;;  %vm617_vm10 = vcmp.lt.s32.totalorder %v490_v41, 15  ;;  %v494_v31 = vsel %vm493_vm9, %v4364_v33, 0 }
 0x1c6   :  { %1772 = vadd.xlane.f32.xlu1 %v1771_v62  ;;  %v4371_v62 = vld [vmem:[%s6478_s1 + $0x60] sm:$0xff]  ;;  %v618_v29 = vsel %vm617_vm10, %v490_v41, 15  ;;  %vm621_vm12 = vcmp.lt.s32.totalorder %v494_v31, 15 }
 0x1c7   :  { %vm497_vm11 = vcmp.gt.s32.totalorder %v4371_v62, 0 }
 0x1c8   :  { %v498_v8 = vsel %vm497_vm11, %v4371_v62, 0 }
 0x1c9   :  { %vm625_vm14 = vcmp.lt.s32.totalorder %v498_v8, 15 }
 0x1ca   :  { %v626_v41 = vsel %vm625_vm14, %v498_v8, 15  ;;  %v108_v8 = vld [vmem:[%s6478_s1 + $0xb0] sm:$0xff] }
 0x1cb   :  { %vm517_vm6 = vcmp.gt.s32.totalorder %v108_v8, 0 }
 0x1d7   :  { %1455 = vperm.xlu1 %2973, %v614_v45   ;;  %v622_v45 = vsel %vm621_vm12, %v494_v31, 15  ;;  %v106_v31 = vld [vmem:[%s6478_s1 + $0xa0] sm:$0xff]  ;;  %vm529_vm12 = vcmp.gt.s32.totalorder %v114_v36, 0 }
 0x1d8   :  { %vm513_vm4 = vcmp.gt.s32.totalorder %v106_v31, 0 }
 0x1d9   :  { %v514_v53 = vsel %vm513_vm4, %v106_v31, 0 }
 0x1da   :  { %vm641_vm7 = vcmp.lt.s32.totalorder %v514_v53, 15 }
 0x1db   :  { %1458 = vperm.xlu1 %2973, %v616_v37   ;;  %v502_v37 = vsel %vm501_vm13, %v4378_v38, 0  ;;  %v642_v21 = vsel %vm641_vm7, %v514_v53, 15  ;;  %v116_v53 = vld [vmem:[%s6478_s1 + $0xf0] sm:$0xff] }
 0x1dc   :  { %vm629_vm1 = vcmp.lt.s32.totalorder %v502_v37, 15  ;;  %vm533_vm14 = vcmp.gt.s32.totalorder %v116_v53, 0 }
 0x1df   :  { %1461 = vperm.xlu1 %2973, %v618_v29   ;;  %v630_v29 = vsel %vm629_vm1, %v502_v37, 15  ;;  %v110_v37 = vld [vmem:[%s6478_s1 + $0xc0] sm:$0xff] }
 0x1e0   :  { %vm521_vm8 = vcmp.gt.s32.totalorder %v110_v37, 0 }
 0x1e3   :  { %1467 = vperm.xlu1 %2973, %v622_v45   ;;  %v634_v45 = vsel %vm633_vm3, %v506_v63, 15  ;;  %v112_v63 = vld [vmem:[%s6478_s1 + $0xd0] sm:$0xff] }
 0x1e4   :  { %vm525_vm10 = vcmp.gt.s32.totalorder %v112_v63, 0 }
 0x1e7   :  { %1473 = vperm.xlu1 %2973, %v626_v41   ;;  %v518_v41 = vsel %vm517_vm6, %v108_v8, 0 }
 0x1e8   :  { %vm645_vm9 = vcmp.lt.s32.totalorder %v518_v41, 15 }
 0x1e9   :  { %v646_v31 = vsel %vm645_vm9, %v518_v41, 15  ;;  %v118_v41 = vld [vmem:[%s6478_s1 + $0x100] sm:$0xff] }
 0x1ea   :  { %vm537_vm1 = vcmp.gt.s32.totalorder %v118_v41, 0 }
 0x1eb   :  { %1479 = vperm.xlu1 %2973, %v630_v29   ;;  %v522_v29 = vsel %vm521_vm8, %v110_v37, 0 }
 0x1ec   :  { %vm649_vm11 = vcmp.lt.s32.totalorder %v522_v29, 15 }
 0x1ed   :  { %v650_v8 = vsel %vm649_vm11, %v522_v29, 15  ;;  %v120_v29 = vld [vmem:[%s6478_s1 + $0x110] sm:$0xff] }
 0x1ee   :  { %vm541_vm3 = vcmp.gt.s32.totalorder %v120_v29, 0 }
 0x1ef   :  { %1485 = vperm.xlu1 %2973, %v634_v45   ;;  %v526_v45 = vsel %vm525_vm10, %v112_v63, 0 }
 0x1f0   :  { %vm653_vm13 = vcmp.lt.s32.totalorder %v526_v45, 15 }
 0x1f1   :  { %v654_v37 = vsel %vm653_vm13, %v526_v45, 15  ;;  %v123_v45 = vld [vmem:[%s6478_s1 + $0x128] sm:$0xff] }
 0x1f2   :  { %vm547_vm5 = vcmp.gt.s32.totalorder %v123_v45, 0 }
 0x1f3   :  { %1491 = vperm.xlu1 %2973, %v638_v46   ;;  %v530_v46 = vsel %vm529_vm12, %v114_v36, 0 }
 0x1f4   :  { %vm657_vm15 = vcmp.lt.s32.totalorder %v530_v46, 15 }
 0x1f5   :  { %v658_v63 = vsel %vm657_vm15, %v530_v46, 15  ;;  %v124_v46 = vld [vmem:[%s6478_s1 + $0x130] sm:$0xff] }
 0x1f6   :  { %vm549_vm7 = vcmp.gt.s32.totalorder %v124_v46, 0 }
 0x1f7   :  { %1497 = vperm.xlu1 %2973, %v642_v21   ;;  %v534_v21 = vsel %vm533_vm14, %v116_v53, 0 }
 0x1f8   :  { %vm661_vm2 = vcmp.lt.s32.totalorder %v534_v21, 15 }
 0x1f9   :  { %v662_v36 = vsel %vm661_vm2, %v534_v21, 15  ;;  %v126_v21 = vld [vmem:[%s6478_s1 + $0x140] sm:$0xff] }
 0x1fa   :  { %vm553_vm9 = vcmp.gt.s32.totalorder %v126_v21, 0 }
 0x1fb   :  { %1503 = vperm.xlu1 %2973, %v646_v31   ;;  %v538_v31 = vsel %vm537_vm1, %v118_v41, 0 }
 0x1fc   :  { %vm665_vm4 = vcmp.lt.s32.totalorder %v538_v31, 15 }
 0x1fd   :  { %v666_v53 = vsel %vm665_vm4, %v538_v31, 15  ;;  %v127_v31 = vld [vmem:[%s6478_s1 + $0x148] sm:$0xff] }
 0x1fe   :  { %vm555_vm11 = vcmp.gt.s32.totalorder %v127_v31, 0 }
 0x1ff   :  { %1509 = vperm.xlu1 %2973, %v650_v8   ;;  %v542_v8 = vsel %vm541_vm3, %v120_v29, 0 }
 0x200   :  { %vm669_vm6 = vcmp.lt.s32.totalorder %v542_v8, 15 }
 0x201   :  { %v670_v41 = vsel %vm669_vm6, %v542_v8, 15  ;;  %v556_v8 = vsel %vm555_vm11, %v127_v31, 0 }
 0x202   :  { %vm683_vm13 = vcmp.lt.s32.totalorder %v556_v8, 15 }
 0x203   :  { %1515 = vperm.xlu1 %2973, %v654_v37   ;;  %v548_v37 = vsel %vm547_vm5, %v123_v45, 0  ;;  %v684_v40 = vsel %vm683_vm13, %v556_v8, 15 }
 0x204   :  { %vm675_vm8 = vcmp.lt.s32.totalorder %v548_v37, 15 }
 0x205   :  { %v676_v29 = vsel %vm675_vm8, %v548_v37, 15 }
 0x207   :  { %1521 = vperm.xlu1 %2973, %v658_v63   ;;  %v550_v63 = vsel %vm549_vm7, %v124_v46, 0 }
 0x208   :  { %vm677_vm10 = vcmp.lt.s32.totalorder %v550_v63, 15 }
 0x209   :  { %v678_v45 = vsel %vm677_vm10, %v550_v63, 15  ;;  %v3236_v63 = vld [vmem:[%s6477_s0 + $0x30] sm:$0xff] }
 0x20b   :  { %1527 = vperm.xlu1 %2973, %v662_v36   ;;  %v554_v36 = vsel %vm553_vm9, %v126_v21, 0 }
 0x20c   :  { %vm681_vm12 = vcmp.lt.s32.totalorder %v554_v36, 15 }
 0x20f   :  { %1533 = vperm.xlu1 %2973, %v666_v53   ;;  %v682_v53 = vsel %vm681_vm12, %v554_v36, 15  ;;  %v3237_v36 = vld [vmem:[%s6477_s0 + $0x38] sm:$0xff] }
 0x213   :  { %1539 = vperm.xlu1 %2973, %v670_v41  }
 0x217   :  { %1548 = vperm.xlu1 %2973, %v676_v29  }
 0x21b   :  { %1551 = vperm.xlu1 %2973, %v678_v45  }
 0x21f   :  { %1557 = vperm.xlu1 %2973, %v682_v53  }
 0x223   :  { %1560 = vperm.xlu1 %2973, %v684_v40  }
 0x243   :  { %v4425_v46 = vpop.xlane.xlu1 %1757 }
 0x244   :  { %6808 = vst [vmem:[#allocation111_spill] sm:$0xff] %v4425_v46  ;;  %v4492_v46 = vld [vmem:[%s6478_s1 + $0xa8] sm:$0xff] }
 0x245   :  { %6815 = vst [vmem:[#allocation118_spill] sm:$0xff] %v4492_v46  ;;  %vm515_vm13 = vcmp.gt.s32.totalorder %v4492_v46, 0 }
 0x247   :  { %v4427_v37 = vpop.xlane.xlu1 %1763 }
 0x248   :  { %6809 = vst [vmem:[#allocation112_spill] sm:$0xff] %v4427_v37  ;;  %v4485_v37 = vld [vmem:[%s6478_s1 + $0x98] sm:$0xff] }
 0x249   :  { %6814 = vst [vmem:[#allocation117_spill] sm:$0xff] %v4485_v37  ;;  %vm511_vm11 = vcmp.gt.s32.totalorder %v4485_v37, 0 }
 0x24f   :  { %v4429_v41 = vpop.xlane.xlu1 %1769 }
 0x250   :  { %6810 = vst [vmem:[#allocation113_spill] sm:$0xff] %v4429_v41 }
 0x253   :  { %v4431_v57 = vpop.xlane.xlu1 %1772 }
 0x254   :  { %6811 = vst [vmem:[#allocation114_spill] sm:$0xff] %v4431_v57  ;;  %v4478_v57 = vld [vmem:[%s6478_s1 + $0x88] sm:$0xff] }
 0x255   :  { %6813 = vst [vmem:[#allocation116_spill] sm:$0xff] %v4478_v57  ;;  %vm507_vm9 = vcmp.gt.s32.totalorder %v4478_v57, 0 }
 0x257   :  { %v1456_v21 = vpop.permute.xlu1 %1455 }
 0x258   :  { %vm1634_vm14 = vcmp.eq.s32.totalorder %v4309_v49, %v1456_v21  ;;  %v3238_v21 = vld [vmem:[%s6477_s0 + $0x40] sm:$0xff] }
 0x259   :  { %v1698_v29 = vsel %vm1634_vm14, %v3236_v63, 0.0 }
 0x25a   :  { %v1774_v31 = vsel %vm729_vm0, %v1698_v29, 0.0 }
 0x25b   :  { %1775 = vadd.xlane.f32.xlu0 %v1774_v31  ;;  %v1459_v40 = vpop.permute.xlu1 %1458  ;;  %v4451_v31 = vld [vmem:[%s6478_s1 + $0x48] sm:$0xff] }
 0x25c   :  { %vm1635_vm15 = vcmp.eq.s32.totalorder %v4309_v49, %v1459_v40  ;;  %vm491_vm2 = vcmp.gt.s32.totalorder %v4451_v31, 0  ;;  %v4457_v40 = vld [vmem:[%s6478_s1 + $0x58] sm:$0xff] }
 0x25d   :  { %v1699_v45 = vsel %vm1635_vm15, %v3237_v36, 0.0  ;;  %v492_v36 = vsel %vm491_vm2, %v4451_v31, 0  ;;  %vm495_vm3 = vcmp.gt.s32.totalorder %v4457_v40, 0  ;;  %vm519_vm15 = vcmp.gt.s32.totalorder %v109_v44, 0 }
 0x25e   :  { %v1777_v8 = vsel %vm729_vm0, %v1699_v45, 0.0  ;;  %v4464_v45 = vld [vmem:[%s6478_s1 + $0x68] sm:$0xff]  ;;  %vm619_vm4 = vcmp.lt.s32.totalorder %v492_v36, 15  ;;  %v520_v48 = vsel %vm519_vm15, %v109_v44, 0  ;;  %vm523_vm2 = vcmp.gt.s32.totalorder %v111_v61, 0 }
 0x25f   :  { %1778 = vadd.xlane.f32.xlu1 %v1777_v8  ;;  %v1462_v53 = vpop.permute.xlu1 %1461  ;;  %v496_v8 = vsel %vm495_vm3, %v4457_v40, 0  ;;  %vm499_vm5 = vcmp.gt.s32.totalorder %v4464_v45, 0  ;;  %vm647_vm3 = vcmp.lt.s32.totalorder %v520_v48, 15  ;;  %v524_v17 = vsel %vm523_vm2, %v111_v61, 0 }
 0x260   :  { %vm1636_vm1 = vcmp.eq.s32.totalorder %v4309_v49, %v1462_v53  ;;  %v620_v53 = vsel %vm619_vm4, %v492_v36, 15  ;;  %vm623_vm6 = vcmp.lt.s32.totalorder %v496_v8, 15 }
 0x261   :  { %v1700_v63 = vsel %vm1636_vm1, %v3238_v21, 0.0  ;;  %v4471_v21 = vld [vmem:[%s6478_s1 + $0x78] sm:$0xff] }
 0x262   :  { %v1780_v29 = vsel %vm729_vm0, %v1700_v63, 0.0  ;;  %6812 = vst [vmem:[#allocation115_spill] sm:$0xff] %v4471_v21  ;;  %v500_v63 = vsel %vm499_vm5, %v4464_v45, 0  ;;  %vm503_vm7 = vcmp.gt.s32.totalorder %v4471_v21, 0  ;;  %vm651_vm5 = vcmp.lt.s32.totalorder %v524_v17, 15 }
 0x263   :  { %1781 = vadd.xlane.f32.xlu1 %v1780_v29  ;;  %v624_v29 = vsel %vm623_vm6, %v496_v8, 15  ;;  %vm627_vm8 = vcmp.lt.s32.totalorder %v500_v63, 15  ;;  %v504_v36 = vsel %vm503_vm7, %v4471_v21, 0  ;;  %v508_v8 = vsel %vm507_vm9, %v4478_v57, 0 }
 0x264   :  { %v628_v41 = vsel %vm627_vm8, %v500_v63, 15  ;;  %vm631_vm10 = vcmp.lt.s32.totalorder %v504_v36, 15  ;;  %vm635_vm12 = vcmp.lt.s32.totalorder %v508_v8, 15  ;;  %v512_v63 = vsel %vm511_vm11, %v4485_v37, 0 }
 0x265   :  { %vm639_vm14 = vcmp.lt.s32.totalorder %v512_v63, 15  ;;  %v652_v44 = vsel %vm651_vm5, %v524_v17, 15  ;;  %v121_v17 = vld [vmem:[%s6478_s1 + $0x118] sm:$0xff] }
 0x271   :  { %1464 = vperm.xlu0 %2972, %v620_v53   ;;  %v632_v53 = vsel %vm631_vm10, %v504_v36, 15  ;;  %v640_v36 = vsel %vm639_vm14, %v512_v63, 15  ;;  %v115_v63 = vld [vmem:[%s6478_s1 + $0xe8] sm:$0xff] }
 0x272   :  { %vm531_vm6 = vcmp.gt.s32.totalorder %v115_v63, 0 }
 0x275   :  { %1470 = vperm.xlu0 %2972, %v624_v29   ;;  %v636_v29 = vsel %vm635_vm12, %v508_v8, 15  ;;  %v113_v8 = vld [vmem:[%s6478_s1 + $0xd8] sm:$0xff]  ;;  %vm543_vm12 = vcmp.gt.s32.totalorder %v121_v17, 0 }
 0x276   :  { %vm527_vm4 = vcmp.gt.s32.totalorder %v113_v8, 0 }
 0x279   :  { %1476 = vperm.xlu0 %2972, %v628_v41   ;;  %v516_v41 = vsel %vm515_vm13, %v4492_v46, 0  ;;  %v528_v46 = vsel %vm527_vm4, %v113_v8, 0 }
 0x27a   :  { %vm643_vm1 = vcmp.lt.s32.totalorder %v516_v41, 15  ;;  %vm655_vm7 = vcmp.lt.s32.totalorder %v528_v46, 15 }
 0x27b   :  { %v656_v61 = vsel %vm655_vm7, %v528_v46, 15  ;;  %v122_v46 = vld [vmem:[%s6478_s1 + $0x120] sm:$0xff] }
 0x27c   :  { %vm545_vm14 = vcmp.gt.s32.totalorder %v122_v46, 0 }
 0x27d   :  { %1482 = vperm.xlu0 %2972, %v632_v53   ;;  %v644_v53 = vsel %vm643_vm1, %v516_v41, 15  ;;  %v117_v41 = vld [vmem:[%s6478_s1 + $0xf8] sm:$0xff] }
 0x27e   :  { %vm535_vm8 = vcmp.gt.s32.totalorder %v117_v41, 0 }
 0x281   :  { %1488 = vperm.xlu0 %2972, %v636_v29   ;;  %v648_v29 = vsel %vm647_vm3, %v520_v48, 15  ;;  %v119_v48 = vld [vmem:[%s6478_s1 + $0x108] sm:$0xff] }
 0x282   :  { %vm539_vm10 = vcmp.gt.s32.totalorder %v119_v48, 0 }
 0x285   :  { %1494 = vperm.xlu0 %2972, %v640_v36   ;;  %v532_v36 = vsel %vm531_vm6, %v115_v63, 0 }
 0x286   :  { %vm659_vm9 = vcmp.lt.s32.totalorder %v532_v36, 15 }
 0x287   :  { %v660_v8 = vsel %vm659_vm9, %v532_v36, 15  ;;  %v125_v36 = vld [vmem:[%s6478_s1 + $0x138] sm:$0xff] }
 0x288   :  { %vm551_vm1 = vcmp.gt.s32.totalorder %v125_v36, 0 }
 0x289   :  { %1500 = vperm.xlu0 %2972, %v644_v53   ;;  %v536_v53 = vsel %vm535_vm8, %v117_v41, 0 }
 0x28a   :  { %vm663_vm11 = vcmp.lt.s32.totalorder %v536_v53, 15 }
 0x28b   :  { %v664_v63 = vsel %vm663_vm11, %v536_v53, 15  ;;  %v128_v53 = vld [vmem:[%s6478_s1 + $0x150] sm:$0xff] }
 0x28c   :  { %vm557_vm3 = vcmp.gt.s32.totalorder %v128_v53, 0 }
 0x28d   :  { %1506 = vperm.xlu0 %2972, %v648_v29   ;;  %v540_v29 = vsel %vm539_vm10, %v119_v48, 0 }
 0x28e   :  { %vm667_vm13 = vcmp.lt.s32.totalorder %v540_v29, 15 }
 0x28f   :  { %v668_v41 = vsel %vm667_vm13, %v540_v29, 15  ;;  %v129_v29 = vld [vmem:[%s6478_s1 + $0x158] sm:$0xff] }
 0x290   :  { %vm559_vm5 = vcmp.gt.s32.totalorder %v129_v29, 0 }
 0x291   :  { %1512 = vperm.xlu0 %2972, %v652_v44   ;;  %v544_v44 = vsel %vm543_vm12, %v121_v17, 0 }
 0x292   :  { %vm671_vm15 = vcmp.lt.s32.totalorder %v544_v44, 15 }
 0x293   :  { %v672_v48 = vsel %vm671_vm15, %v544_v44, 15  ;;  %v130_v44 = vld [vmem:[%s6478_s1 + $0x160] sm:$0xff] }
 0x294   :  { %vm561_vm7 = vcmp.gt.s32.totalorder %v130_v44, 0 }
 0x295   :  { %1518 = vperm.xlu0 %2972, %v656_v61   ;;  %v546_v61 = vsel %vm545_vm14, %v122_v46, 0 }
 0x296   :  { %vm673_vm2 = vcmp.lt.s32.totalorder %v546_v61, 15 }
 0x297   :  { %v674_v17 = vsel %vm673_vm2, %v546_v61, 15  ;;  %v131_v61 = vld [vmem:[%s6478_s1 + $0x168] sm:$0xff] }
 0x298   :  { %vm563_vm9 = vcmp.gt.s32.totalorder %v131_v61, 0 }
 0x299   :  { %1524 = vperm.xlu0 %2972, %v660_v8   ;;  %v552_v8 = vsel %vm551_vm1, %v125_v36, 0 }
 0x29a   :  { %vm679_vm4 = vcmp.lt.s32.totalorder %v552_v8, 15 }
 0x29b   :  { %v680_v46 = vsel %vm679_vm4, %v552_v8, 15  ;;  %v132_v8 = vld [vmem:[%s6478_s1 + $0x170] sm:$0xff] }
 0x29c   :  { %vm565_vm11 = vcmp.gt.s32.totalorder %v132_v8, 0 }
 0x29d   :  { %1530 = vperm.xlu0 %2972, %v664_v63   ;;  %v558_v63 = vsel %vm557_vm3, %v128_v53, 0 }
 0x29e   :  { %vm685_vm6 = vcmp.lt.s32.totalorder %v558_v63, 15 }
 0x29f   :  { %v686_v36 = vsel %vm685_vm6, %v558_v63, 15  ;;  %v133_v63 = vld [vmem:[%s6478_s1 + $0x178] sm:$0xff] }
 0x2a0   :  { %vm567_vm13 = vcmp.gt.s32.totalorder %v133_v63, 0 }
 0x2a1   :  { %1536 = vperm.xlu0 %2972, %v668_v41   ;;  %v560_v41 = vsel %vm559_vm5, %v129_v29, 0 }
 0x2a2   :  { %vm687_vm8 = vcmp.lt.s32.totalorder %v560_v41, 15 }
 0x2a3   :  { %v688_v53 = vsel %vm687_vm8, %v560_v41, 15  ;;  %v134_v41 = vld [vmem:[%s6478_s1 + $0x180] sm:$0xff] }
 0x2a4   :  { %vm569_vm15 = vcmp.gt.s32.totalorder %v134_v41, 0 }
 0x2a5   :  { %1542 = vperm.xlu0 %2972, %v672_v48   ;;  %v562_v48 = vsel %vm561_vm7, %v130_v44, 0 }
 0x2a6   :  { %vm689_vm10 = vcmp.lt.s32.totalorder %v562_v48, 15 }
 0x2a7   :  { %v690_v29 = vsel %vm689_vm10, %v562_v48, 15  ;;  %v135_v48 = vld [vmem:[%s6478_s1 + $0x188] sm:$0xff] }
 0x2a8   :  { %vm571_vm2 = vcmp.gt.s32.totalorder %v135_v48, 0 }
 0x2a9   :  { %1545 = vperm.xlu0 %2972, %v674_v17   ;;  %v564_v17 = vsel %vm563_vm9, %v131_v61, 0 }
 0x2aa   :  { %vm691_vm12 = vcmp.lt.s32.totalorder %v564_v17, 15 }
 0x2ab   :  { %v692_v44 = vsel %vm691_vm12, %v564_v17, 15  ;;  %v136_v17 = vld [vmem:[%s6478_s1 + $0x190] sm:$0xff]  ;;  %vm581_vm12 = vcmp.gt.s32.totalorder %v140_v2, 0 }
 0x2ac   :  { %vm573_vm4 = vcmp.gt.s32.totalorder %v136_v17, 0 }
 0x2ad   :  { %1554 = vperm.xlu0 %2972, %v680_v46   ;;  %v566_v46 = vsel %vm565_vm11, %v132_v8, 0 }
 0x2ae   :  { %vm693_vm14 = vcmp.lt.s32.totalorder %v566_v46, 15 }
 0x2af   :  { %v694_v61 = vsel %vm693_vm14, %v566_v46, 15  ;;  %v137_v46 = vld [vmem:[%s6478_s1 + $0x198] sm:$0xff]  ;;  %vm583_vm14 = vcmp.gt.s32.totalorder %v141_v12, 0 }
 0x2b0   :  { %vm575_vm6 = vcmp.gt.s32.totalorder %v137_v46, 0 }
 0x2b1   :  { %1563 = vperm.xlu0 %2972, %v686_v36   ;;  %v568_v36 = vsel %vm567_vm13, %v133_v63, 0 }
 0x2b2   :  { %vm695_vm1 = vcmp.lt.s32.totalorder %v568_v36, 15 }
 0x2b3   :  { %v696_v8 = vsel %vm695_vm1, %v568_v36, 15 }
 0x2b5   :  { %1566 = vperm.xlu0 %2972, %v688_v53   ;;  %v570_v53 = vsel %vm569_vm15, %v134_v41, 0  ;;  %v4554_v41 = vpop.permute.xlu1 %1467 }
 0x2b6   :  { %vm697_vm3 = vcmp.lt.s32.totalorder %v570_v53, 15 }
 0x2b7   :  { %v698_v63 = vsel %vm697_vm3, %v570_v53, 15  ;;  %vm281_vm3 = vcmp.ne.s32.totalorder %v4147_v16, 4294967295 }
 0x2b9   :  { %1569 = vperm.xlu0 %2972, %v690_v29   ;;  %v572_v29 = vsel %vm571_vm2, %v135_v48, 0  ;;  %v576_v48 = vsel %vm575_vm6, %v137_v46, 0 }
 0x2ba   :  { %vm699_vm5 = vcmp.lt.s32.totalorder %v572_v29, 15  ;;  %vm703_vm9 = vcmp.lt.s32.totalorder %v576_v48, 15 }
 0x2bb   :  { %v700_v36 = vsel %vm699_vm5, %v572_v29, 15  ;;  %v704_v29 = vsel %vm703_vm9, %v576_v48, 15  ;;  %vm587_vm5 = vcmp.gt.s32.totalorder %v143_v4, 0 }
 0x2bc   :  { %v588_v52 = vsel %vm587_vm5, %v143_v4, 0 }
 0x2bd   :  { %1572 = vperm.xlu0 %2972, %v692_v44   ;;  %v574_v44 = vsel %vm573_vm4, %v136_v17, 0  ;;  %v4562_v17 = vpop.permute.xlu1 %1473  ;;  %vm282_vm4 = vcmp.ne.s32.totalorder %v4142_v58, 4294967295 }
 0x2be   :  { %vm701_vm7 = vcmp.lt.s32.totalorder %v574_v44, 15 }
 0x2bf   :  { %v702_v53 = vsel %vm701_vm7, %v574_v44, 15  ;;  %vm2141_vm7 = vcmask 7168  }
 0x2c1   :  { %1575 = vperm.xlu0 %2972, %v694_v61   ;;  %v138_v61 = vld [vmem:[%s6478_s1 + $0x1a0] sm:$0xff]  ;;  %v4567_v44 = vpop.permute.xlu1 %1479 }
 0x2c2   :  { %vm577_vm8 = vcmp.gt.s32.totalorder %v138_v61, 0 }
 0x2c5   :  { %1578 = vperm.xlu0 %2972, %v696_v8   ;;  %v139_v8 = vld [vmem:[%s6478_s1 + $0x1a8] sm:$0xff] }
 0x2c6   :  { %vm579_vm10 = vcmp.gt.s32.totalorder %v139_v8, 0 }
 0x2c7   :  { %v580_v46 = vsel %vm579_vm10, %v139_v8, 0  ;;  %v4575_v8 = vpop.permute.xlu1 %1485  ;;  %vm715_vm10 = vcmp.lt.s32.totalorder %v588_v52, 15 }
 0x2c8   :  { %vm707_vm13 = vcmp.lt.s32.totalorder %v580_v46, 15 }
 0x2c9   :  { %1581 = vperm.xlu0 %2972, %v698_v63   ;;  %v578_v63 = vsel %vm577_vm8, %v138_v61, 0  ;;  %v582_v61 = vsel %vm581_vm12, %v140_v2, 0  ;;  %v708_v48 = vsel %vm707_vm13, %v580_v46, 15  ;;  %v6567_v46 = vmov 0.0  }
 0x2ca   :  { %vm705_vm11 = vcmp.lt.s32.totalorder %v578_v63, 15  ;;  %vm709_vm15 = vcmp.lt.s32.totalorder %v582_v61, 15  ;;  %vm283_vm8 = vcmp.ne.s32.totalorder %v4154_v28, 4294967295  ;;  %vm591_vm12 = vcmp.gt.s32.totalorder %v145_v11, 0 }
 0x2cd   :  { %1584 = vperm.xlu0 %2972, %v700_v36   ;;  %v706_v36 = vsel %vm705_vm11, %v578_v63, 15  ;;  %v710_v63 = vsel %vm709_vm15, %v582_v61, 15  ;;  %v4588_v61 = vpop.permute.xlu1 %1491  ;;  %vm284_vm11 = vcmp.ne.s32.totalorder %v4162_v34, 4294967295 }
 0x2d1   :  { %1587 = vperm.xlu0 %2972, %v702_v53   ;;  %v142_v53 = vld [vmem:[%s6478_s1 + $0x1c0] sm:$0xff] }
 0x2d2   :  { %vm585_vm1 = vcmp.gt.s32.totalorder %v142_v53, 0 }
 0x2d3   :  { %v586_v2 = vsel %vm585_vm1, %v142_v53, 0  ;;  %v144_v53 = vld [vmem:[%s6478_s1 + $0x1d0] sm:$0xff] }
 0x2d4   :  { %vm713_vm6 = vcmp.lt.s32.totalorder %v586_v2, 15  ;;  %vm589_vm9 = vcmp.gt.s32.totalorder %v144_v53, 0 }
 0x2d5   :  { %1590 = vperm.xlu0 %2972, %v704_v29   ;;  %v584_v29 = vsel %vm583_vm14, %v141_v12, 0  ;;  %v2898_v12 = vsel %vm281_vm3, 1.0, %v6567_v46  ;;  %v714_v58 = vsel %vm713_vm6, %v586_v2, 15  ;;  %v2901_v2 = vsel %vm284_vm11, 1.0, %v6567_v46 }
 0x2d6   :  { %vm711_vm2 = vcmp.lt.s32.totalorder %v584_v29, 15  ;;  %v2742_v37 = vsel %vm2141_vm7, %v2898_v12, 0.0  ;;  %v4606_v12 = vpop.permute.xlu1 %1497  ;;  %vm285_vm14 = vcmp.ne.s32.totalorder %v4171_v55, 4294967295  ;;  %vm1638_vm6 = vcmp.eq.s32.totalorder %v4309_v49, %v4554_v41 }
 0x2d9   :  { %1593 = vperm.xlu0 %2972, %v706_v36   ;;  %v2899_v36 = vsel %vm282_vm4, 1.0, %v6567_v46 }
 0x2da   :  { %v2743_v16 = vsel %vm2141_vm7, %v2899_v36, 0.0  ;;  %v590_v36 = vsel %vm589_vm9, %v144_v53, 0  ;;  %v592_v53 = vsel %vm591_vm12, %v145_v11, 0  ;;  %vm287_vm12 = vcmp.ne.s32.totalorder %v4344_v0, 4294967295  ;;  %v5837_v0 = vld [vmem:[%s6478_s1 + $0x1a0] sm:$0xff] }
 0x2db   :  { %vm717_vm13 = vcmp.lt.s32.totalorder %v590_v36, 15  ;;  %vm719_vm1 = vcmp.lt.s32.totalorder %v592_v53, 15 }
 0x2dc   :  { %v718_v34 = vsel %vm717_vm13, %v590_v36, 15  ;;  %v720_v36 = vsel %vm719_vm1, %v592_v53, 15  ;;  %v3240_v53 = vld [vmem:[%s6477_s0 + $0x50] sm:$0xff] }
 0x2dd   :  { %1596 = vperm.xlu0 %2972, %v708_v48   ;;  %v712_v48 = vsel %vm711_vm2, %v584_v29, 15  ;;  %v2900_v29 = vsel %vm283_vm8, 1.0, %v6567_v46  ;;  %vm286_vm2 = vcmp.ne.s32.totalorder %v4182_v42, 4294967295 }
 0x2de   :  { %v2745_v30 = vsel %vm2141_vm7, %v2900_v29, 0.0  ;;  %v2747_v29 = vsel %vm2141_vm7, %v2901_v2, 0.0 }
 0x2e1   :  { %1599 = vperm.xlu0 %2972, %v710_v63   ;;  %v4593_v63 = vpop.xlane.xlu0 %1760 }
 0x2e2   :  { %6816 = vst [vmem:[#allocation119_spill] sm:$0xff] %v4593_v63  ;;  %v2744_v63 = vadd.f32 %v2743_v16, %v2742_v37  ;;  %v146_v16 = vld [vmem:[%s6478_s1 + $0x1e0] sm:$0xff] }
 0x2e3   :  { %vm593_vm15 = vcmp.gt.s32.totalorder %v146_v16, 0 }
 0x2e4   :  { %v2746_v37 = vadd.f32 %v2745_v30, %v2744_v63  ;;  %v147_v30 = vld [vmem:[%s6478_s1 + $0x1e8] sm:$0xff] }
 0x2e5   :  { %1602 = vperm.xlu0 %2972, %v712_v48   ;;  %v4604_v4 = vpop.xlane.xlu0 %1766  ;;  %v716_v48 = vsel %vm715_vm10, %v588_v52, 15  ;;  %v4623_v52 = vpop.permute.xlu1 %1503  ;;  %vm595_vm5 = vcmp.gt.s32.totalorder %v147_v30, 0 }
 0x2e6   :  { %6817 = vst [vmem:[#allocation120_spill] sm:$0xff] %v4604_v4  ;;  %v2748_v63 = vadd.f32 %v2747_v29, %v2746_v37  ;;  %v3239_v37 = vld [vmem:[%s6477_s0 + $0x48] sm:$0xff]  ;;  %v596_v55 = vsel %vm595_vm5, %v147_v30, 0  ;;  %vm288_vm5 = vcmp.ne.s32.totalorder %v4350_v32, 4294967295  ;;  %v6992_v32 = vld [vmem:[#allocation8_spill] sm:$0xff] }
 0x2e7   :  { %vm723_vm1 = vcmp.lt.s32.totalorder %v596_v55, 15 }
 0x2e9   :  { %1605 = vperm.xlu0 %2972, %v714_v58   ;;  %v4616_v28 = vpop.xlane.xlu0 %1775  ;;  %v2902_v58 = vsel %vm285_vm14, 1.0, %v6567_v46 }
 0x2ea   :  { %6818 = vst [vmem:[#allocation121_spill] sm:$0xff] %v4616_v28  ;;  %v594_v28 = vsel %vm593_vm15, %v146_v16, 0  ;;  %v2749_v2 = vsel %vm2141_vm7, %v2902_v58, 0.0  ;;  %v148_v16 = vld [vmem:[%s6478_s1 + $0x1f0] sm:$0xff]  ;;  %v4642_v58 = vpop.permute.xlu1 %1509 }
 0x2eb   :  { %vm721_vm10 = vcmp.lt.s32.totalorder %v594_v28, 15  ;;  %v2750_v29 = vadd.f32 %v2749_v2, %v2748_v63  ;;  %v1702_v63 = vsel %vm1638_vm6, %v3240_v53, 0.0  ;;  %vm597_vm13 = vcmp.gt.s32.totalorder %v148_v16, 0 }
 0x2ec   :  { %v6819_v2 = vmov 0.0   ;;  %v722_v30 = vsel %vm721_vm10, %v594_v28, 15  ;;  %v598_v4 = vsel %vm597_vm13, %v148_v16, 0  ;;  %v3241_v28 = vld [vmem:[%s6477_s0 + $0x58] sm:$0xff]  ;;  %vm289_vm13 = vcmp.ne.s32.totalorder %v4357_v25, 4294967295  ;;  %v5891_v25 = vld [vmem:[%s6478_s1 + $0x1b0] sm:$0xff] }
 0x2ed   :  { %1608 = vperm.xlu0 %2972, %v716_v48   ;;  %v2903_v48 = vsel %vm286_vm2, 1.0, %v6567_v46  ;;  %v2905_v16 = vsel %vm288_vm5, 1.0, %v6819_v2  ;;  %vm725_vm10 = vcmp.lt.s32.totalorder %v598_v4, 15 }
 0x2f0   :  { %v1465_v11 = vpop.permute.xlu0 %1464 }
 0x2f1   :  { %1611 = vperm.xlu0 %2972, %v718_v34   ;;  %vm1637_vm9 = vcmp.eq.s32.totalorder %v4309_v49, %v1465_v11  ;;  %v2751_v11 = vsel %vm2141_vm7, %v2903_v48, 0.0 }
 0x2f2   :  { %v1701_v34 = vsel %vm1637_vm9, %v3239_v37, 0.0  ;;  %v2904_v37 = vsel %vm287_vm12, 1.0, %v6819_v2  ;;  %v2752_v48 = vadd.f32 %v2751_v11, %v2750_v29  ;;  %vm1640_vm9 = vcmp.eq.s32.totalorder %v4309_v49, %v4562_v17  ;;  %v4668_v29 = vpop.permute.xlu1 %1515  ;;  %v3242_v17 = vld [vmem:[%s6477_s0 + $0x60] sm:$0xff] }
 0x2f3   :  { %v1783_v46 = vsel %vm729_vm0, %v1701_v34, 0.0  ;;  %v2753_v41 = vsel %vm2141_vm7, %v2904_v37, 0.0  ;;  %v724_v11 = vsel %vm723_vm1, %v596_v55, 15  ;;  %v2906_v55 = vsel %vm289_vm13, 1.0, %v6819_v2 }
 0x2f4   :  { %v1471_v42 = vpop.permute.xlu0 %1470  ;;  %1784 = vadd.xlane.f32.xlu1 %v1783_v46  ;;  %v149_v46 = vld [vmem:[%s6478_s1 + $0x1f8] sm:$0xff]  ;;  %v2754_v53 = vadd.f32 %v2753_v41, %v2752_v48  ;;  %v726_v48 = vsel %vm725_vm10, %v598_v4, 15 }
 0x2f5   :  { %1614 = vperm.xlu0 %2972, %v720_v36   ;;  %vm1639_vm15 = vcmp.eq.s32.totalorder %v4309_v49, %v1471_v42  ;;  %v1786_v36 = vsel %vm729_vm0, %v1702_v63, 0.0  ;;  %vm599_vm6 = vcmp.gt.s32.totalorder %v149_v46, 0 }
 0x2f6   :  { %v1703_v42 = vsel %vm1639_vm15, %v3241_v28, 0.0  ;;  %v1704_v28 = vsel %vm1640_vm9, %v3242_v17, 0.0  ;;  %vm6583_vm9 = vcmp.ne.s32.totalorder %v4451_v31, 4294967295 }
 0x2f7   :  { %v1789_v63 = vsel %vm729_vm0, %v1703_v42, 0.0  ;;  %v1792_v42 = vsel %vm729_vm0, %v1704_v28, 0.0 }
 0x2f8   :  { %v1477_v34 = vpop.permute.xlu0 %1476  ;;  %1787 = vadd.xlane.f32.xlu1 %v1786_v36  ;;  %v2755_v36 = vsel %vm2141_vm7, %v2905_v16, 0.0 }
 0x2f9   :  { %1617 = vperm.xlu0 %2972, %v722_v30   ;;  %v600_v30 = vsel %vm599_vm6, %v149_v46, 0  ;;  %vm1641_vm15 = vcmp.eq.s32.totalorder %v4309_v49, %v1477_v34  ;;  %v4683_v46 = vpop.permute.xlu1 %1521  ;;  %v2756_v41 = vadd.f32 %v2755_v36, %v2754_v53  ;;  %vm1642_vm6 = vcmp.eq.s32.totalorder %v4309_v49, %v4567_v44 }
 0x2fa   :  { %vm727_vm1 = vcmp.lt.s32.totalorder %v600_v30, 15  ;;  %v2907_v34 = vsel %vm6583_vm9, 1.0, %v6819_v2 }
 0x2fb   :  { %v728_v4 = vsel %vm727_vm1, %v600_v30, 15  ;;  %v2759_v44 = vsel %vm2141_vm7, %v2907_v34, 0.0  ;;  %vm1644_vm1 = vcmp.eq.s32.totalorder %v4309_v49, %v4575_v8 }
 0x2fc   :  { %v1483_v37 = vpop.permute.xlu0 %1482  ;;  %1790 = vadd.xlane.f32.xlu1 %v1789_v63  ;;  %v3243_v63 = vld [vmem:[%s6477_s0 + $0x68] sm:$0xff]  ;;  %v1708_v8 = vsel %vm1644_vm1, %v3246_v50, 0.0  ;;  %vm1646_vm1 = vcmp.eq.s32.totalorder %v4309_v49, %v4588_v61  ;;  %v3248_v61 = vld [vmem:[%s6477_s0 + $0x90] sm:$0xff] }
 0x2fd   :  { %1620 = vperm.xlu0 %2972, %v724_v11   ;;  %v2757_v11 = vsel %vm2141_vm7, %v2906_v55, 0.0  ;;  %v1705_v17 = vsel %vm1641_vm15, %v3243_v63, 0.0  ;;  %v3244_v55 = vld [vmem:[%s6477_s0 + $0x70] sm:$0xff]  ;;  %v4703_v30 = vpop.permute.xlu1 %1527  ;;  %vm1643_vm10 = vcmp.eq.s32.totalorder %v4309_v49, %v1483_v37  ;;  %vm6574_vm15 = vcmp.ne.s32.totalorder %v4364_v33, 4294967295  ;;  %v3245_v63 = vld [vmem:[%s6477_s0 + $0x78] sm:$0xff] }
 0x2fe   :  { %v2758_v53 = vadd.f32 %v2757_v11, %v2756_v41  ;;  %v1795_v36 = vsel %vm729_vm0, %v1705_v17, 0.0  ;;  %v1707_v17 = vsel %vm1643_vm10, %v3245_v63, 0.0  ;;  %v1710_v50 = vsel %vm1646_vm1, %v3248_v61, 0.0 }
 0x2ff   :  { %vm6577_vm1 = vcmp.ne.s32.totalorder %v4378_v38, 4294967295 }
 0x300   :  { %v1489_v16 = vpop.permute.xlu0 %1488  ;;  %1793 = vadd.xlane.f32.xlu1 %v1792_v42  ;;  %v2760_v11 = vadd.f32 %v2759_v44, %v2758_v53  ;;  %v1801_v53 = vsel %vm729_vm0, %v1707_v17, 0.0  ;;  %v3103_v17 = vpop.eup %3102  ;;  %v2912_v35 = vsel %vm6577_vm1, 1.0, %v6819_v2  ;;  %vm1658_vm1 = vcmp.eq.s32.totalorder %v4309_v49, %v4703_v30 }
 0x301   :  { %1623 = vperm.xlu0 %2972, %v726_v48   ;;  %v1706_v48 = vsel %vm1642_vm6, %v3244_v55, 0.0  ;;  %v4722_v34 = vpop.permute.xlu1 %1533  ;;  %vm6578_vm6 = vcmp.ne.s32.totalorder %v4457_v40, 4294967295  ;;  %vm1645_vm10 = vcmp.eq.s32.totalorder %v4309_v49, %v1489_v16  ;;  %3134 = vlog2.f32 %v4213_v18 }
 0x302   :  { %v1798_v42 = vsel %vm729_vm0, %v1706_v48, 0.0  ;;  %v2909_v13 = vsel %vm6578_vm6, 1.0, %v6819_v2  ;;  %v1804_v48 = vsel %vm729_vm0, %v1708_v8, 0.0 }
 0x303   :  { %v2763_v54 = vsel %vm2141_vm7, %v2909_v13, 0.0 }
 0x304   :  { %v4697_v28 = vpop.permute.xlu0 %1494  ;;  %1796 = vadd.xlane.f32.xlu1 %v1795_v36 }
 0x305   :  { %1626 = vperm.xlu0 %2972, %v728_v4   ;;  %v2908_v4 = vsel %vm6574_vm15, 1.0, %v6819_v2  ;;  %vm6575_vm15 = vcmp.ne.s32.totalorder %v4371_v62, 4294967295  ;;  %v4750_v16 = vpop.permute.xlu1 %1539 }
 0x306   :  { %v2761_v37 = vsel %vm2141_vm7, %v2908_v4, 0.0  ;;  %v2910_v20 = vsel %vm6575_vm15, 1.0, %v6819_v2  ;;  %vm1647_vm15 = vcmp.eq.s32.totalorder %v4309_v49, %v4697_v28 }
 0x307   :  { %v2762_v55 = vadd.f32 %v2761_v37, %v2760_v11  ;;  %v2765_v63 = vsel %vm2141_vm7, %v2910_v20, 0.0  ;;  %v1711_v28 = vsel %vm1647_vm15, %v3249_v22, 0.0  ;;  %vm6582_vm15 = vcmp.ne.s32.totalorder %v4471_v21, 4294967295 }
 0x308   :  { %v4707_v41 = vpop.permute.xlu0 %1500  ;;  %1799 = vadd.xlane.f32.xlu1 %v1798_v42  ;;  %v3247_v42 = vld [vmem:[%s6477_s0 + $0x88] sm:$0xff]  ;;  %v2913_v51 = vsel %vm6582_vm15, 1.0, %v6819_v2 }
 0x309   :  { %v2764_v7 = vadd.f32 %v2763_v54, %v2762_v55  ;;  %v1709_v11 = vsel %vm1645_vm10, %v3247_v42, 0.0  ;;  %vm6576_vm10 = vcmp.ne.s32.totalorder %v4464_v45, 4294967295  ;;  %v3105_v55 = vpop.eup %3104  ;;  %v4771_v54 = vpop.permute.xlu1 %1548  ;;  %vm1649_vm6 = vcmp.eq.s32.totalorder %v4309_v49, %v4707_v41 }
 0x30a   :  { %v1807_v4 = vsel %vm729_vm0, %v1709_v11, 0.0  ;;  %v2911_v59 = vsel %vm6576_vm10, 1.0, %v6819_v2  ;;  %v3107_v23 = vpop.eup %3106  ;;  %v1307_v11 = vmul.f32 0.6931472, %v3103_v17  ;;  %v1309_v20 = vmul.f32 0.6931472, %v3105_v55 }
 0x30b   :  { %v2767_v8 = vsel %vm2141_vm7, %v2911_v59, 0.0  ;;  %v3109_v13 = vpop.eup %3108  ;;  %vm1648_vm10 = vcmp.eq.s32.totalorder %v4309_v49, %v4606_v12  ;;  %v1311_v17 = vmul.f32 0.6931472, %v3107_v23  ;;  %v2771_v27 = vsel %vm2141_vm7, %v2913_v51, 0.0 }
 0x30c   :  { %v4725_v36 = vpop.permute.xlu0 %1506  ;;  %1802 = vadd.xlane.f32.xlu1 %v1801_v53  ;;  %v2766_v53 = vadd.f32 %v2765_v63, %v2764_v7  ;;  %v3111_v43 = vpop.eup %3110  ;;  %v2769_v63 = vsel %vm2141_vm7, %v2912_v35, 0.0  ;;  %v1313_v6 = vmul.f32 0.6931472, %v3109_v13  ;;  %v1712_v12 = vsel %vm1648_vm10, %v3250_v3, 0.0  ;;  %v6820_v13 = vld [vmem:[#allocation17_spill] sm:$0xff]  ;;  %v3251_v35 = vld [vmem:[%s6477_s0 + $0xf0] sm:$0xff] }
 0x30d   :  { %v3113_v55 = vpop.eup %3112  ;;  %v4803_v23 = vpop.permute.xlu1 %1551  ;;  %v1816_v19 = vsel %vm729_vm0, %v1712_v12, 0.0  ;;  %3136 = vlog2.f32 %v4215_v60 }
 0x30e   :  { %v2768_v42 = vadd.f32 %v2767_v8, %v2766_v53  ;;  %v1813_v53 = vsel %vm729_vm0, %v1711_v28, 0.0  ;;  %v3115_v59 = vpop.eup %3114  ;;  %v1317_v12 = vmul.f32 0.6931472, %v3113_v55  ;;  %3138 = vlog2.f32 %v4217_v26 }
 0x30f   :  { %v3117_v8 = vpop.eup %3116  ;;  %3140 = vlog2.f32 %v4219_v10 }
 0x310   :  { %v4739_v44 = vpop.permute.xlu0 %1512  ;;  %1805 = vadd.xlane.f32.xlu1 %v1804_v48  ;;  %v1810_v48 = vsel %vm729_vm0, %v1710_v50, 0.0  ;;  %v2770_v50 = vadd.f32 %v2769_v63, %v2768_v42  ;;  %v4815_v42 = vadd.f32 %v1311_v17, %v3821_v15  ;;  %v3119_v22 = vpop.eup %3118  ;;  %v4833_v15 = vadd.f32 %v1313_v6, %v3829_v47 }
 0x311   :  { %v3121_v3 = vpop.eup %3120  ;;  %v1319_v47 = vmul.f32 0.6931472, %v3115_v59  ;;  %v1321_v51 = vmul.f32 0.6931472, %v3117_v8  ;;  %3142 = vlog2.f32 %v4221_v56  ;;  %vm1653_vm9 = vcmp.eq.s32.totalorder %v4309_v49, %v4739_v44 }
 0x312   :  { %v2772_v63 = vadd.f32 %v2771_v27, %v2770_v50  ;;  %v1323_v27 = vmul.f32 0.6931472, %v3119_v22 }
 0x314   :  { %v4756_v37 = vpop.permute.xlu0 %1518  ;;  %1808 = vadd.xlane.f32.xlu1 %v1807_v4  ;;  %v1315_v4 = vmul.f32 0.6931472, %v3111_v43  ;;  %v4809_v43 = vadd.f32 %v1307_v11, %v6820_v13  ;;  %v1722_v11 = vsel %vm1658_vm1, %v3251_v35, 0.0  ;;  %vm1650_vm1 = vcmp.eq.s32.totalorder %v4309_v49, %v4623_v52  ;;  %v6823_v52 = vld [vmem:[#allocation19_spill] sm:$0xff] }
 0x315   :  { %v1846_v41 = vsel %vm729_vm0, %v1722_v11, 0.0  ;;  %v1714_v18 = vsel %vm1650_vm1, %v3254_v24, 0.0 }
 0x316   :  { %v1822_v26 = vsel %vm729_vm0, %v1714_v18, 0.0 }
 0x318   :  { %v4774_v7 = vpop.permute.xlu0 %1524  ;;  %1811 = vadd.xlane.f32.xlu1 %v1810_v48  ;;  %v4812_v48 = vadd.f32 %v1309_v20, %v3827_v39  ;;  %v4829_v39 = vld [vmem:[%s6478_s1 + $0x80] sm:$0xff]  ;;  %v6822_v20 = vld [vmem:[#allocation18_spill] sm:$0xff] }
 0x319   :  { %6821 = vst [vmem:[#allocation17_spill] sm:$0xff] %v4829_v39  ;;  %vm6579_vm10 = vcmp.ne.s32.totalorder %v4829_v39, 4294967295  ;;  %v4836_v17 = vadd.f32 %v1315_v4, %v6822_v20  ;;  %v3123_v4 = vpop.eup %3122  ;;  %v1325_v20 = vmul.f32 0.6931472, %v3121_v3  ;;  %v6824_v3 = vld [vmem:[#allocation20_spill] sm:$0xff] }
 0x31a   :  { %v2914_v50 = vsel %vm6579_vm10, 1.0, %v6819_v2  ;;  %v3125_v13 = vpop.eup %3124  ;;  %v1327_v11 = vmul.f32 0.6931472, %v3123_v4  ;;  %vm1651_vm10 = vcmp.eq.s32.totalorder %v4309_v49, %v4725_v36  ;;  %v4883_v4 = vadd.f32 %v1323_v27, %v3851_v9 }
 0x31b   :  { %v2773_v6 = vsel %vm2141_vm7, %v2914_v50, 0.0  ;;  %v3127_v22 = vpop.eup %3126  ;;  %v4877_v50 = vadd.f32 %v1319_v47, %v6823_v52  ;;  %v4902_v47 = vadd.f32 %v1325_v20, %v3854_v1  ;;  %v6826_v1 = vld [vmem:[#allocation21_spill] sm:$0xff] }
 0x31c   :  { %v4790_v61 = vpop.permute.xlu0 %1530  ;;  %1814 = vadd.xlane.f32.xlu1 %v1813_v53  ;;  %v3253_v53 = vld [vmem:[%s6477_s0 + $0xa8] sm:$0xff]  ;;  %v2774_v35 = vadd.f32 %v2773_v6, %v2772_v63  ;;  %v3129_v63 = vpop.eup %3128  ;;  %v4880_v6 = vadd.f32 %v1321_v51, %v6824_v3  ;;  %v4911_v27 = vadd.f32 %v1327_v11, %v3861_v5  ;;  %v6828_v3 = vld [vmem:[#allocation117_spill] sm:$0xff] }
 0x31d   :  { %v1713_v30 = vsel %vm1649_vm6, %v3253_v53, 0.0  ;;  %vm6580_vm6 = vcmp.ne.s32.totalorder %v4478_v57, 4294967295  ;;  %v1329_v53 = vmul.f32 0.6931472, %v3125_v13  ;;  %v1331_v13 = vmul.f32 0.6931472, %v3127_v22 }
 0x31e   :  { %v1819_v55 = vsel %vm729_vm0, %v1713_v30, 0.0  ;;  %v2915_v8 = vsel %vm6580_vm6, 1.0, %v6819_v2  ;;  %v4874_v30 = vadd.f32 %v1317_v12, %v3837_v14  ;;  %v4891_v14 = vld [vmem:[%s6478_s1 + $0x90] sm:$0xff]  ;;  %v3256_v12 = vld [vmem:[%s6477_s0 + $0xb8] sm:$0xff]  ;;  %vm1652_vm6 = vcmp.eq.s32.totalorder %v4309_v49, %v4642_v58  ;;  %v3257_v5 = vld [vmem:[%s6477_s0 + $0xc0] sm:$0xff] }
 0x31f   :  { %v2775_v60 = vsel %vm2141_vm7, %v2915_v8, 0.0  ;;  %6825 = vst [vmem:[#allocation18_spill] sm:$0xff] %v4891_v14  ;;  %vm6581_vm1 = vcmp.ne.s32.totalorder %v4891_v14, 4294967295  ;;  %v1715_v9 = vsel %vm1651_vm10, %v3256_v12, 0.0  ;;  %v4915_v20 = vadd.f32 %v1329_v53, %v6826_v1  ;;  %v6827_v8 = vld [vmem:[#allocation68_spill] sm:$0xff]  ;;  %v6829_v53 = vld [vmem:[#allocation69_spill] sm:$0xff] }
 0x320   :  { %v4818_v28 = vpop.permute.xlu0 %1536  ;;  %1817 = vadd.xlane.f32.xlu1 %v1816_v19  ;;  %v4853_v19 = vpop.permute.xlu1 %1557  ;;  %v2776_v24 = vadd.f32 %v2775_v60, %v2774_v35  ;;  %v2916_v51 = vsel %vm6581_vm1, 1.0, %v6819_v2  ;;  %v1333_v35 = vmul.f32 0.6931472, %v3129_v63  ;;  %3144 = vlog2.f32 %v6827_v8  ;;  %v6830_v58 = vld [vmem:[#allocation70_spill] sm:$0xff]  ;;  %v6832_v8 = vld [vmem:[#allocation23_spill] sm:$0xff]  ;;  %v6849_v57 = vld [vmem:[#allocation28_spill] sm:$0xff] }
 0x321   :  { %v2777_v36 = vsel %vm2141_vm7, %v2916_v51, 0.0  ;;  %v1825_v60 = vsel %vm729_vm0, %v1715_v9, 0.0  ;;  %vm300_vm10 = vcmp.ne.s32.totalorder %v6828_v3, 4294967295  ;;  %v1716_v22 = vsel %vm1652_vm6, %v3257_v5, 0.0  ;;  %v3259_v5 = vld [vmem:[%s6477_s0 + $0x148] sm:$0xff] }
 0x322   :  { %v2778_v52 = vadd.f32 %v2777_v36, %v2776_v24  ;;  %v2917_v11 = vsel %vm300_vm10, 1.0, %v6819_v2  ;;  %3146 = vlog2.f32 %v6829_v53  ;;  %v6831_v36 = vld [vmem:[#allocation22_spill] sm:$0xff]  ;;  %vm1654_vm6 = vcmp.eq.s32.totalorder %v4309_v49, %v4668_v29 }
 0x323   :  { %v2779_v12 = vsel %vm2141_vm7, %v2917_v11, 0.0  ;;  %3148 = vlog2.f32 %v6830_v58  ;;  %v4941_v1 = vadd.f32 %v1331_v13, %v6831_v36  ;;  %v1828_v11 = vsel %vm729_vm0, %v1716_v22, 0.0  ;;  %v4957_v13 = vld [vmem:[%s6478_s1 + $0xa0] sm:$0xff]  ;;  %v3261_v58 = vld [vmem:[%s6477_s0 + $0xc8] sm:$0xff]  ;;  %v6834_v22 = vld [vmem:[#allocation24_spill] sm:$0xff] }
 0x324   :  { %1847 = vadd.xlane.f32.xlu0 %v1846_v41  ;;  %v4856_v59 = vpop.permute.xlu0 %1542  ;;  %1820 = vadd.xlane.f32.xlu1 %v1819_v55  ;;  %v3131_v41 = vpop.eup %3130  ;;  %6833 = vst [vmem:[#allocation19_spill] sm:$0xff] %v4957_v13  ;;  %v6835_v36 = vld [vmem:[#allocation71_spill] sm:$0xff]  ;;  %v6838_v3 = vld [vmem:[#allocation118_spill] sm:$0xff] }
 0x325   :  { %v1561_v10 = vpop.permute.xlu1 %1560  ;;  %v1335_v18 = vmul.f32 0.6931472, %v3131_v41  ;;  %v3258_v41 = vld [vmem:[%s6477_s0 + $0x138] sm:$0xff]  ;;  %3150 = vlog2.f32 %v6835_v36  ;;  %v6839_v14 = vld [vmem:[#allocation74_spill] sm:$0xff] }
 0x326   :  { %vm1669_vm1 = vcmp.eq.s32.totalorder %v4309_v49, %v1561_v10  ;;  %v1717_v10 = vsel %vm1653_vm9, %v3261_v58, 0.0  ;;  %v6836_v58 = vld [vmem:[#allocation72_spill] sm:$0xff]  ;;  %vm6600_vm9 = vcmp.ne.s32.totalorder %v6838_v3, 4294967295 }
 0x327   :  { %v1733_v53 = vsel %vm1669_vm1, %v3259_v5, 0.0  ;;  %3152 = vlog2.f32 %v6836_v58  ;;  %v6841_v58 = vld [vmem:[#allocation76_spill] sm:$0xff] }
 0x328   :  { %v4886_v55 = vpop.permute.xlu0 %1545  ;;  %1823 = vadd.xlane.f32.xlu1 %v1822_v26  ;;  %v3133_v26 = vpop.eup %3132 }
 0x329   :  { %v3135_v63 = vpop.eup %3134 }
 0x32a   :  { %v3137_v9 = vpop.eup %3136 }
 0x32b   :  { %v1341_v5 = vmul.f32 0.6931472, %v3137_v9  ;;  %v3262_v9 = vld [vmem:[%s6477_s0 + $0xd0] sm:$0xff] }
 0x32c   :  { %v1555_v56 = vpop.permute.xlu0 %1554  ;;  %1826 = vadd.xlane.f32.xlu1 %v1825_v60  ;;  %v4944_v60 = vadd.f32 %v1333_v35, %v6832_v8  ;;  %v1337_v35 = vmul.f32 0.6931472, %v3133_v26 }
 0x32d   :  { %vm1667_vm15 = vcmp.eq.s32.totalorder %v4309_v49, %v1555_v56  ;;  %v3139_v56 = vpop.eup %3138 }
 0x32e   :  { %v1731_v24 = vsel %vm1667_vm15, %v3258_v41, 0.0  ;;  %vm6589_vm15 = vcmp.ne.s32.totalorder %v4957_v13, 4294967295  ;;  %v3141_v8 = vpop.eup %3140  ;;  %v1343_v44 = vmul.f32 0.6931472, %v3139_v56  ;;  %v1831_v13 = vsel %vm729_vm0, %v1717_v10, 0.0  ;;  %v6840_v10 = vld [vmem:[#allocation75_spill] sm:$0xff] }
 0x32f   :  { %v1873_v51 = vsel %vm729_vm0, %v1731_v24, 0.0  ;;  %v2780_v24 = vadd.f32 %v2779_v12, %v2778_v52  ;;  %v2918_v52 = vsel %vm6589_vm15, 1.0, %v6819_v2  ;;  %v1339_v12 = vmul.f32 0.6931472, %v3135_v63 }
 0x330   :  { %1874 = vadd.xlane.f32.xlu0 %v1873_v51  ;;  %v4952_v41 = vpop.permute.xlu0 %1563  ;;  %1829 = vadd.xlane.f32.xlu1 %v1828_v11  ;;  %v4967_v51 = vadd.f32 %v1335_v18, %v6834_v22  ;;  %v2781_v26 = vsel %vm2141_vm7, %v2918_v52, 0.0  ;;  %v1879_v18 = vsel %vm729_vm0, %v1733_v53, 0.0  ;;  %v3143_v11 = vpop.eup %3142  ;;  %v6837_v22 = vld [vmem:[#allocation73_spill] sm:$0xff]  ;;  %v1718_v56 = vsel %vm1654_vm6, %v3262_v9, 0.0 }
 0x331   :  { %3154 = vlog2.f32 %v6837_v22  ;;  %v2782_v36 = vadd.f32 %v2781_v26, %v2780_v24  ;;  %v2919_v53 = vsel %vm6600_vm9, 1.0, %v6819_v2  ;;  %v3145_v24 = vpop.eup %3144  ;;  %vm1655_vm15 = vcmp.eq.s32.totalorder %v4309_v49, %v4756_v37 }
 0x332   :  { %3156 = vlog2.f32 %v6839_v14  ;;  %v3263_v14 = vld [vmem:[%s6477_s0 + $0x158] sm:$0xff]  ;;  %v2783_v52 = vsel %vm2141_vm7, %v2919_v53, 0.0  ;;  %v1345_v26 = vmul.f32 0.6931472, %v3141_v8  ;;  %v1347_v29 = vmul.f32 0.6931472, %v3143_v11  ;;  %v3147_v22 = vpop.eup %3146 }
 0x333   :  { %3158 = vlog2.f32 %v6840_v10  ;;  %v1834_v9 = vsel %vm729_vm0, %v1718_v56, 0.0  ;;  %v2784_v3 = vadd.f32 %v2783_v52, %v2782_v36  ;;  %v3149_v8 = vpop.eup %3148  ;;  %v3265_v11 = vld [vmem:[%s6477_s0 + $0xd8] sm:$0xff]  ;;  %v6844_v53 = vld [vmem:[#allocation25_spill] sm:$0xff]  ;;  %v6845_v36 = vld [vmem:[#allocation26_spill] sm:$0xff]  ;;  %v5032_v37 = vadd.f32 %v1343_v44, %v6849_v57 }
 0x334   :  { %1880 = vadd.xlane.f32.xlu0 %v1879_v18  ;;  %v1567_v63 = vpop.permute.xlu0 %1566  ;;  %1832 = vadd.xlane.f32.xlu1 %v1831_v13  ;;  %3160 = vlog2.f32 %v6841_v58  ;;  %v1719_v56 = vsel %vm1655_vm15, %v3265_v11, 0.0  ;;  %v5021_v52 = vadd.f32 %v1339_v12, %v6845_v36  ;;  %v6850_v11 = vld [vmem:[#allocation78_spill] sm:$0xff]  ;;  %v6851_v12 = vld [vmem:[#allocation29_spill] sm:$0xff]  ;;  %v3151_v39 = vpop.eup %3150  ;;  %v1351_v21 = vmul.f32 0.6931472, %v3147_v22  ;;  %v6855_v44 = vld [vmem:[#allocation79_spill] sm:$0xff] }
 0x335   :  { %vm1671_vm1 = vcmp.eq.s32.totalorder %v4309_v49, %v1567_v63  ;;  %v6842_v63 = vld [vmem:[#allocation77_spill] sm:$0xff]  ;;  %v6853_v36 = vld [vmem:[#allocation30_spill] sm:$0xff]  ;;  %v3153_v57 = vpop.eup %3152  ;;  %v6857_v22 = vld [vmem:[#allocation80_spill] sm:$0xff]  ;;  %vm1657_vm9 = vcmp.eq.s32.totalorder %v4309_v49, %v4774_v7 }
 0x336   :  { %v1735_v13 = vsel %vm1671_vm1, %v3263_v14, 0.0  ;;  %3162 = vlog2.f32 %v6842_v63  ;;  %v5008_v14 = vld [vmem:[%s6478_s1 + $0xb0] sm:$0xff]  ;;  %6846 = vst [vmem:[#allocation21_spill] sm:$0xff] %v5021_v52  ;;  %vm1656_vm1 = vcmp.eq.s32.totalorder %v4309_v49, %v4683_v46  ;;  %v1353_v52 = vmul.f32 0.6931472, %v3149_v8  ;;  %v3268_v8 = vld [vmem:[%s6477_s0 + $0x168] sm:$0xff] }
 0x337   :  { %v1885_v18 = vsel %vm729_vm0, %v1735_v13, 0.0  ;;  %6843 = vst [vmem:[#allocation20_spill] sm:$0xff] %v5008_v14  ;;  %vm6599_vm6 = vcmp.ne.s32.totalorder %v5008_v14, 4294967295  ;;  %v5018_v13 = vadd.f32 %v1337_v35, %v6844_v53  ;;  %v1349_v35 = vmul.f32 0.6931472, %v3145_v24  ;;  %v3266_v24 = vld [vmem:[%s6477_s0 + $0xe0] sm:$0xff] }
 0x338   :  { %1886 = vadd.xlane.f32.xlu0 %v1885_v18  ;;  %v5003_v10 = vpop.permute.xlu0 %1569  ;;  %1835 = vadd.xlane.f32.xlu1 %v1834_v9  ;;  %v2920_v58 = vsel %vm6599_vm6, 1.0, %v6819_v2  ;;  %v6847_v18 = vld [vmem:[#allocation27_spill] sm:$0xff]  ;;  %3164 = vlog2.f32 %v6850_v11  ;;  %v5037_v53 = vadd.f32 %v1345_v26, %v6851_v12  ;;  %v5040_v14 = vadd.f32 %v1347_v29, %v6853_v36  ;;  %v5054_v29 = vld [vmem:[%s6478_s1 + $0xb8] sm:$0xff]  ;;  %v6858_v11 = vld [vmem:[#allocation81_spill] sm:$0xff] }
 0x339   :  { %v5029_v63 = vadd.f32 %v1341_v5, %v6847_v18  ;;  %v2785_v9 = vsel %vm2141_vm7, %v2920_v58, 0.0  ;;  %v1837_v5 = vsel %vm729_vm0, %v1719_v56, 0.0  ;;  %3166 = vlog2.f32 %v6855_v44  ;;  %6856 = vst [vmem:[#allocation22_spill] sm:$0xff] %v5054_v29 }
 0x33a   :  { %6852 = vst [vmem:[#allocation69_spill] sm:$0xff] %v5037_v53  ;;  %6854 = vst [vmem:[#allocation70_spill] sm:$0xff] %v5040_v14  ;;  %v1720_v26 = vsel %vm1656_vm1, %v3266_v24, 0.0  ;;  %vm6606_vm6 = vcmp.ne.s32.totalorder %v5054_v29, 4294967295  ;;  %3168 = vlog2.f32 %v6857_v22  ;;  %v6859_v24 = vld [vmem:[#allocation31_spill] sm:$0xff]  ;;  %v6863_v53 = vld [vmem:[#allocation82_spill] sm:$0xff] }
 0x33b   :  { %6848 = vst [vmem:[#allocation68_spill] sm:$0xff] %v5029_v63  ;;  %v2786_v63 = vadd.f32 %v2785_v9, %v2784_v3  ;;  %v3155_v3 = vpop.eup %3154  ;;  %v2921_v46 = vsel %vm6606_vm6, 1.0, %v6819_v2  ;;  %v1355_v9 = vmul.f32 0.6931472, %v3151_v39  ;;  %3170 = vlog2.f32 %v6858_v11 }
 0x33c   :  { %v1573_v18 = vpop.permute.xlu0 %1572  ;;  %1838 = vadd.xlane.f32.xlu1 %v1837_v5  ;;  %v3157_v58 = vpop.eup %3156  ;;  %v2787_v36 = vsel %vm2141_vm7, %v2921_v46, 0.0  ;;  %v5073_v22 = vadd.f32 %v1349_v35, %v6859_v24  ;;  %3172 = vlog2.f32 %v6863_v53  ;;  %v6864_v46 = vld [vmem:[#allocation33_spill] sm:$0xff]  ;;  %v1357_v35 = vmul.f32 0.6931472, %v3153_v57 }
 0x33d   :  { %vm1673_vm15 = vcmp.eq.s32.totalorder %v4309_v49, %v1573_v18  ;;  %v3159_v5 = vpop.eup %3158  ;;  %v1840_v18 = vsel %vm729_vm0, %v1720_v26, 0.0  ;;  %v2788_v14 = vadd.f32 %v2787_v36, %v2786_v63  ;;  %v5086_v11 = vadd.f32 %v1353_v52, %v6864_v46  ;;  %v6867_v36 = vld [vmem:[#allocation34_spill] sm:$0xff] }
 0x33e   :  { %v1737_v56 = vsel %vm1673_vm15, %v3268_v8, 0.0  ;;  %6860 = vst [vmem:[#allocation23_spill] sm:$0xff] %v5073_v22  ;;  %v6861_v8 = vld [vmem:[#allocation32_spill] sm:$0xff]  ;;  %v3161_v39 = vpop.eup %3160  ;;  %v1359_v53 = vmul.f32 0.6931472, %v3155_v3  ;;  %vm1659_vm15 = vcmp.eq.s32.totalorder %v4309_v49, %v4790_v61  ;;  %vm1660_vm6 = vcmp.eq.s32.totalorder %v4309_v49, %v4722_v34 }
 0x33f   :  { %v1891_v12 = vsel %vm729_vm0, %v1737_v56, 0.0  ;;  %v5076_v29 = vadd.f32 %v1351_v21, %v6861_v8  ;;  %v3269_v56 = vld [vmem:[%s6477_s0 + $0xe8] sm:$0xff]  ;;  %6865 = vst [vmem:[#allocation71_spill] sm:$0xff] %v5086_v11  ;;  %v5091_v21 = vld [vmem:[%s6478_s1 + $0xc0] sm:$0xff]  ;;  %v1363_v52 = vmul.f32 0.6931472, %v3159_v5 }
 0x340   :  { %1892 = vadd.xlane.f32.xlu0 %v1891_v12  ;;  %v5070_v44 = vpop.permute.xlu0 %1575  ;;  %v1721_v26 = vsel %vm1657_vm9, %v3269_v56, 0.0  ;;  %1841 = vadd.xlane.f32.xlu1 %v1840_v18  ;;  %6866 = vst [vmem:[#allocation72_spill] sm:$0xff] %v5091_v21  ;;  %vm6605_vm1 = vcmp.ne.s32.totalorder %v5091_v21, 4294967295  ;;  %v3163_v63 = vpop.eup %3162  ;;  %v1361_v12 = vmul.f32 0.6931472, %v3157_v58  ;;  %v5100_v18 = vadd.f32 %v1355_v9, %v6867_v36  ;;  %v6869_v56 = vld [vmem:[#allocation83_spill] sm:$0xff] }
 0x341   :  { %6862 = vst [vmem:[#allocation24_spill] sm:$0xff] %v5076_v29  ;;  %v2922_v7 = vsel %vm6605_vm1, 1.0, %v6819_v2  ;;  %v1365_v8 = vmul.f32 0.6931472, %v3161_v39  ;;  %3174 = vlog2.f32 %v6869_v56  ;;  %v1843_v57 = vsel %vm729_vm0, %v1721_v26, 0.0  ;;  %v3271_v21 = vld [vmem:[%s6477_s0 + $0xf8] sm:$0xff] }
 0x342   :  { %6868 = vst [vmem:[#allocation73_spill] sm:$0xff] %v5100_v18  ;;  %v2789_v24 = vsel %vm2141_vm7, %v2922_v7, 0.0  ;;  %v3165_v11 = vpop.eup %3164  ;;  %v1367_v61 = vmul.f32 0.6931472, %v3163_v63  ;;  %v1723_v58 = vsel %vm1659_vm15, %v3271_v21, 0.0  ;;  %v5112_v9 = vld [vmem:[%s6478_s1 + $0xc8] sm:$0xff] }
 0x343   :  { %v2790_v46 = vadd.f32 %v2789_v24, %v2788_v14  ;;  %6870 = vst [vmem:[#allocation74_spill] sm:$0xff] %v5112_v9  ;;  %vm6612_vm1 = vcmp.ne.s32.totalorder %v5112_v9, 4294967295  ;;  %v6871_v5 = vld [vmem:[#allocation84_spill] sm:$0xff]  ;;  %v3167_v21 = vpop.eup %3166  ;;  %v6872_v7 = vld [vmem:[#allocation35_spill] sm:$0xff]  ;;  %v6876_v18 = vld [vmem:[#allocation85_spill] sm:$0xff] }
 0x344   :  { %v1579_v3 = vpop.permute.xlu0 %1578  ;;  %1844 = vadd.xlane.f32.xlu1 %v1843_v57  ;;  %3176 = vlog2.f32 %v6871_v5  ;;  %v3273_v14 = vld [vmem:[%s6477_s0 + $0x178] sm:$0xff]  ;;  %v2923_v26 = vsel %vm6612_vm1, 1.0, %v6819_v2  ;;  %v5126_v36 = vadd.f32 %v1357_v35, %v6872_v7  ;;  %v1369_v5 = vmul.f32 0.6931472, %v3165_v11  ;;  %v3274_v35 = vld [vmem:[%s6477_s0 + $0x100] sm:$0xff]  ;;  %v5145_v11 = vld [vmem:[%s6478_s1 + $0xd0] sm:$0xff] }
 0x345   :  { %vm1675_vm9 = vcmp.eq.s32.totalorder %v4309_v49, %v1579_v3  ;;  %v2791_v24 = vsel %vm2141_vm7, %v2923_v26, 0.0  ;;  %v6874_v56 = vld [vmem:[#allocation36_spill] sm:$0xff]  ;;  %v3169_v3 = vpop.eup %3168  ;;  %3178 = vlog2.f32 %v6876_v18  ;;  %6877 = vst [vmem:[#allocation77_spill] sm:$0xff] %v5145_v11  ;;  %vm6611_vm15 = vcmp.ne.s32.totalorder %v5145_v11, 4294967295  ;;  %v6878_v18 = vld [vmem:[#allocation37_spill] sm:$0xff]  ;;  %v6883_v7 = vld [vmem:[#allocation39_spill] sm:$0xff] }
 0x346   :  { %v1739_v39 = vsel %vm1675_vm9, %v3273_v14, 0.0  ;;  %6873 = vst [vmem:[#allocation75_spill] sm:$0xff] %v5126_v36  ;;  %v5130_v57 = vadd.f32 %v1359_v53, %v6874_v56  ;;  %v1849_v14 = vsel %vm729_vm0, %v1723_v58, 0.0  ;;  %v2792_v29 = vadd.f32 %v2791_v24, %v2790_v46  ;;  %v3171_v22 = vpop.eup %3170  ;;  %v6880_v46 = vld [vmem:[#allocation38_spill] sm:$0xff]  ;;  %v6882_v26 = vld [vmem:[#allocation40_spill] sm:$0xff]  ;;  %v6888_v11 = vld [vmem:[#allocation87_spill] sm:$0xff] }
 0x347   :  { %v1897_v63 = vsel %vm729_vm0, %v1739_v39, 0.0  ;;  %v1724_v53 = vsel %vm1660_vm6, %v3274_v35, 0.0  ;;  %v5149_v58 = vadd.f32 %v1361_v12, %v6878_v18  ;;  %v5152_v39 = vadd.f32 %v1363_v52, %v6880_v46  ;;  %v3173_v56 = vpop.eup %3172  ;;  %v6885_v35 = vld [vmem:[#allocation86_spill] sm:$0xff] }
 0x348   :  { %6875 = vst [vmem:[#allocation76_spill] sm:$0xff] %v5130_v57  ;;  %1898 = vadd.xlane.f32.xlu0 %v1897_v63  ;;  %v5134_v9 = vpop.permute.xlu0 %1581  ;;  %1850 = vadd.xlane.f32.xlu1 %v1849_v14  ;;  %vm1661_vm9 = vcmp.eq.s32.totalorder %v4309_v49, %v4818_v28  ;;  %v5157_v63 = vadd.f32 %v1367_v61, %v6882_v26  ;;  %v2924_v34 = vsel %vm6611_vm15, 1.0, %v6819_v2  ;;  %v1371_v14 = vmul.f32 0.6931472, %v3167_v21  ;;  %v6886_v26 = vld [vmem:[#allocation41_spill] sm:$0xff]  ;;  %v3278_v28 = vld [vmem:[%s6477_s0 + $0x188] sm:$0xff] }
 0x349   :  { %6879 = vst [vmem:[#allocation25_spill] sm:$0xff] %v5149_v58  ;;  %6881 = vst [vmem:[#allocation26_spill] sm:$0xff] %v5152_v39  ;;  %v5163_v24 = vadd.f32 %v1365_v8, %v6883_v7  ;;  %v1373_v12 = vmul.f32 0.6931472, %v3169_v3  ;;  %3180 = vlog2.f32 %v6885_v35  ;;  %v2793_v52 = vsel %vm2141_vm7, %v2924_v34, 0.0  ;;  %v3276_v8 = vld [vmem:[%s6477_s0 + $0x108] sm:$0xff] }
 0x34a   :  { %v1375_v18 = vmul.f32 0.6931472, %v3171_v22  ;;  %v1852_v46 = vsel %vm729_vm0, %v1724_v53, 0.0  ;;  %v2794_v61 = vadd.f32 %v2793_v52, %v2792_v29  ;;  %v5169_v58 = vadd.f32 %v1369_v5, %v6886_v26  ;;  %v5182_v29 = vld [vmem:[%s6478_s1 + $0xd8] sm:$0xff]  ;;  %v6890_v34 = vld [vmem:[#allocation42_spill] sm:$0xff] }
 0x34b   :  { %6884 = vst [vmem:[#allocation27_spill] sm:$0xff] %v5163_v24  ;;  %3182 = vlog2.f32 %v6888_v11  ;;  %v1725_v21 = vsel %vm1661_vm9, %v3276_v8, 0.0  ;;  %6889 = vst [vmem:[#allocation78_spill] sm:$0xff] %v5182_v29  ;;  %vm6614_vm15 = vcmp.ne.s32.totalorder %v5182_v29, 4294967295  ;;  %v3175_v22 = vpop.eup %3174  ;;  %v1377_v3 = vmul.f32 0.6931472, %v3173_v56 }
 0x34c   :  { %v1585_v39 = vpop.permute.xlu0 %1584  ;;  %6887 = vst [vmem:[#allocation28_spill] sm:$0xff] %v5169_v58  ;;  %1853 = vadd.xlane.f32.xlu1 %v1852_v46  ;;  %vm1662_vm1 = vcmp.eq.s32.totalorder %v4309_v49, %v4750_v16  ;;  %v2925_v53 = vsel %vm6614_vm15, 1.0, %v6819_v2  ;;  %v5196_v7 = vadd.f32 %v1371_v14, %v6890_v34  ;;  %v6892_v56 = vld [vmem:[#allocation43_spill] sm:$0xff]  ;;  %v6894_v46 = vld [vmem:[#allocation88_spill] sm:$0xff]  ;;  %v1855_v26 = vsel %vm729_vm0, %v1725_v21, 0.0  ;;  %v5218_v21 = vld [vmem:[%s6478_s1 + $0xe0] sm:$0xff] }
 0x34d   :  { %vm1677_vm6 = vcmp.eq.s32.totalorder %v4309_v49, %v1585_v39  ;;  %v2795_v39 = vsel %vm2141_vm7, %v2925_v53, 0.0  ;;  %v5199_v35 = vadd.f32 %v1373_v12, %v6892_v56  ;;  %3184 = vlog2.f32 %v6894_v46  ;;  %v6895_v58 = vld [vmem:[#allocation44_spill] sm:$0xff]  ;;  %v6897_v53 = vld [vmem:[#allocation89_spill] sm:$0xff]  ;;  %v3279_v14 = vld [vmem:[%s6477_s0 + $0x110] sm:$0xff]  ;;  %6898 = vst [vmem:[#allocation80_spill] sm:$0xff] %v5218_v21 }
 0x34e   :  { %v1741_v5 = vsel %vm1677_vm6, %v3278_v28, 0.0  ;;  %6891 = vst [vmem:[#allocation29_spill] sm:$0xff] %v5196_v7  ;;  %v3177_v52 = vpop.eup %3176  ;;  %v2796_v28 = vadd.f32 %v2795_v39, %v2794_v61  ;;  %v5206_v24 = vadd.f32 %v1375_v18, %v6895_v58  ;;  %3186 = vlog2.f32 %v6897_v53  ;;  %v6899_v18 = vld [vmem:[#allocation90_spill] sm:$0xff]  ;;  %v6902_v39 = vld [vmem:[#allocation91_spill] sm:$0xff]  ;;  %v6903_v46 = vld [vmem:[#allocation92_spill] sm:$0xff] }
 0x34f   :  { %v1903_v11 = vsel %vm729_vm0, %v1741_v5, 0.0  ;;  %6893 = vst [vmem:[#allocation30_spill] sm:$0xff] %v5199_v35  ;;  %v1379_v5 = vmul.f32 0.6931472, %v3175_v22  ;;  %v1726_v12 = vsel %vm1662_vm1, %v3279_v14, 0.0  ;;  %vm6613_vm9 = vcmp.ne.s32.totalorder %v5218_v21, 4294967295  ;;  %v3179_v58 = vpop.eup %3178 }
 0x350   :  { %1904 = vadd.xlane.f32.xlu0 %v1903_v11  ;;  %v5203_v8 = vpop.permute.xlu0 %1587  ;;  %6896 = vst [vmem:[#allocation79_spill] sm:$0xff] %v5206_v24  ;;  %1856 = vadd.xlane.f32.xlu1 %v1855_v26  ;;  %3188 = vlog2.f32 %v6899_v18  ;;  %vm1663_vm6 = vcmp.eq.s32.totalorder %v4309_v49, %v4856_v59  ;;  %v2926_v61 = vsel %vm6613_vm9, 1.0, %v6819_v2  ;;  %v6900_v22 = vld [vmem:[#allocation45_spill] sm:$0xff]  ;;  %v1381_v11 = vmul.f32 0.6931472, %v3177_v52  ;;  %v5234_v34 = vld [vmem:[%s6478_s1 + $0xf0] sm:$0xff] }
 0x351   :  { %v5228_v16 = vadd.f32 %v1377_v3, %v6900_v22  ;;  %3190 = vlog2.f32 %v6902_v39  ;;  %vm6615_vm1 = vcmp.ne.s32.totalorder %v5234_v34, 4294967295  ;;  %v2797_v56 = vsel %vm2141_vm7, %v2926_v61, 0.0  ;;  %v3282_v22 = vld [vmem:[%s6477_s0 + $0x118] sm:$0xff]  ;;  %v6907_v35 = vld [vmem:[#allocation46_spill] sm:$0xff] }
 0x352   :  { %3192 = vlog2.f32 %v6903_v46  ;;  %v1858_v26 = vsel %vm729_vm0, %v1726_v12, 0.0  ;;  %v2928_v3 = vsel %vm6615_vm1, 1.0, %v6819_v2  ;;  %v2798_v52 = vadd.f32 %v2797_v56, %v2796_v28  ;;  %v5253_v12 = vld [vmem:[%s6478_s1 + $0xe8] sm:$0xff]  ;;  %v6905_v28 = vld [vmem:[#allocation93_spill] sm:$0xff]  ;;  %v3284_v59 = vld [vmem:[%s6477_s0 + $0x198] sm:$0xff] }
 0x353   :  { %6901 = vst [vmem:[#allocation81_spill] sm:$0xff] %v5228_v16  ;;  %v3181_v14 = vpop.eup %3180  ;;  %v1383_v18 = vmul.f32 0.6931472, %v3179_v58  ;;  %v1727_v61 = vsel %vm1663_vm6, %v3282_v22, 0.0  ;;  %6904 = vst [vmem:[#allocation31_spill] sm:$0xff] %v5253_v12  ;;  %vm6623_vm15 = vcmp.ne.s32.totalorder %v5253_v12, 4294967295  ;;  %3194 = vlog2.f32 %v6905_v28 }
 0x354   :  { %v1591_v53 = vpop.permute.xlu0 %1590  ;;  %1859 = vadd.xlane.f32.xlu1 %v1858_v26  ;;  %vm1664_vm1 = vcmp.eq.s32.totalorder %v4309_v49, %v4886_v55  ;;  %v2927_v39 = vsel %vm6623_vm15, 1.0, %v6819_v2  ;;  %v6906_v46 = vld [vmem:[#allocation94_spill] sm:$0xff]  ;;  %v1385_v28 = vmul.f32 0.6931472, %v3181_v14  ;;  %v1861_v16 = vsel %vm729_vm0, %v1727_v61, 0.0  ;;  %v6909_v12 = vld [vmem:[#allocation95_spill] sm:$0xff] }
 0x355   :  { %vm1679_vm9 = vcmp.eq.s32.totalorder %v4309_v49, %v1591_v53  ;;  %v3183_v56 = vpop.eup %3182  ;;  %3196 = vlog2.f32 %v6906_v46  ;;  %v2801_v53 = vsel %vm2141_vm7, %v2928_v3, 0.0  ;;  %v2799_v22 = vsel %vm2141_vm7, %v2927_v39, 0.0  ;;  %v5285_v14 = vld [vmem:[%s6478_s1 + $0xf8] sm:$0xff]  ;;  %v6914_v46 = vld [vmem:[#allocation97_spill] sm:$0xff] }
 0x356   :  { %v1743_v58 = vsel %vm1679_vm9, %v3284_v59, 0.0  ;;  %v2800_v59 = vadd.f32 %v2799_v22, %v2798_v52  ;;  %v5273_v7 = vadd.f32 %v1379_v5, %v6907_v35  ;;  %3198 = vlog2.f32 %v6909_v12  ;;  %6910 = vst [vmem:[#allocation82_spill] sm:$0xff] %v5285_v14  ;;  %v6911_v35 = vld [vmem:[#allocation47_spill] sm:$0xff]  ;;  %v6913_v61 = vld [vmem:[#allocation96_spill] sm:$0xff] }
 0x357   :  { %v1909_v26 = vsel %vm729_vm0, %v1743_v58, 0.0  ;;  %v3285_v58 = vld [vmem:[%s6477_s0 + $0x120] sm:$0xff]  ;;  %vm6622_vm9 = vcmp.ne.s32.totalorder %v5285_v14, 4294967295  ;;  %v5289_v5 = vadd.f32 %v1381_v11, %v6911_v35  ;;  %v3185_v52 = vpop.eup %3184  ;;  %3200 = vlog2.f32 %v6913_v61  ;;  %v6915_v22 = vld [vmem:[#allocation48_spill] sm:$0xff]  ;;  %v6917_v35 = vld [vmem:[#allocation98_spill] sm:$0xff] }
 0x358   :  { %1910 = vadd.xlane.f32.xlu0 %v1909_v26  ;;  %v5270_v24 = vpop.permute.xlu0 %1593  ;;  %6908 = vst [vmem:[#allocation32_spill] sm:$0xff] %v5273_v7  ;;  %v1728_v3 = vsel %vm1664_vm1, %v3285_v58, 0.0  ;;  %1862 = vadd.xlane.f32.xlu1 %v1861_v16  ;;  %vm1665_vm6 = vcmp.eq.s32.totalorder %v4309_v49, %v4771_v54  ;;  %v2929_v55 = vsel %vm6622_vm9, 1.0, %v6819_v2  ;;  %v2802_v16 = vadd.f32 %v2801_v53, %v2800_v59  ;;  %v3187_v12 = vpop.eup %3186  ;;  %v6918_v7 = vld [vmem:[#allocation49_spill] sm:$0xff]  ;;  %v3289_v54 = vld [vmem:[%s6477_s0 + $0x1a8] sm:$0xff]  ;;  %v6924_v57 = vld [vmem:[#allocation100_spill] sm:$0xff] }
 0x359   :  { %6912 = vst [vmem:[#allocation33_spill] sm:$0xff] %v5289_v5  ;;  %v1387_v39 = vmul.f32 0.6931472, %v3183_v56  ;;  %3202 = vlog2.f32 %v6914_v46  ;;  %v2803_v26 = vsel %vm2141_vm7, %v2929_v55, 0.0  ;;  %v5300_v11 = vadd.f32 %v1383_v18, %v6915_v22  ;;  %v3287_v56 = vld [vmem:[%s6477_s0 + $0x128] sm:$0xff] }
 0x35a   :  { %v3189_v58 = vpop.eup %3188  ;;  %3204 = vlog2.f32 %v6917_v35  ;;  %v1864_v61 = vsel %vm729_vm0, %v1728_v3, 0.0  ;;  %v5305_v21 = vadd.f32 %v1385_v28, %v6918_v7  ;;  %v2804_v14 = vadd.f32 %v2803_v26, %v2802_v16  ;;  %v5317_v3 = vld [vmem:[%s6478_s1 + $0x100] sm:$0xff]  ;;  %v6921_v28 = vld [vmem:[#allocation99_spill] sm:$0xff] }
 0x35b   :  { %6916 = vst [vmem:[#allocation34_spill] sm:$0xff] %v5300_v11  ;;  %v3191_v53 = vpop.eup %3190  ;;  %v1389_v59 = vmul.f32 0.6931472, %v3185_v52  ;;  %v1729_v18 = vsel %vm1665_vm6, %v3287_v56, 0.0  ;;  %6920 = vst [vmem:[#allocation84_spill] sm:$0xff] %v5317_v3  ;;  %vm6631_vm9 = vcmp.ne.s32.totalorder %v5317_v3, 4294967295  ;;  %3206 = vlog2.f32 %v6921_v28 }
 0x35c   :  { %v1597_v5 = vpop.permute.xlu0 %1596  ;;  %6919 = vst [vmem:[#allocation83_spill] sm:$0xff] %v5305_v21  ;;  %1865 = vadd.xlane.f32.xlu1 %v1864_v61  ;;  %v3193_v7 = vpop.eup %3192  ;;  %vm1666_vm15 = vcmp.eq.s32.totalorder %v4309_v49, %v4803_v23  ;;  %v1391_v55 = vmul.f32 0.6931472, %v3187_v12  ;;  %v1393_v16 = vmul.f32 0.6931472, %v3189_v58  ;;  %v1867_v61 = vsel %vm729_vm0, %v1729_v18, 0.0 }
 0x35d   :  { %vm1681_vm1 = vcmp.eq.s32.totalorder %v4309_v49, %v1597_v5  ;;  %v2930_v5 = vsel %vm6631_vm9, 1.0, %v6819_v2  ;;  %v3195_v22 = vpop.eup %3194  ;;  %v1395_v35 = vmul.f32 0.6931472, %v3191_v53  ;;  %v6922_v11 = vld [vmem:[#allocation50_spill] sm:$0xff]  ;;  %v1397_v3 = vmul.f32 0.6931472, %v3193_v7 }
 0x35e   :  { %v1745_v52 = vsel %vm1681_vm1, %v3289_v54, 0.0  ;;  %v2805_v26 = vsel %vm2141_vm7, %v2930_v5, 0.0  ;;  %v5335_v54 = vadd.f32 %v1387_v39, %v6922_v11  ;;  %3208 = vlog2.f32 %v6924_v57  ;;  %v3290_v12 = vld [vmem:[%s6477_s0 + $0x130] sm:$0xff]  ;;  %v6926_v39 = vld [vmem:[#allocation101_spill] sm:$0xff] }
 0x35f   :  { %v1915_v46 = vsel %vm729_vm0, %v1745_v52, 0.0  ;;  %v2806_v28 = vadd.f32 %v2805_v26, %v2804_v14  ;;  %v3197_v29 = vpop.eup %3196  ;;  %v1730_v58 = vsel %vm1666_vm15, %v3290_v12, 0.0  ;;  %v5347_v14 = vld [vmem:[%s6478_s1 + $0x108] sm:$0xff]  ;;  %3210 = vlog2.f32 %v6926_v39  ;;  %v6927_v57 = vld [vmem:[#allocation51_spill] sm:$0xff]  ;;  %v6929_v7 = vld [vmem:[#allocation53_spill] sm:$0xff] }
 0x360   :  { %1916 = vadd.xlane.f32.xlu0 %v1915_v46  ;;  %v5332_v56 = vpop.permute.xlu0 %1599  ;;  %6923 = vst [vmem:[#allocation35_spill] sm:$0xff] %v5335_v54  ;;  %1868 = vadd.xlane.f32.xlu1 %v1867_v61  ;;  %6925 = vst [vmem:[#allocation36_spill] sm:$0xff] %v5347_v14  ;;  %vm6630_vm6 = vcmp.ne.s32.totalorder %v5347_v14, 4294967295  ;;  %vm1668_vm1 = vcmp.eq.s32.totalorder %v4309_v49, %v4853_v19  ;;  %v5354_v11 = vadd.f32 %v1389_v59, %v6927_v57  ;;  %v3199_v53 = vpop.eup %3198  ;;  %v6931_v46 = vld [vmem:[#allocation52_spill] sm:$0xff]  ;;  %v6933_v54 = vld [vmem:[#allocation54_spill] sm:$0xff] }
 0x361   :  { %v2931_v23 = vsel %vm6630_vm6, 1.0, %v6819_v2  ;;  %v1399_v18 = vmul.f32 0.6931472, %v3195_v22  ;;  %v5360_v52 = vadd.f32 %v1393_v16, %v6929_v7  ;;  %v5364_v26 = vadd.f32 %v1391_v55, %v6931_v46  ;;  %v3201_v61 = vpop.eup %3200  ;;  %v3292_v16 = vld [vmem:[%s6477_s0 + $0x140] sm:$0xff]  ;;  %v3294_v19 = vld [vmem:[%s6477_s0 + $0x1b8] sm:$0xff] }
 0x362   :  { %6928 = vst [vmem:[#allocation85_spill] sm:$0xff] %v5354_v11  ;;  %v2807_v5 = vsel %vm2141_vm7, %v2931_v23, 0.0  ;;  %v1401_v12 = vmul.f32 0.6931472, %v3197_v29  ;;  %v1870_v39 = vsel %vm729_vm0, %v1730_v58, 0.0  ;;  %v5368_v11 = vadd.f32 %v1395_v35, %v6933_v54  ;;  %v6935_v29 = vld [vmem:[#allocation55_spill] sm:$0xff] }
 0x363   :  { %6930 = vst [vmem:[#allocation37_spill] sm:$0xff] %v5360_v52  ;;  %6932 = vst [vmem:[#allocation38_spill] sm:$0xff] %v5364_v26  ;;  %v2808_v57 = vadd.f32 %v2807_v5, %v2806_v28  ;;  %v3203_v14 = vpop.eup %3202  ;;  %v1732_v22 = vsel %vm1668_vm1, %v3292_v16, 0.0  ;;  %v5378_v55 = vadd.f32 %v1397_v3, %v6935_v29  ;;  %v5383_v35 = vld [vmem:[%s6478_s1 + $0x110] sm:$0xff]  ;;  %v1403_v54 = vmul.f32 0.6931472, %v3199_v53 }
 0x364   :  { %v1603_v59 = vpop.permute.xlu0 %1602  ;;  %6934 = vst [vmem:[#allocation40_spill] sm:$0xff] %v5368_v11  ;;  %1871 = vadd.xlane.f32.xlu1 %v1870_v39  ;;  %6937 = vst [vmem:[#allocation86_spill] sm:$0xff] %v5383_v35  ;;  %vm6633_vm6 = vcmp.ne.s32.totalorder %v5383_v35, 4294967295  ;;  %v3205_v28 = vpop.eup %3204  ;;  %vm1670_vm9 = vcmp.eq.s32.totalorder %v4309_v49, %v4952_v41  ;;  %v1405_v23 = vmul.f32 0.6931472, %v3201_v61  ;;  %v6938_v46 = vld [vmem:[#allocation56_spill] sm:$0xff] }
 0x365   :  { %vm1683_vm15 = vcmp.eq.s32.totalorder %v4309_v49, %v1603_v59  ;;  %6936 = vst [vmem:[#allocation39_spill] sm:$0xff] %v5378_v55  ;;  %v2932_v3 = vsel %vm6633_vm6, 1.0, %v6819_v2  ;;  %v5397_v39 = vadd.f32 %v1399_v18, %v6938_v46  ;;  %v3207_v53 = vpop.eup %3206  ;;  %v1407_v59 = vmul.f32 0.6931472, %v3203_v14  ;;  %v6942_v61 = vld [vmem:[#allocation102_spill] sm:$0xff]  ;;  %v5415_v18 = vld [vmem:[%s6478_s1 + $0x118] sm:$0xff] }
 0x366   :  { %v1747_v58 = vsel %vm1683_vm15, %v3294_v19, 0.0  ;;  %v2809_v5 = vsel %vm2141_vm7, %v2932_v3, 0.0  ;;  %v1876_v16 = vsel %vm729_vm0, %v1732_v22, 0.0  ;;  %v6940_v19 = vld [vmem:[#allocation57_spill] sm:$0xff]  ;;  %v1409_v55 = vmul.f32 0.6931472, %v3205_v28 }
 0x367   :  { %v1921_v7 = vsel %vm729_vm0, %v1747_v58, 0.0  ;;  %6939 = vst [vmem:[#allocation41_spill] sm:$0xff] %v5397_v39  ;;  %v5403_v11 = vadd.f32 %v1401_v12, %v6940_v19  ;;  %v2810_v26 = vadd.f32 %v2809_v5, %v2808_v57  ;;  %3212 = vlog2.f32 %v6942_v61  ;;  %v3295_v58 = vld [vmem:[%s6477_s0 + $0x150] sm:$0xff]  ;;  %6943 = vst [vmem:[#allocation42_spill] sm:$0xff] %v5415_v18  ;;  %v6945_v22 = vld [vmem:[#allocation58_spill] sm:$0xff] }
 0x368   :  { %1922 = vadd.xlane.f32.xlu0 %v1921_v7  ;;  %v5400_v29 = vpop.permute.xlu0 %1605  ;;  %v1734_v14 = vsel %vm1670_vm9, %v3295_v58, 0.0  ;;  %1877 = vadd.xlane.f32.xlu1 %v1876_v16  ;;  %vm6632_vm1 = vcmp.ne.s32.totalorder %v5415_v18, 4294967295  ;;  %v6944_v12 = vld [vmem:[#allocation103_spill] sm:$0xff]  ;;  %vm1672_vm15 = vcmp.eq.s32.totalorder %v4309_v49, %v5003_v10  ;;  %v5425_v41 = vadd.f32 %v1403_v54, %v6945_v22  ;;  %v3209_v28 = vpop.eup %3208  ;;  %v6947_v7 = vld [vmem:[#allocation104_spill] sm:$0xff]  ;;  %v6950_v61 = vld [vmem:[#allocation105_spill] sm:$0xff] }
 0x369   :  { %6941 = vst [vmem:[#allocation87_spill] sm:$0xff] %v5403_v11  ;;  %3214 = vlog2.f32 %v6944_v12  ;;  %v2933_v57 = vsel %vm6632_vm1, 1.0, %v6819_v2  ;;  %v1411_v3 = vmul.f32 0.6931472, %v3207_v53  ;;  %v6948_v5 = vld [vmem:[#allocation59_spill] sm:$0xff]  ;;  %v3211_v19 = vpop.eup %3210  ;;  %v1882_v10 = vsel %vm729_vm0, %v1734_v14, 0.0 }
 0x36a   :  { %6946 = vst [vmem:[#allocation43_spill] sm:$0xff] %v5425_v41  ;;  %3216 = vlog2.f32 %v6947_v7  ;;  %v5429_v46 = vadd.f32 %v1405_v23, %v6948_v5  ;;  %v2811_v16 = vsel %vm2141_vm7, %v2933_v57, 0.0  ;;  %v6951_v39 = vld [vmem:[#allocation60_spill] sm:$0xff]  ;;  %v3297_v54 = vld [vmem:[%s6477_s0 + $0x160] sm:$0xff]  ;;  %vm1674_vm6 = vcmp.eq.s32.totalorder %v4309_v49, %v5070_v44  ;;  %v6963_v44 = vld [vmem:[#allocation63_spill] sm:$0xff] }
 0x36b   :  { %3218 = vlog2.f32 %v6950_v61  ;;  %v2812_v12 = vadd.f32 %v2811_v16, %v2810_v26  ;;  %v5435_v11 = vadd.f32 %v1407_v59, %v6951_v39  ;;  %v1736_v53 = vsel %vm1672_vm15, %v3297_v54, 0.0  ;;  %v6953_v23 = vld [vmem:[#allocation61_spill] sm:$0xff]  ;;  %v3299_v39 = vld [vmem:[%s6477_s0 + $0x1c8] sm:$0xff]  ;;  %v6974_v18 = vld [vmem:[#allocation112_spill] sm:$0xff] }
 0x36c   :  { %6949 = vst [vmem:[#allocation88_spill] sm:$0xff] %v5429_v46  ;;  %v1609_v58 = vpop.permute.xlu0 %1608  ;;  %1883 = vadd.xlane.f32.xlu1 %v1882_v10  ;;  %v5442_v57 = vadd.f32 %v1409_v55, %v6953_v23  ;;  %v5447_v14 = vld [vmem:[%s6478_s1 + $0x120] sm:$0xff]  ;;  %v1413_v26 = vmul.f32 0.6931472, %v3209_v28  ;;  %v1415_v22 = vmul.f32 0.6931472, %v3211_v19  ;;  %v2014_v52 = vsub.f32 %v4815_v42, %v6974_v18 }
 0x36d   :  { %6952 = vst [vmem:[#allocation44_spill] sm:$0xff] %v5435_v11  ;;  %vm1685_vm9 = vcmp.eq.s32.totalorder %v4309_v49, %v1609_v58  ;;  %6955 = vst [vmem:[#allocation90_spill] sm:$0xff] %v5447_v14  ;;  %vm6635_vm1 = vcmp.ne.s32.totalorder %v5447_v14, 4294967295  ;;  %v6956_v16 = vld [vmem:[#allocation62_spill] sm:$0xff]  ;;  %v6959_v10 = vld [vmem:[#allocation111_spill] sm:$0xff]  ;;  %v1888_v54 = vsel %vm729_vm0, %v1736_v53, 0.0 }
 0x36e   :  { %6954 = vst [vmem:[#allocation89_spill] sm:$0xff] %v5442_v57  ;;  %v1749_v59 = vsel %vm1685_vm9, %v3299_v39, 0.0  ;;  %v2934_v55 = vsel %vm6635_vm1, 1.0, %v6819_v2  ;;  %v5461_v61 = vadd.f32 %v1411_v3, %v6956_v16  ;;  %v6958_v28 = vld [vmem:[#allocation106_spill] sm:$0xff]  ;;  %v2012_v58 = vsub.f32 %v4809_v43, %v6959_v10  ;;  %v6960_v11 = vld [vmem:[#allocation107_spill] sm:$0xff]  ;;  %v5497_v16 = vld [vmem:[%s6478_s1 + $0x138] sm:$0xff] }
 0x36f   :  { %v1927_v7 = vsel %vm729_vm0, %v1749_v59, 0.0  ;;  %v2813_v5 = vsel %vm2141_vm7, %v2934_v55, 0.0  ;;  %3220 = vlog2.f32 %v6958_v28  ;;  %v2282_v19 = vsub.f32 1.0, %v6959_v10  ;;  %v3300_v3 = vld [vmem:[%s6477_s0 + $0x170] sm:$0xff]  ;;  %v5480_v43 = vld [vmem:[%s6478_s1 + $0x128] sm:$0xff]  ;;  %6965 = vst [vmem:[#allocation93_spill] sm:$0xff] %v5497_v16 }
 0x370   :  { %6957 = vst [vmem:[#allocation45_spill] sm:$0xff] %v5461_v61  ;;  %1928 = vadd.xlane.f32.xlu0 %v1927_v7  ;;  %v5467_v23 = vpop.permute.xlu0 %1611  ;;  %v2814_v39 = vadd.f32 %v2813_v5, %v2812_v12  ;;  %3222 = vlog2.f32 %v6960_v11  ;;  %v1738_v59 = vsel %vm1674_vm6, %v3300_v3, 0.0  ;;  %1889 = vadd.xlane.f32.xlu1 %v1888_v54  ;;  %6961 = vst [vmem:[#allocation91_spill] sm:$0xff] %v5480_v43  ;;  %vm6634_vm15 = vcmp.ne.s32.totalorder %v5480_v43, 4294967295  ;;  %v6962_v12 = vld [vmem:[#allocation119_spill] sm:$0xff]  ;;  %v6966_v28 = vld [vmem:[#allocation5_spill] sm:$0xff] }
 0x371   :  { %v2013_v11 = vsub.f32 %v4812_v48, %v6962_v12  ;;  %vm1676_vm9 = vcmp.eq.s32.totalorder %v4309_v49, %v5134_v9  ;;  %v2935_v53 = vsel %vm6634_vm15, 1.0, %v6819_v2  ;;  %v5491_v55 = vadd.f32 %v1413_v26, %v6963_v44  ;;  %v3213_v7 = vpop.eup %3212  ;;  %v3305_v9 = vld [vmem:[%s6477_s0 + $0x1d8] sm:$0xff]  ;;  %v3310_v35 = vld [vmem:[%s6477_s0 + $0x1a0] sm:$0xff]  ;;  %v5641_v42 = vld [vmem:[%s6478_s1 + $0x168] sm:$0xff] }
 0x372   :  { %v2283_v5 = vsub.f32 1.0, %v6962_v12  ;;  %vm6636_vm6 = vcmp.ne.s32.totalorder %v5497_v16, 4294967295  ;;  %v2815_v48 = vsel %vm2141_vm7, %v2935_v53, 0.0  ;;  %v5502_v10 = vadd.f32 %v1415_v22, %v6966_v28  ;;  %v3303_v22 = vld [vmem:[%s6477_s0 + $0x180] sm:$0xff]  ;;  %6976 = vst [vmem:[#allocation48_spill] sm:$0xff] %v5641_v42 }
 0x373   :  { %6964 = vst [vmem:[#allocation92_spill] sm:$0xff] %v5491_v55  ;;  %v5504_v54 = vpop.eup %3214  ;;  %v2077_v26 = vsel %vm281_vm3, %v2012_v58, 0.0  ;;  %v1894_v44 = vsel %vm729_vm0, %v1738_v59, 0.0  ;;  %v2937_v61 = vsel %vm6636_vm6, 1.0, %v6819_v2  ;;  %v2816_v41 = vadd.f32 %v2815_v48, %v2814_v39  ;;  %v5524_v58 = vld [vmem:[%s6478_s1 + $0x130] sm:$0xff] }
 0x374   :  { %6967 = vst [vmem:[#allocation94_spill] sm:$0xff] %v5502_v10  ;;  %v1615_v12 = vpop.permute.xlu0 %1614  ;;  %v5512_v55 = vpop.eup %3216  ;;  %v2346_v57 = vmul.f32 %v2282_v19, %v2282_v19  ;;  %v1740_v53 = vsel %vm1676_vm9, %v3303_v22, 0.0  ;;  %1895 = vadd.xlane.f32.xlu1 %v1894_v44  ;;  %6969 = vst [vmem:[#allocation46_spill] sm:$0xff] %v5524_v58  ;;  %vm6643_vm1 = vcmp.ne.s32.totalorder %v5524_v58, 4294967295  ;;  %v2078_v59 = vsel %vm282_vm4, %v2013_v11, 0.0  ;;  %v5544_v11 = vld [vmem:[%s6478_s1 + $0x148] sm:$0xff] }
 0x375   :  { %vm1687_vm15 = vcmp.eq.s32.totalorder %v4309_v49, %v1615_v12  ;;  %v5527_v39 = vpop.eup %3218  ;;  %vm1678_vm6 = vcmp.eq.s32.totalorder %v4309_v49, %v5203_v8  ;;  %v2936_v28 = vsel %vm6643_vm1, 1.0, %v6819_v2  ;;  %v2819_v12 = vsel %vm2141_vm7, %v2937_v61, 0.0  ;;  %6971 = vst [vmem:[#allocation95_spill] sm:$0xff] %v5544_v11 }
 0x376   :  { %v1751_v48 = vsel %vm1687_vm15, %v3305_v9, 0.0  ;;  %vm322_vm9 = vcmp.ne.s32.totalorder %v5544_v11, 4294967295  ;;  %v2817_v22 = vsel %vm2141_vm7, %v2936_v28, 0.0  ;;  %v5548_v10 = vmul.f32 0.6931472, %v3213_v7  ;;  %v5550_v9 = vpop.xlane.xlu1 %1778  ;;  %v3307_v7 = vld [vmem:[%s6477_s0 + $0x190] sm:$0xff] }
 0x377   :  { %v1933_v44 = vsel %vm729_vm0, %v1751_v48, 0.0  ;;  %v1900_v46 = vsel %vm729_vm0, %v1740_v53, 0.0  ;;  %v2939_v61 = vsel %vm322_vm9, 1.0, %v6819_v2  ;;  %v2818_v48 = vadd.f32 %v2817_v22, %v2816_v41  ;;  %v5568_v53 = vld [vmem:[%s6478_s1 + $0x140] sm:$0xff] }
 0x378   :  { %1934 = vadd.xlane.f32.xlu0 %v1933_v44  ;;  %v5553_v58 = vpop.permute.xlu0 %1617  ;;  %v2142_v43 = vsel %vm2141_vm7, %v2077_v26, 0.0  ;;  %v2347_v14 = vmul.f32 %v2283_v5, %v2283_v5  ;;  %v1742_v28 = vsel %vm1678_vm6, %v3307_v7, 0.0  ;;  %1901 = vadd.xlane.f32.xlu1 %v1900_v46  ;;  %6972 = vst [vmem:[#allocation47_spill] sm:$0xff] %v5568_v53  ;;  %vm6650_vm15 = vcmp.ne.s32.totalorder %v5568_v53, 4294967295  ;;  %v5587_v7 = vld [vmem:[%s6478_s1 + $0x158] sm:$0xff] }
 0x379   :  { %v5571_v41 = vpop.eup %3220  ;;  %v2143_v5 = vsel %vm2141_vm7, %v2078_v59, 0.0  ;;  %vm1680_vm1 = vcmp.eq.s32.totalorder %v4309_v49, %v5270_v24  ;;  %v2938_v8 = vsel %vm6650_vm15, 1.0, %v6819_v2  ;;  %v2820_v26 = vadd.f32 %v2819_v12, %v2818_v48  ;;  %6973 = vst [vmem:[#allocation96_spill] sm:$0xff] %v5587_v7  ;;  %v3312_v24 = vld [vmem:[%s6477_s0 + $0x1e8] sm:$0xff] }
 0x37a   :  { %v5579_v46 = vpop.eup %3222  ;;  %v2410_v44 = vsel %vm281_vm3, %v2346_v57, 0.0  ;;  %v2823_v22 = vsel %vm2141_vm7, %v2939_v61, 0.0  ;;  %vm6651_vm6 = vcmp.ne.s32.totalorder %v5587_v7, 4294967295  ;;  %v2821_v59 = vsel %vm2141_vm7, %v2938_v8, 0.0 }
 0x37b   :  { %v2284_v53 = vsub.f32 1.0, %v6974_v18  ;;  %v1906_v12 = vsel %vm729_vm0, %v1742_v28, 0.0  ;;  %v2941_v57 = vsel %vm6651_vm6, 1.0, %v6819_v2  ;;  %v2822_v3 = vadd.f32 %v2821_v59, %v2820_v26  ;;  %v5608_v28 = vld [vmem:[%s6478_s1 + $0x150] sm:$0xff]  ;;  %v5647_v18 = vld [vmem:[%s6478_s1 + $0x160] sm:$0xff] }
 0x37c   :  { %v1621_v48 = vpop.permute.xlu0 %1620  ;;  %v5596_v61 = vadd.f32 %v2143_v5, %v2142_v43  ;;  %v1744_v8 = vsel %vm1680_vm1, %v3310_v35, 0.0  ;;  %1907 = vadd.xlane.f32.xlu1 %v1906_v12  ;;  %6975 = vst [vmem:[#allocation97_spill] sm:$0xff] %v5608_v28  ;;  %vm323_vm15 = vcmp.ne.s32.totalorder %v5608_v28, 4294967295  ;;  %v5611_v43 = vpop.xlane.xlu1 %1781  ;;  %vm1682_vm6 = vcmp.eq.s32.totalorder %v4309_v49, %v5332_v56  ;;  %6977 = vst [vmem:[#allocation98_spill] sm:$0xff] %v5647_v18 }
 0x37d   :  { %vm1689_vm3 = vcmp.eq.s32.totalorder %v4309_v49, %v1621_v48  ;;  %v2940_v5 = vsel %vm323_vm15, 1.0, %v6819_v2  ;;  %v2824_v26 = vadd.f32 %v2823_v22, %v2822_v3  ;;  %v2411_v59 = vsel %vm282_vm4, %v2347_v14, 0.0  ;;  %v3313_v14 = vld [vmem:[%s6477_s0 + $0x1b0] sm:$0xff]  ;;  %v6978_v3 = vld [vmem:[#allocation120_spill] sm:$0xff] }
 0x37e   :  { %v1753_v35 = vsel %vm1689_vm3, %v3312_v24, 0.0  ;;  %v2827_v48 = vsel %vm2141_vm7, %v2941_v57, 0.0  ;;  %v2825_v7 = vsel %vm2141_vm7, %v2940_v5, 0.0  ;;  %v2348_v11 = vmul.f32 %v2284_v53, %v2284_v53  ;;  %v6982_v5 = vld [vmem:[#allocation113_spill] sm:$0xff] }
 0x37f   :  { %v1939_v12 = vsel %vm729_vm0, %v1753_v35, 0.0  ;;  %v1912_v24 = vsel %vm729_vm0, %v1744_v8, 0.0  ;;  %v2826_v28 = vadd.f32 %v2825_v7, %v2824_v26  ;;  %v2474_v22 = vsel %vm2141_vm7, %v2410_v44, 0.0 }
 0x380   :  { %1940 = vadd.xlane.f32.xlu0 %v1939_v12  ;;  %v5629_v16 = vpop.permute.xlu0 %1623  ;;  %v1746_v19 = vsel %vm1682_vm6, %v3313_v14, 0.0  ;;  %1913 = vadd.xlane.f32.xlu1 %v1912_v24  ;;  %vm326_vm4 = vcmp.ne.s32.totalorder %v5641_v42, 4294967295  ;;  %vm6662_vm1 = vcmp.ne.s32.totalorder %v5647_v18, 4294967295  ;;  %vm1684_vm3 = vcmp.eq.s32.totalorder %v4309_v49, %v5400_v29 }
 0x381   :  { %v5652_v56 = vpop.xlane.xlu1 %1784  ;;  %v2943_v53 = vsel %vm326_vm4, 1.0, %v6819_v2  ;;  %v2942_v44 = vsel %vm6662_vm1, 1.0, %v6819_v2  ;;  %v2828_v7 = vadd.f32 %v2827_v48, %v2826_v28  ;;  %v2475_v57 = vsel %vm2141_vm7, %v2411_v59, 0.0  ;;  %v3316_v28 = vld [vmem:[%s6477_s0 + $0x1c0] sm:$0xff] }
 0x382   :  { %v2015_v8 = vsub.f32 %v4833_v15, %v6978_v3  ;;  %v2285_v35 = vsub.f32 1.0, %v6978_v3  ;;  %v2829_v29 = vsel %vm2141_vm7, %v2942_v44, 0.0  ;;  %v2079_v26 = vsel %vm283_vm8, %v2014_v52, 0.0  ;;  %v5678_v52 = vld [vmem:[%s6478_s1 + $0x170] sm:$0xff] }
 0x383   :  { %v2412_v12 = vsel %vm283_vm8, %v2348_v11, 0.0  ;;  %v1918_v24 = vsel %vm729_vm0, %v1746_v19, 0.0  ;;  %v2830_v18 = vadd.f32 %v2829_v29, %v2828_v7  ;;  %v1748_v59 = vsel %vm1684_vm3, %v3316_v28, 0.0  ;;  %6980 = vst [vmem:[#allocation49_spill] sm:$0xff] %v5678_v52  ;;  %v3318_v11 = vld [vmem:[%s6477_s0 + $0x1f8] sm:$0xff] }
 0x384   :  { %v1627_v14 = vpop.permute.xlu0 %1626  ;;  %1919 = vadd.xlane.f32.xlu1 %v1918_v24  ;;  %v2831_v15 = vsel %vm2141_vm7, %v2943_v53, 0.0  ;;  %vm327_vm8 = vcmp.ne.s32.totalorder %v5678_v52, 4294967295  ;;  %vm1686_vm1 = vcmp.eq.s32.totalorder %v4309_v49, %v5467_v23  ;;  %v5691_v53 = vld [vmem:[%s6478_s1 + $0x178] sm:$0xff]  ;;  %v2080_v3 = vsel %vm284_vm11, %v2015_v8, 0.0  ;;  %v3320_v8 = vld [vmem:[%s6477_s0 + $0x1d0] sm:$0xff] }
 0x385   :  { %vm1691_vm6 = vcmp.eq.s32.totalorder %v4309_v49, %v1627_v14  ;;  %v5686_v19 = vpop.xlane.xlu1 %1787  ;;  %vm328_vm3 = vcmp.ne.s32.totalorder %v5691_v53, 4294967295  ;;  %v2944_v44 = vsel %vm327_vm8, 1.0, %v6819_v2  ;;  %v2349_v29 = vmul.f32 %v2285_v35, %v2285_v35 }
 0x386   :  { %v1755_v48 = vsel %vm1691_vm6, %v3318_v11, 0.0  ;;  %v2016_v24 = vsub.f32 %v4836_v17, %v6982_v5  ;;  %v2945_v14 = vsel %vm328_vm3, 1.0, %v6819_v2  ;;  %v2286_v28 = vsub.f32 1.0, %v6982_v5 }
 0x387   :  { %v1924_v11 = vsel %vm729_vm0, %v1748_v59, 0.0  ;;  %v1945_v42 = vsel %vm729_vm0, %v1755_v48, 0.0  ;;  %v2832_v21 = vadd.f32 %v2831_v15, %v2830_v18  ;;  %v2476_v52 = vadd.f32 %v2475_v57, %v2474_v22 }
 0x388   :  { %v2145_v36 = vsel %vm2141_vm7, %v2079_v26, 0.0  ;;  %v1750_v17 = vsel %vm1686_vm1, %v3320_v8, 0.0  ;;  %1925 = vadd.xlane.f32.xlu1 %v1924_v11  ;;  %1946 = vadd.xlane.f32.xlu0 %v1945_v42  ;;  %v2833_v35 = vsel %vm2141_vm7, %v2944_v44, 0.0  ;;  %v2477_v59 = vsel %vm2141_vm7, %v2412_v12, 0.0  ;;  %v5729_v12 = vld [vmem:[%s6478_s1 + $0x180] sm:$0xff]  ;;  %v6984_v44 = vld [vmem:[#allocation114_spill] sm:$0xff] }
 0x389   :  { %vm1688_vm6 = vcmp.eq.s32.totalorder %v4309_v49, %v5553_v58  ;;  %v5718_v22 = vpop.xlane.xlu1 %1790  ;;  %v2835_v18 = vsel %vm2141_vm7, %v2945_v14, 0.0  ;;  %v2834_v57 = vadd.f32 %v2833_v35, %v2832_v21  ;;  %v2147_v26 = vsel %vm2141_vm7, %v2080_v3, 0.0 }
 0x38a   :  { %v2413_v23 = vsel %vm284_vm11, %v2349_v29, 0.0  ;;  %v2081_v42 = vsel %vm285_vm14, %v2016_v24, 0.0  ;;  %vm6667_vm1 = vcmp.ne.s32.totalorder %v5729_v12, 4294967295  ;;  %v2350_v48 = vmul.f32 %v2286_v28, %v2286_v28  ;;  %v3322_v24 = vld [vmem:[%s6477_s0 + $0x1e0] sm:$0xff] }
 0x38b   :  { %v2287_v5 = vsub.f32 1.0, %v6984_v44  ;;  %v1930_v21 = vsel %vm729_vm0, %v1750_v17, 0.0  ;;  %v2946_v7 = vsel %vm6667_vm1, 1.0, %v6819_v2  ;;  %v2146_v3 = vadd.f32 %v2145_v36, %v5596_v61 }
 0x38c   :  { %v2017_v29 = vsub.f32 %v4874_v30, %v6984_v44  ;;  %v1752_v14 = vsel %vm1688_vm6, %v3322_v24, 0.0  ;;  %1931 = vadd.xlane.f32.xlu1 %v1930_v21  ;;  %v2836_v28 = vadd.f32 %v2835_v18, %v2834_v57  ;;  %v2478_v11 = vadd.f32 %v2477_v59, %v2476_v52  ;;  %v5753_v30 = vld [vmem:[%s6478_s1 + $0x188] sm:$0xff]  ;;  %v6985_v18 = vld [vmem:[#allocation121_spill] sm:$0xff] }
 0x38d   :  { %vm1690_vm11 = vcmp.eq.s32.totalorder %v4309_v49, %v5629_v16  ;;  %v5748_v8 = vpop.xlane.xlu1 %1793  ;;  %vm330_vm1 = vcmp.ne.s32.totalorder %v5753_v30, 4294967295  ;;  %v2837_v36 = vsel %vm2141_vm7, %v2946_v7, 0.0  ;;  %v2148_v61 = vadd.f32 %v2147_v26, %v2146_v3 }
 0x38e   :  { %v2479_v58 = vsel %vm2141_vm7, %v2413_v23, 0.0  ;;  %v2149_v17 = vsel %vm2141_vm7, %v2081_v42, 0.0  ;;  %v2947_v52 = vsel %vm330_vm1, 1.0, %v6819_v2  ;;  %v2414_v35 = vsel %vm285_vm14, %v2350_v48, 0.0  ;;  %v3324_v23 = vld [vmem:[%s6477_s0 + $0x1f0] sm:$0xff] }
 0x38f   :  { %v2351_v59 = vmul.f32 %v2287_v5, %v2287_v5  ;;  %v2288_v57 = vsub.f32 1.0, %v6985_v18  ;;  %v1936_v44 = vsel %vm729_vm0, %v1752_v14, 0.0  ;;  %v2082_v7 = vsel %vm286_vm2, %v2017_v29, 0.0  ;;  %v6987_v5 = vld [vmem:[#allocation108_spill] sm:$0xff] }
 0x390   :  { %v2018_v26 = vsub.f32 %v4877_v50, %v6985_v18  ;;  %v1754_v15 = vsel %vm1690_vm11, %v3324_v23, 0.0  ;;  %1937 = vadd.xlane.f32.xlu1 %v1936_v44  ;;  %v2838_v42 = vadd.f32 %v2837_v36, %v2836_v28  ;;  %v1419_v48 = vmul.f32 0.6931472, %v5504_v54  ;;  %v5784_v50 = vld [vmem:[%s6478_s1 + $0x190] sm:$0xff] }
 0x391   :  { %3224 = vlog2.f32 %v6987_v5  ;;  %v5778_v3 = vpop.xlane.xlu1 %1796  ;;  %v2839_v29 = vsel %vm2141_vm7, %v2947_v52, 0.0  ;;  %vm331_vm14 = vcmp.ne.s32.totalorder %v5784_v50, 4294967295  ;;  %v2480_v24 = vadd.f32 %v2479_v58, %v2478_v11 }
 0x392   :  { %v2150_v49 = vadd.f32 %v2149_v17, %v2148_v61  ;;  %v2481_v16 = vsel %vm2141_vm7, %v2414_v35, 0.0  ;;  %v2948_v54 = vsel %vm331_vm14, 1.0, %v6819_v2  ;;  %v2151_v14 = vsel %vm2141_vm7, %v2082_v7, 0.0  ;;  %v6988_v17 = vld [vmem:[#allocation109_spill] sm:$0xff] }
 0x393   :  { %v2415_v28 = vsel %vm286_vm2, %v2351_v59, 0.0  ;;  %v2352_v36 = vmul.f32 %v2288_v57, %v2288_v57  ;;  %v1942_v52 = vsel %vm729_vm0, %v1754_v15, 0.0  ;;  %v2083_v18 = vsel %vm287_vm12, %v2018_v26, 0.0  ;;  %v5806_v59 = vld [vmem:[%s6478_s1 + $0x198] sm:$0xff]  ;;  %v6989_v57 = vld [vmem:[#allocation6_spill] sm:$0xff]  ;;  %v6990_v26 = vld [vmem:[#allocation7_spill] sm:$0xff] }
 0x394   :  { %v2019_v11 = vsub.f32 %v4880_v6, %v5550_v9  ;;  %v2289_v61 = vsub.f32 1.0, %v5550_v9  ;;  %1943 = vadd.xlane.f32.xlu1 %v1942_v52  ;;  %v2840_v58 = vadd.f32 %v2839_v29, %v2838_v42  ;;  %3226 = vlog2.f32 %v6988_v17 }
 0x395   :  { %v5801_v35 = vpop.xlane.xlu1 %1799  ;;  %vm332_vm0 = vcmp.ne.s32.totalorder %v5806_v59, 4294967295  ;;  %v5811_v44 = vadd.f32 %v5548_v10, %v6989_v57  ;;  %v2841_v6 = vsel %vm2141_vm7, %v2948_v54, 0.0  ;;  %v2482_v9 = vadd.f32 %v2481_v16, %v2480_v24 }
 0x396   :  { %v2152_v21 = vadd.f32 %v2151_v14, %v2150_v49  ;;  %v2949_v7 = vsel %vm332_vm0, 1.0, %v6819_v2  ;;  %v5818_v23 = vadd.f32 %v1419_v48, %v6990_v26  ;;  %v2483_v15 = vsel %vm2141_vm7, %v2415_v28, 0.0 }
 0x397   :  { %v2153_v42 = vsel %vm2141_vm7, %v2083_v18, 0.0  ;;  %v2416_v5 = vsel %vm287_vm12, %v2352_v36, 0.0  ;;  %v2290_v10 = vsub.f32 1.0, %v5611_v43  ;;  %v2084_v29 = vsel %vm288_vm5, %v2019_v11, 0.0  ;;  %v6991_v36 = vld [vmem:[#allocation110_spill] sm:$0xff] }
 0x398   :  { %v2353_v24 = vmul.f32 %v2289_v61, %v2289_v61  ;;  %v2020_v49 = vsub.f32 %v4883_v4, %v5611_v43  ;;  %v2842_v16 = vadd.f32 %v2841_v6, %v2840_v58  ;;  %v1421_v48 = vmul.f32 0.6931472, %v5512_v55 }
 0x399   :  { %v1423_v54 = vmul.f32 0.6931472, %v5527_v39  ;;  %v5831_v14 = vpop.xlane.xlu1 %1802  ;;  %v2843_v28 = vsel %vm2141_vm7, %v2949_v7, 0.0  ;;  %vm6669_vm2 = vcmp.ne.s32.totalorder %v5837_v0, 4294967295  ;;  %3228 = vlog2.f32 %v6991_v36  ;;  %v5859_v7 = vld [vmem:[%s6478_s1 + $0x1a8] sm:$0xff] }
 0x39a   :  { %v2484_v52 = vadd.f32 %v2483_v15, %v2482_v9  ;;  %v2154_v4 = vadd.f32 %v2153_v42, %v2152_v21  ;;  %v2950_v55 = vsel %vm6669_vm2, 1.0, %v6819_v2  ;;  %v2485_v43 = vsel %vm2141_vm7, %v2416_v5, 0.0 }
 0x39b   :  { %v3225_v39 = vpop.eup %3224  ;;  %v2155_v18 = vsel %vm2141_vm7, %v2084_v29, 0.0  ;;  %v2354_v11 = vmul.f32 %v2290_v10, %v2290_v10  ;;  %v2291_v61 = vsub.f32 1.0, %v5652_v56  ;;  %v2417_v58 = vsel %vm288_vm5, %v2353_v24, 0.0 }
 0x39c   :  { %v2085_v17 = vsel %vm289_vm13, %v2020_v49, 0.0  ;;  %v2021_v57 = vsub.f32 %v4902_v47, %v5652_v56  ;;  %v2844_v6 = vadd.f32 %v2843_v28, %v2842_v16  ;;  %v1425_v9 = vmul.f32 0.6931472, %v5571_v41  ;;  %v6993_v41 = vld [vmem:[#allocation9_spill] sm:$0xff] }
 0x39d   :  { %v5854_v21 = vpop.xlane.xlu1 %1805  ;;  %vm334_vm12 = vcmp.ne.s32.totalorder %v5859_v7, 4294967295  ;;  %v5863_v26 = vadd.f32 %v1421_v48, %v6992_v32  ;;  %v2845_v15 = vsel %vm2141_vm7, %v2950_v55, 0.0  ;;  %v2486_v42 = vadd.f32 %v2485_v43, %v2484_v52  ;;  %v6995_v43 = vld [vmem:[#allocation10_spill] sm:$0xff] }
 0x39e   :  { %v2156_v5 = vadd.f32 %v2155_v18, %v2154_v4  ;;  %v2951_v47 = vsel %vm334_vm12, 1.0, %v6819_v2  ;;  %v5870_v56 = vadd.f32 %v1423_v54, %v6993_v41  ;;  %v3227_v10 = vpop.eup %3226  ;;  %v2487_v29 = vsel %vm2141_vm7, %v2417_v58, 0.0  ;;  %v6998_v41 = vld [vmem:[#allocation11_spill] sm:$0xff] }
 0x39f   :  { %v2157_v24 = vsel %vm2141_vm7, %v2085_v17, 0.0  ;;  %v2418_v49 = vsel %vm289_vm13, %v2354_v11, 0.0  ;;  %v2355_v16 = vmul.f32 %v2291_v61, %v2291_v61  ;;  %vm6994_vm5 = vcmp.ne.s32.totalorder %v4451_v31, 4294967295 }
 0x3a0   :  { %v2086_v48 = vsel %vm6994_vm5, %v2021_v57, 0.0  ;;  %v2022_v28 = vsub.f32 %v4911_v27, %v5686_v19  ;;  %v2292_v36 = vsub.f32 1.0, %v5686_v19  ;;  %v2846_v52 = vadd.f32 %v2845_v15, %v2844_v6  ;;  %vm6996_vm6 = vmmov %vm6994_vm5 }
 0x3a1   :  { %v1427_v54 = vmul.f32 0.6931472, %v5579_v46  ;;  %v5882_v4 = vpop.xlane.xlu1 %1808  ;;  %v2847_v55 = vsel %vm2141_vm7, %v2951_v47, 0.0  ;;  %v5886_v18 = vadd.f32 %v1425_v9, %v6995_v43  ;;  %vm6668_vm13 = vcmp.ne.s32.totalorder %v5891_v25, 4294967295  ;;  %v5911_v47 = vld [vmem:[%s6478_s1 + $0x1b8] sm:$0xff] }
 0x3a2   :  { %v1429_v27 = vmul.f32 0.6931472, %v3225_v39  ;;  %v2488_v11 = vadd.f32 %v2487_v29, %v2486_v42  ;;  %v2158_v19 = vadd.f32 %v2157_v24, %v2156_v5  ;;  %v2952_v46 = vsel %vm6668_vm13, 1.0, %v6819_v2 }
 0x3a3   :  { %v2489_v61 = vsel %vm2141_vm7, %v2418_v49, 0.0  ;;  %v2159_v58 = vsel %vm2141_vm7, %v2086_v48, 0.0  ;;  %v2419_v17 = vsel %vm6996_vm6, %v2355_v16, 0.0  ;;  %v2293_v57 = vsub.f32 1.0, %v5718_v22  ;;  %v3229_v6 = vpop.eup %3228 }
 0x3a4   :  { %vm6997_vm11 = vcmp.ne.s32.totalorder %v4364_v33, 4294967295  ;;  %v2356_v39 = vmul.f32 %v2292_v36, %v2292_v36  ;;  %v2023_v32 = vsub.f32 %v4915_v20, %v5718_v22  ;;  %v2848_v15 = vadd.f32 %v2847_v55, %v2846_v52  ;;  %v6999_v22 = vld [vmem:[#allocation12_spill] sm:$0xff]  ;;  %v5946_v33 = vld [vmem:[%s6478_s1 + $0x1c0] sm:$0xff] }
 0x3a5   :  { %v2087_v9 = vsel %vm6997_vm11, %v2022_v28, 0.0  ;;  %v1431_v42 = vmul.f32 0.6931472, %v3227_v10  ;;  %v5906_v5 = vpop.xlane.xlu1 %1811  ;;  %vm336_vm5 = vcmp.ne.s32.totalorder %v5911_v47, 4294967295  ;;  %v2849_v31 = vsel %vm2141_vm7, %v2952_v46, 0.0  ;;  %vm7000_vm6 = vmmov %vm6997_vm11  ;;  %v5940_v46 = vld [vmem:[%s6478_s1 + $0x1c8] sm:$0xff] }
 0x3a6   :  { %v5916_v29 = vadd.f32 %v1427_v54, %v6998_v41  ;;  %v2490_v24 = vadd.f32 %v2489_v61, %v2488_v11  ;;  %v2160_v49 = vadd.f32 %v2159_v58, %v2158_v19  ;;  %v2953_v20 = vsel %vm336_vm5, 1.0, %v6819_v2 }
 0x3a7   :  { %v5922_v10 = vadd.f32 %v1429_v27, %v6999_v22  ;;  %v2491_v16 = vsel %vm2141_vm7, %v2419_v17, 0.0  ;;  %v2161_v48 = vsel %vm2141_vm7, %v2087_v9, 0.0  ;;  %v2357_v28 = vmul.f32 %v2293_v57, %v2293_v57 }
 0x3a8   :  { %v2294_v36 = vsub.f32 1.0, %v5748_v8  ;;  %v2420_v52 = vsel %vm7000_vm6, %v2356_v39, 0.0  ;;  %vm7001_vm11 = vcmp.ne.s32.totalorder %v4457_v40, 4294967295  ;;  %v2024_v55 = vsub.f32 %v4941_v1, %v5748_v8 }
 0x3a9   :  { %v2088_v54 = vsel %vm7001_vm11, %v2023_v32, 0.0  ;;  %v2850_v43 = vadd.f32 %v2849_v31, %v2848_v15  ;;  %v2295_v27 = vsub.f32 1.0, %v5778_v3  ;;  %v5934_v11 = vpop.xlane.xlu1 %1814  ;;  %v2851_v19 = vsel %vm2141_vm7, %v2953_v20, 0.0 }
 0x3aa   :  { %vm6671_vm6 = vcmp.ne.s32.totalorder %v5940_v46, 4294967295  ;;  %vm6670_vm11 = vcmp.ne.s32.totalorder %v5946_v33, 4294967295  ;;  %v2492_v1 = vadd.f32 %v2491_v16, %v2490_v24  ;;  %v2162_v8 = vadd.f32 %v2161_v48, %v2160_v49  ;;  %v7004_v16 = vld [vmem:[#allocation13_spill] sm:$0xff] }
 0x3ab   :  { %v2955_v61 = vsel %vm6671_vm6, 1.0, %v6819_v2  ;;  %v2954_v58 = vsel %vm6670_vm11, 1.0, %v6819_v2  ;;  %v2493_v17 = vsel %vm2141_vm7, %v2420_v52, 0.0  ;;  %v2163_v57 = vsel %vm2141_vm7, %v2088_v54, 0.0 }
 0x3ac   :  { %vm7002_vm13 = vcmp.ne.s32.totalorder %v4457_v40, 4294967295  ;;  %v2358_v39 = vmul.f32 %v2294_v36, %v2294_v36  ;;  %vm7003_vm2 = vcmp.ne.s32.totalorder %v4371_v62, 4294967295  ;;  %v2025_v15 = vsub.f32 %v4944_v60, %v5778_v3  ;;  %v5974_v60 = vld [vmem:[%s6478_s1 + $0x1d8] sm:$0xff] }
 0x3ad   :  { %v2421_v9 = vsel %vm7002_vm13, %v2357_v28, 0.0  ;;  %v2089_v32 = vsel %vm7003_vm2, %v2024_v55, 0.0  ;;  %v2296_v31 = vsub.f32 1.0, %v5801_v35  ;;  %v2852_v41 = vadd.f32 %v2851_v19, %v2850_v43  ;;  %v5964_v20 = vpop.xlane.xlu1 %1817 }
 0x3ae   :  { %v1433_v24 = vmul.f32 0.6931472, %v3229_v6  ;;  %v2359_v49 = vmul.f32 %v2295_v27, %v2295_v27  ;;  %v2853_v22 = vsel %vm2141_vm7, %v2954_v58, 0.0  ;;  %v5968_v48 = vadd.f32 %v1431_v42, %v7004_v16 }
 0x3af   :  { %v2494_v40 = vadd.f32 %v2493_v17, %v2492_v1  ;;  %v2164_v28 = vadd.f32 %v2163_v57, %v2162_v8  ;;  %v2855_v36 = vsel %vm2141_vm7, %v2955_v61, 0.0  ;;  %vm6672_vm2 = vcmp.ne.s32.totalorder %v5974_v60, 4294967295  ;;  %v5997_v61 = vld [vmem:[%s6478_s1 + $0x1d0] sm:$0xff] }
 0x3b0   :  { %v2495_v3 = vsel %vm2141_vm7, %v2421_v9, 0.0  ;;  %v2165_v6 = vsel %vm2141_vm7, %v2089_v32, 0.0  ;;  %vm7005_vm13 = vcmp.ne.s32.totalorder %v4371_v62, 4294967295  ;;  %v2297_v42 = vsub.f32 1.0, %v5831_v14 }
 0x3b1   :  { %v2422_v52 = vsel %vm7005_vm13, %v2358_v39, 0.0  ;;  %vm7006_vm11 = vcmp.ne.s32.totalorder %v4464_v45, 4294967295  ;;  %v2026_v55 = vsub.f32 %v4967_v51, %v5801_v35  ;;  %v2360_v43 = vmul.f32 %v2296_v31, %v2296_v31  ;;  %v5989_v8 = vpop.xlane.xlu1 %1820  ;;  %v6003_v45 = vld [vmem:[%s6478_s1 + $0x1e8] sm:$0xff] }
 0x3b2   :  { %v2090_v54 = vsel %vm7006_vm11, %v2025_v15, 0.0  ;;  %v2854_v27 = vadd.f32 %v2853_v22, %v2852_v41  ;;  %vm7007_vm6 = vmmov %vm7006_vm11  ;;  %v2298_v1 = vsub.f32 1.0, %v5854_v21  ;;  %v2957_v62 = vsel %vm6672_vm2, 1.0, %v6819_v2 }
 0x3b3   :  { %v2423_v19 = vsel %vm7007_vm6, %v2359_v49, 0.0  ;;  %vm6674_vm11 = vcmp.ne.s32.totalorder %v5997_v61, 4294967295  ;;  %v2496_v51 = vadd.f32 %v2495_v3, %v2494_v40  ;;  %v2166_v35 = vadd.f32 %v2165_v6, %v2164_v28  ;;  %v7010_v49 = vld [vmem:[#allocation21_spill] sm:$0xff] }
 0x3b4   :  { %vm6673_vm6 = vcmp.ne.s32.totalorder %v6003_v45, 4294967295  ;;  %v2956_v58 = vsel %vm6674_vm11, 1.0, %v6819_v2  ;;  %v2497_v17 = vsel %vm2141_vm7, %v2422_v52, 0.0  ;;  %v2167_v57 = vsel %vm2141_vm7, %v2090_v54, 0.0 }
 0x3b5   :  { %v2027_v9 = vsub.f32 %v5018_v13, %v5831_v14  ;;  %v2361_v39 = vmul.f32 %v2297_v42, %v2297_v42  ;;  %v2499_v32 = vsel %vm2141_vm7, %v2423_v19, 0.0  ;;  %vm7008_vm13 = vcmp.ne.s32.totalorder %v4378_v38, 4294967295  ;;  %v6021_v28 = vpop.xlane.xlu1 %1823  ;;  %v7011_v38 = vld [vmem:[#allocation14_spill] sm:$0xff]  ;;  %v7012_v42 = vld [vmem:[#allocation115_spill] sm:$0xff] }
 0x3b6   :  { %v2091_v15 = vsel %vm7008_vm13, %v2026_v55, 0.0  ;;  %vm7009_vm2 = vmmov %vm7008_vm13  ;;  %v2856_v41 = vadd.f32 %v2855_v36, %v2854_v27  ;;  %v2028_v22 = vsub.f32 %v7010_v49, %v5854_v21  ;;  %v2362_v16 = vmul.f32 %v2298_v1, %v2298_v1  ;;  %v7015_v55 = vld [vmem:[#allocation68_spill] sm:$0xff] }
 0x3b7   :  { %v2424_v31 = vsel %vm7009_vm2, %v2360_v43, 0.0  ;;  %v2299_v40 = vsub.f32 1.0, %v5882_v4  ;;  %v2857_v13 = vsel %vm2141_vm7, %v2956_v58, 0.0  ;;  %v2498_v14 = vadd.f32 %v2497_v17, %v2496_v51  ;;  %v7016_v51 = vld [vmem:[#allocation17_spill] sm:$0xff] }
 0x3b8   :  { %v2859_v3 = vsel %vm2141_vm7, %v2957_v62, 0.0  ;;  %v2959_v6 = vsel %vm6673_vm6, 1.0, %v6819_v2  ;;  %v6029_v52 = vadd.f32 %v1433_v24, %v7011_v38  ;;  %v2168_v36 = vadd.f32 %v2167_v57, %v2166_v35  ;;  %v6048_v57 = vld [vmem:[%s6478_s1 + $0x1e0] sm:$0xff] }
 0x3b9   :  { %vm7013_vm2 = vcmp.ne.s32.totalorder %v7012_v42, 4294967295  ;;  %v2029_v43 = vsub.f32 %v7015_v55, %v5882_v4  ;;  %v2500_v27 = vadd.f32 %v2499_v32, %v2498_v14  ;;  %v2169_v19 = vsel %vm2141_vm7, %v2091_v15, 0.0  ;;  %v6043_v17 = vpop.xlane.xlu1 %1826 }
 0x3ba   :  { %v2092_v21 = vsel %vm7013_vm2, %v2027_v9, 0.0  ;;  %vm7014_vm13 = vmmov %vm7013_vm2  ;;  %v2501_v1 = vsel %vm2141_vm7, %v2424_v31, 0.0  ;;  %v2858_v62 = vadd.f32 %v2857_v13, %v2856_v41  ;;  %vm7017_vm6 = vcmp.ne.s32.totalorder %v7016_v51, 4294967295  ;;  %v7019_v41 = vld [vmem:[#allocation116_spill] sm:$0xff] }
 0x3bb   :  { %v2425_v54 = vsel %vm7014_vm13, %v2361_v39, 0.0  ;;  %v2093_v24 = vsel %vm7017_vm6, %v2028_v22, 0.0  ;;  %vm7018_vm11 = vmmov %vm7017_vm6  ;;  %v2363_v58 = vmul.f32 %v2299_v40, %v2299_v40  ;;  %vm6675_vm2 = vcmp.ne.s32.totalorder %v6048_v57, 4294967295  ;;  %v6078_v51 = vld [vmem:[%s6478_s1 + $0x1f8] sm:$0xff] }
 0x3bc   :  { %v2426_v35 = vsel %vm7018_vm11, %v2362_v16, 0.0  ;;  %v2171_v4 = vsel %vm2141_vm7, %v2092_v21, 0.0  ;;  %v2503_v9 = vsel %vm2141_vm7, %v2425_v54, 0.0  ;;  %v2300_v39 = vsub.f32 1.0, %v5906_v5 }
 0x3bd   :  { %v2958_v32 = vsel %vm6675_vm2, 1.0, %v6819_v2  ;;  %v2170_v15 = vadd.f32 %v2169_v19, %v2168_v36  ;;  %v2502_v31 = vadd.f32 %v2501_v1, %v2500_v27  ;;  %vm7020_vm11 = vcmp.ne.s32.totalorder %v7019_v41, 4294967295  ;;  %v6066_v36 = vpop.xlane.xlu1 %1829 }
 0x3be   :  { %v2094_v49 = vsel %vm7020_vm11, %v2029_v43, 0.0  ;;  %v2030_v22 = vsub.f32 %v5032_v37, %v5906_v5  ;;  %v2173_v16 = vsel %vm2141_vm7, %v2093_v24, 0.0  ;;  %v2505_v40 = vsel %vm2141_vm7, %v2426_v35, 0.0  ;;  %vm7021_vm6 = vmmov %vm7020_vm11  ;;  %v7022_v37 = vld [vmem:[#allocation69_spill] sm:$0xff] }
 0x3bf   :  { %v2301_v13 = vsub.f32 1.0, %v5934_v11  ;;  %v2860_v14 = vadd.f32 %v2859_v3, %v2858_v62  ;;  %v2172_v38 = vadd.f32 %v2171_v4, %v2170_v15  ;;  %v2504_v42 = vadd.f32 %v2503_v9, %v2502_v31  ;;  %v7023_v3 = vld [vmem:[#allocation18_spill] sm:$0xff]  ;;  %v1848_v4 = vpop.xlane.xlu0 %1847  ;;  %v6090_v31 = vld [vmem:[%s6478_s1 + $0x1f0] sm:$0xff] }
 0x3c0   :  { %v2427_v21 = vsel %vm7021_vm6, %v2363_v58, 0.0  ;;  %v2861_v54 = vsel %vm2141_vm7, %v2958_v32, 0.0  ;;  %v2175_v55 = vsel %vm2141_vm7, %v2094_v49, 0.0  ;;  %v2364_v43 = vmul.f32 %v2300_v39, %v2300_v39  ;;  %v7025_v58 = vld [vmem:[#allocation70_spill] sm:$0xff] }
 0x3c1   :  { %v2031_v5 = vsub.f32 %v7022_v37, %v5934_v11  ;;  %v2302_v27 = vsub.f32 1.0, %v5964_v20  ;;  %v2174_v19 = vadd.f32 %v2173_v16, %v2172_v38  ;;  %v2506_v1 = vadd.f32 %v2505_v40, %v2504_v42  ;;  %v6085_v15 = vpop.xlane.xlu1 %1832 }
 0x3c2   :  { %vm7024_vm13 = vcmp.ne.s32.totalorder %v7023_v3, 4294967295  ;;  %vm6677_vm11 = vcmp.ne.s32.totalorder %v6078_v51, 4294967295  ;;  %v2507_v24 = vsel %vm2141_vm7, %v2427_v21, 0.0  ;;  %v2365_v35 = vmul.f32 %v2301_v13, %v2301_v13  ;;  %v7027_v21 = vld [vmem:[#allocation19_spill] sm:$0xff] }
 0x3c3   :  { %v2095_v62 = vsel %vm7024_vm13, %v2030_v22, 0.0  ;;  %v2032_v11 = vsub.f32 %v7025_v58, %v5964_v20  ;;  %v2862_v9 = vadd.f32 %v2861_v54, %v2860_v14  ;;  %v2176_v39 = vadd.f32 %v2175_v55, %v2174_v19  ;;  %v7029_v55 = vld [vmem:[#allocation23_spill] sm:$0xff] }
 0x3c4   :  { %v2303_v32 = vsub.f32 1.0, %v5989_v8  ;;  %vm6676_vm6 = vcmp.ne.s32.totalorder %v6090_v31, 4294967295  ;;  %v2863_v41 = vsel %vm2141_vm7, %v2959_v6, 0.0  ;;  %v2177_v49 = vsel %vm2141_vm7, %v2095_v62, 0.0 }
 0x3c5   :  { %v2428_v20 = vsel %vm7024_vm13, %v2364_v43, 0.0  ;;  %v2096_v16 = vsel %vm300_vm10, %v2031_v5, 0.0  ;;  %v2366_v40 = vmul.f32 %v2302_v27, %v2302_v27  ;;  %v2508_v13 = vadd.f32 %v2507_v24, %v2506_v1  ;;  %v6113_v3 = vpop.xlane.xlu1 %1835 }
 0x3c6   :  { %v2312_v14 = vsub.f32 1.0, %v1848_v4  ;;  %v2304_v38 = vsub.f32 1.0, %v6021_v28  ;;  %v2960_v42 = vsel %vm6676_vm6, 1.0, %v6819_v2  ;;  %v2429_v6 = vsel %vm300_vm10, %v2365_v35, 0.0  ;;  %v7031_v35 = vld [vmem:[#allocation24_spill] sm:$0xff] }
 0x3c7   :  { %vm7028_vm2 = vcmp.ne.s32.totalorder %v7027_v21, 4294967295  ;;  %v2033_v43 = vsub.f32 %v7029_v55, %v5989_v8  ;;  %v6109_v37 = vadd.f32 %v2863_v41, %v2862_v9  ;;  %v2178_v5 = vadd.f32 %v2177_v49, %v2176_v39  ;;  %v7039_v21 = vld [vmem:[#allocation20_spill] sm:$0xff] }
 0x3c8   :  { %v2097_v54 = vsel %vm7028_vm2, %v2032_v11, 0.0  ;;  %v2509_v27 = vsel %vm2141_vm7, %v2428_v20, 0.0  ;;  %v2179_v19 = vsel %vm2141_vm7, %v2096_v16, 0.0  ;;  %v2367_v1 = vmul.f32 %v2303_v32, %v2303_v32  ;;  %vm7030_vm13 = vmmov %vm7028_vm2  ;;  %v7033_v20 = vld [vmem:[#allocation118_spill] sm:$0xff] }
 0x3c9   :  { %v2430_v62 = vsel %vm7030_vm13, %v2366_v40, 0.0  ;;  %v2042_v24 = vsub.f32 %v5157_v63, %v1848_v4  ;;  %v2034_v58 = vsub.f32 %v7031_v35, %v6021_v28  ;;  %v6123_v8 = vsel %vm6677_vm11, 1.0, %v6819_v2  ;;  %v7035_v63 = vld [vmem:[#allocation71_spill] sm:$0xff]  ;;  %v1839_v40 = vpop.xlane.xlu1 %1838 }
 0x3ca   :  { %7032 = vst [vmem:[#allocation99_spill] sm:$0xff] %v6123_v8  ;;  %v2511_v11 = vsel %vm2141_vm7, %v2429_v6, 0.0  ;;  %v2181_v9 = vsel %vm2141_vm7, %v2097_v54, 0.0  ;;  %v2376_v39 = vmul.f32 %v2312_v14, %v2312_v14  ;;  %v2368_v32 = vmul.f32 %v2304_v38, %v2304_v38 }
 0x3cb   :  { %v2510_v41 = vadd.f32 %v2509_v27, %v2508_v13  ;;  %v2180_v49 = vadd.f32 %v2179_v19, %v2178_v5  ;;  %vm7034_vm10 = vcmp.ne.s32.totalorder %v7033_v20, 4294967295  ;;  %v2035_v4 = vsub.f32 %v7035_v63, %v6043_v17  ;;  %v7043_v19 = vld [vmem:[#allocation22_spill] sm:$0xff]  ;;  %v7046_v20 = vld [vmem:[#allocation75_spill] sm:$0xff] }
 0x3cc   :  { %v2098_v22 = vsel %vm7034_vm10, %v2033_v43, 0.0  ;;  %v2513_v28 = vsel %vm2141_vm7, %v2430_v62, 0.0  ;;  %vm7036_vm2 = vmmov %vm7034_vm10  ;;  %v2305_v16 = vsub.f32 1.0, %v6043_v17  ;;  %v6136_v6 = vsel %vm2141_vm7, %v2960_v42, 0.0  ;;  %v7045_v62 = vld [vmem:[#allocation73_spill] sm:$0xff] }
 0x3cd   :  { %v2431_v2 = vsel %vm7036_vm2, %v2367_v1, 0.0  ;;  %7037 = vst [vmem:[#allocation50_spill] sm:$0xff] %v6136_v6  ;;  %v2512_v14 = vadd.f32 %v2511_v11, %v2510_v41  ;;  %v2182_v13 = vadd.f32 %v2181_v9, %v2180_v49  ;;  %vm7038_vm13 = vcmp.ne.s32.totalorder %v5234_v34, 4294967295  ;;  %v1875_v11 = vpop.xlane.xlu0 %1874 }
 0x3ce   :  { %v2107_v38 = vsel %vm7038_vm13, %v2042_v24, 0.0  ;;  %vm7040_vm10 = vcmp.ne.s32.totalorder %v7039_v21, 4294967295  ;;  %v2183_v55 = vsel %vm2141_vm7, %v2098_v22, 0.0  ;;  %vm7041_vm6 = vmmov %vm7038_vm13  ;;  %v2306_v5 = vsub.f32 1.0, %v6066_v36  ;;  %v7050_v21 = vld [vmem:[#allocation76_spill] sm:$0xff] }
 0x3cf   :  { %v2099_v54 = vsel %vm7040_vm10, %v2034_v58, 0.0  ;;  %v2440_v43 = vsel %vm7041_vm6, %v2376_v39, 0.0  ;;  %vm7042_vm2 = vmmov %vm7040_vm10  ;;  %v2514_v42 = vadd.f32 %v2513_v28, %v2512_v14  ;;  %v2515_v27 = vsel %vm2141_vm7, %v2431_v2, 0.0  ;;  %v1842_v39 = vpop.xlane.xlu1 %1841 }
 0x3d0   :  { %v2432_v17 = vsel %vm7042_vm2, %v2368_v32, 0.0  ;;  %vm7044_vm11 = vcmp.ne.s32.totalorder %v7043_v19, 4294967295  ;;  %v2036_v24 = vsub.f32 %v7045_v62, %v6066_v36  ;;  %v6154_v35 = vsel %vm2141_vm7, %v2107_v38, 0.0  ;;  %v7049_v38 = vld [vmem:[#allocation83_spill] sm:$0xff] }
 0x3d1   :  { %v2100_v1 = vsel %vm7044_vm11, %v2035_v4, 0.0  ;;  %v2185_v34 = vsel %vm2141_vm7, %v2099_v54, 0.0  ;;  %v2369_v58 = vmul.f32 %v2305_v16, %v2305_v16  ;;  %v2307_v9 = vsub.f32 1.0, %v6085_v15  ;;  %v7047_v16 = vld [vmem:[#allocation72_spill] sm:$0xff] }
 0x3d2   :  { %v2184_v32 = vadd.f32 %v2183_v55, %v2182_v13  ;;  %v6159_v41 = vsel %vm2141_vm7, %v2440_v43, 0.0  ;;  %v2517_v49 = vsel %vm2141_vm7, %v2432_v17, 0.0  ;;  %v2037_v22 = vsub.f32 %v7046_v20, %v6085_v15 }
 0x3d3   :  { %v2516_v36 = vadd.f32 %v2515_v27, %v2514_v42  ;;  %v2187_v63 = vsel %vm2141_vm7, %v2100_v1, 0.0  ;;  %v2370_v4 = vmul.f32 %v2306_v5, %v2306_v5  ;;  %v2308_v28 = vsub.f32 1.0, %v6113_v3  ;;  %v1845_v42 = vpop.xlane.xlu1 %1844  ;;  %v7052_v1 = vld [vmem:[#allocation74_spill] sm:$0xff] }
 0x3d4   :  { %v2186_v2 = vadd.f32 %v2185_v34, %v2184_v32  ;;  %vm7048_vm11 = vcmp.ne.s32.totalorder %v7047_v16, 4294967295  ;;  %v2051_v13 = vsub.f32 %v7049_v38, %v1875_v11  ;;  %v2038_v54 = vsub.f32 %v7050_v21, %v6113_v3  ;;  %v7054_v34 = vld [vmem:[#allocation25_spill] sm:$0xff]  ;;  %v1881_v21 = vpop.xlane.xlu0 %1880 }
 0x3d5   :  { %v2101_v14 = vsel %vm7048_vm11, %v2036_v24, 0.0  ;;  %v2518_v55 = vadd.f32 %v2517_v49, %v2516_v36  ;;  %vm7051_vm6 = vcmp.ne.s32.totalorder %v7043_v19, 4294967295  ;;  %v2371_v15 = vmul.f32 %v2307_v9, %v2307_v9  ;;  %vm7055_vm10 = vmmov %vm7048_vm11  ;;  %v7058_v36 = vld [vmem:[#allocation77_spill] sm:$0xff] }
 0x3d6   :  { %v2433_v43 = vsel %vm7051_vm6, %v2369_v58, 0.0  ;;  %v2309_v17 = vsub.f32 1.0, %v1839_v40  ;;  %v2188_v27 = vadd.f32 %v2187_v63, %v2186_v2  ;;  %v2321_v5 = vsub.f32 1.0, %v1875_v11  ;;  %v7056_v58 = vld [vmem:[#allocation93_spill] sm:$0xff]  ;;  %v7060_v63 = vld [vmem:[#allocation26_spill] sm:$0xff] }
 0x3d7   :  { %vm7053_vm13 = vcmp.ne.s32.totalorder %v7052_v1, 4294967295  ;;  %v2039_v32 = vsub.f32 %v7054_v34, %v1839_v40  ;;  %v2189_v24 = vsel %vm2141_vm7, %v2101_v14, 0.0  ;;  %v2434_v20 = vsel %vm7055_vm10, %v2370_v4, 0.0  ;;  %v1851_v4 = vpop.xlane.xlu1 %1850  ;;  %v7064_v34 = vld [vmem:[#allocation27_spill] sm:$0xff] }
 0x3d8   :  { %v2102_v62 = vsel %vm7053_vm13, %v2037_v22, 0.0  ;;  %v2372_v3 = vmul.f32 %v2308_v28, %v2308_v28  ;;  %v2310_v49 = vsub.f32 1.0, %v1842_v39  ;;  %v2519_v19 = vsel %vm2141_vm7, %v2433_v43, 0.0  ;;  %vm7061_vm6 = vmmov %vm7053_vm13  ;;  %v7062_v43 = vld [vmem:[#allocation78_spill] sm:$0xff] }
 0x3d9   :  { %vm7057_vm2 = vcmp.ne.s32.totalorder %v7056_v58, 4294967295  ;;  %vm7059_vm11 = vcmp.ne.s32.totalorder %v7058_v36, 4294967295  ;;  %v2040_v2 = vsub.f32 %v7060_v63, %v1842_v39  ;;  %v2191_v22 = vsel %vm2141_vm7, %v2102_v62, 0.0 }
 0x3da   :  { %v2116_v9 = vsel %vm7057_vm2, %v2051_v13, 0.0  ;;  %v2103_v11 = vsel %vm7059_vm11, %v2038_v54, 0.0  ;;  %v2435_v40 = vsel %vm7061_vm6, %v2371_v15, 0.0  ;;  %v2373_v14 = vmul.f32 %v2309_v17, %v2309_v17  ;;  %vm7065_vm10 = vmmov %vm7059_vm11 }
 0x3db   :  { %v2311_v16 = vsub.f32 1.0, %v1845_v42  ;;  %v2190_v28 = vadd.f32 %v2189_v24, %v2188_v27  ;;  %v2521_v38 = vsel %vm2141_vm7, %v2434_v20, 0.0  ;;  %vm7063_vm13 = vcmp.ne.s32.totalorder %v7062_v43, 4294967295  ;;  %v7066_v27 = vld [vmem:[#allocation80_spill] sm:$0xff] }
 0x3dc   :  { %v2104_v13 = vsel %vm7063_vm13, %v2039_v32, 0.0  ;;  %v2041_v8 = vsub.f32 %v7064_v34, %v1845_v42  ;;  %v2520_v54 = vadd.f32 %v2519_v19, %v2518_v55  ;;  %v2193_v39 = vsel %vm2141_vm7, %v2103_v11, 0.0  ;;  %vm7068_vm11 = vmmov %vm7063_vm13  ;;  %v1854_v32 = vpop.xlane.xlu1 %1853 }
 0x3dd   :  { %v2436_v62 = vsel %vm7065_vm10, %v2372_v3, 0.0  ;;  %v2374_v1 = vmul.f32 %v2310_v49, %v2310_v49  ;;  %v2385_v15 = vmul.f32 %v2321_v5, %v2321_v5  ;;  %v2192_v17 = vadd.f32 %v2191_v22, %v2190_v28  ;;  %v7069_v49 = vld [vmem:[#allocation31_spill] sm:$0xff]  ;;  %v7071_v22 = vld [vmem:[#allocation85_spill] sm:$0xff] }
 0x3de   :  { %v2523_v63 = vsel %vm2141_vm7, %v2435_v40, 0.0  ;;  %vm7067_vm2 = vcmp.ne.s32.totalorder %v7066_v27, 4294967295  ;;  %v2522_v20 = vadd.f32 %v2521_v38, %v2520_v54  ;;  %v2195_v6 = vsel %vm2141_vm7, %v2104_v13, 0.0 }
 0x3df   :  { %v2105_v24 = vsel %vm7067_vm2, %v2040_v2, 0.0  ;;  %v2437_v42 = vsel %vm7068_vm11, %v2373_v14, 0.0  ;;  %v2375_v55 = vmul.f32 %v2311_v16, %v2311_v16  ;;  %v2323_v19 = vsub.f32 1.0, %v1881_v21  ;;  %vm7072_vm13 = vmmov %vm7067_vm2  ;;  %v1887_v16 = vpop.xlane.xlu0 %1886 }
 0x3e0   :  { %v2194_v11 = vadd.f32 %v2193_v39, %v2192_v17  ;;  %v2525_v3 = vsel %vm2141_vm7, %v2436_v62, 0.0  ;;  %vm7070_vm6 = vcmp.ne.s32.totalorder %v7069_v49, 4294967295  ;;  %v2524_v36 = vadd.f32 %v2523_v63, %v2522_v20  ;;  %v1857_v39 = vpop.xlane.xlu1 %1856  ;;  %v7075_v17 = vld [vmem:[#allocation28_spill] sm:$0xff] }
 0x3e1   :  { %v2106_v5 = vsel %vm7070_vm6, %v2041_v8, 0.0  ;;  %v2053_v40 = vsub.f32 %v7071_v22, %v1881_v21  ;;  %v2197_v2 = vsel %vm2141_vm7, %v2105_v24, 0.0  ;;  %v2438_v28 = vsel %vm7072_vm13, %v2374_v1, 0.0  ;;  %vm7074_vm2 = vmmov %vm7070_vm6 }
 0x3e2   :  { %v6209_v38 = vsel %vm2141_vm7, %v2116_v9, 0.0  ;;  %vm7073_vm10 = vcmp.ne.s32.totalorder %v7056_v58, 4294967295  ;;  %v2196_v43 = vadd.f32 %v2195_v6, %v2194_v11  ;;  %v2527_v13 = vsel %vm2141_vm7, %v2437_v42, 0.0  ;;  %v7077_v6 = vld [vmem:[#allocation37_spill] sm:$0xff] }
 0x3e3   :  { %v2449_v14 = vsel %vm7073_vm10, %v2385_v15, 0.0  ;;  %v2526_v34 = vadd.f32 %v2525_v3, %v2524_v36  ;;  %v2199_v8 = vsel %vm2141_vm7, %v2106_v5, 0.0  ;;  %v2439_v21 = vsel %vm7074_vm2, %v2375_v55, 0.0  ;;  %v7078_v55 = vld [vmem:[#allocation29_spill] sm:$0xff] }
 0x3e4   :  { %v2313_v54 = vsub.f32 1.0, %v1851_v4  ;;  %v2387_v62 = vmul.f32 %v2323_v19, %v2323_v19  ;;  %v2198_v1 = vadd.f32 %v2197_v2, %v2196_v43  ;;  %v2529_v9 = vsel %vm2141_vm7, %v2438_v28, 0.0  ;;  %v7079_v28 = vld [vmem:[#allocation82_spill] sm:$0xff] }
 0x3e5   :  { %v2043_v63 = vsub.f32 %v7075_v17, %v1851_v4  ;;  %v2118_v15 = vsel %vm322_vm9, %v2053_v40, 0.0  ;;  %v2055_v27 = vsub.f32 %v7077_v6, %v1887_v16  ;;  %v2528_v24 = vadd.f32 %v2527_v13, %v2526_v34  ;;  %v1860_v4 = vpop.xlane.xlu1 %1859  ;;  %v7081_v43 = vld [vmem:[#allocation30_spill] sm:$0xff]  ;;  %v7082_v34 = vld [vmem:[#allocation96_spill] sm:$0xff] }
 0x3e6   :  { %v2314_v20 = vsub.f32 1.0, %v1854_v32  ;;  %v2325_v42 = vsub.f32 1.0, %v1887_v16  ;;  %v2200_v11 = vadd.f32 %v2199_v8, %v2198_v1  ;;  %v2531_v3 = vsel %vm2141_vm7, %v2439_v21, 0.0 }
 0x3e7   :  { %v2044_v49 = vsub.f32 %v7078_v55, %v1854_v32  ;;  %v6225_v19 = vsel %vm2141_vm7, %v2449_v14, 0.0  ;;  %v2530_v5 = vadd.f32 %v2529_v9, %v2528_v24  ;;  %v2377_v36 = vmul.f32 %v2313_v54, %v2313_v54  ;;  %v7084_v9 = vld [vmem:[#allocation84_spill] sm:$0xff] }
 0x3e8   :  { %v2315_v22 = vsub.f32 1.0, %v1857_v39  ;;  %v6228_v2 = vsel %vm2141_vm7, %v2118_v15, 0.0  ;;  %v2451_v40 = vsel %vm322_vm9, %v2387_v62, 0.0  ;;  %vm7080_vm11 = vcmp.ne.s32.totalorder %v7079_v28, 4294967295  ;;  %v7086_v15 = vld [vmem:[#allocation79_spill] sm:$0xff] }
 0x3e9   :  { %v2108_v16 = vsel %vm7080_vm11, %v2043_v63, 0.0  ;;  %v2045_v13 = vsub.f32 %v7081_v43, %v1857_v39  ;;  %vm7083_vm6 = vcmp.ne.s32.totalorder %v7082_v34, 4294967295  ;;  %v2532_v14 = vadd.f32 %v2531_v3, %v2530_v5  ;;  %vm7087_vm9 = vmmov %vm7080_vm11  ;;  %v7097_v34 = vld [vmem:[#allocation42_spill] sm:$0xff] }
 0x3ea   :  { %v2120_v32 = vsel %vm7083_vm6, %v2055_v27, 0.0  ;;  %v2378_v8 = vmul.f32 %v2314_v20, %v2314_v20  ;;  %v2316_v21 = vsub.f32 1.0, %v1860_v4  ;;  %v2389_v54 = vmul.f32 %v2325_v42, %v2325_v42  ;;  %v1863_v27 = vpop.xlane.xlu1 %1862  ;;  %v1893_v20 = vpop.xlane.xlu0 %1892  ;;  %vm7092_vm11 = vmmov %vm7083_vm6 }
 0x3eb   :  { %v2202_v1 = vadd.f32 %v6154_v35, %v2200_v11  ;;  %vm7085_vm13 = vcmp.ne.s32.totalorder %v7084_v9, 4294967295  ;;  %v2046_v58 = vsub.f32 %v7086_v15, %v1860_v4  ;;  %v6242_v62 = vsel %vm2141_vm7, %v2451_v40, 0.0  ;;  %v7088_v35 = vld [vmem:[#allocation36_spill] sm:$0xff]  ;;  %v7090_v11 = vld [vmem:[#allocation81_spill] sm:$0xff] }
 0x3ec   :  { %v2109_v17 = vsel %vm7085_vm13, %v2044_v49, 0.0  ;;  %v2203_v63 = vsel %vm2141_vm7, %v2108_v16, 0.0  ;;  %v2441_v39 = vsel %vm7087_vm9, %v2377_v36, 0.0  ;;  %v2379_v6 = vmul.f32 %v2315_v22, %v2315_v22  ;;  %vm7091_vm2 = vmmov %vm7085_vm13  ;;  %v7093_v16 = vld [vmem:[#allocation86_spill] sm:$0xff] }
 0x3ed   :  { %v6248_v24 = vsel %vm2141_vm7, %v2120_v32, 0.0  ;;  %vm7089_vm10 = vcmp.ne.s32.totalorder %v7088_v35, 4294967295  ;;  %v2047_v3 = vsub.f32 %v7090_v11, %v1863_v27  ;;  %v2317_v55 = vsub.f32 1.0, %v1863_v27  ;;  %v7101_v11 = vld [vmem:[#allocation90_spill] sm:$0xff] }
 0x3ee   :  { %v2110_v42 = vsel %vm7089_vm10, %v2045_v13, 0.0  ;;  %v2534_v49 = vadd.f32 %v6159_v41, %v2532_v14  ;;  %v2205_v5 = vsel %vm2141_vm7, %v2109_v17, 0.0  ;;  %v2442_v4 = vsel %vm7091_vm2, %v2378_v8, 0.0  ;;  %v7095_v13 = vld [vmem:[#allocation39_spill] sm:$0xff]  ;;  %vm7096_vm13 = vmmov %vm7089_vm10  ;;  %v1866_v9 = vpop.xlane.xlu1 %1865 }
 0x3ef   :  { %v2380_v36 = vmul.f32 %v2316_v21, %v2316_v21  ;;  %v2453_v22 = vsel %vm7092_vm11, %v2389_v54, 0.0  ;;  %v2204_v40 = vadd.f32 %v2203_v63, %v2202_v1  ;;  %v2535_v28 = vsel %vm2141_vm7, %v2441_v39, 0.0  ;;  %v7099_v1 = vld [vmem:[#allocation32_spill] sm:$0xff] }
 0x3f0   :  { %vm7094_vm6 = vcmp.ne.s32.totalorder %v7093_v16, 4294967295  ;;  %v2057_v32 = vsub.f32 %v7095_v13, %v1893_v20  ;;  %v2207_v15 = vsel %vm2141_vm7, %v2110_v42, 0.0  ;;  %v2443_v41 = vsel %vm7096_vm13, %v2379_v6, 0.0  ;;  %v7104_v16 = vld [vmem:[#allocation33_spill] sm:$0xff] }
 0x3f1   :  { %v2111_v43 = vsel %vm7094_vm6, %v2046_v58, 0.0  ;;  %v2381_v14 = vmul.f32 %v2317_v55, %v2317_v55  ;;  %v2206_v8 = vadd.f32 %v2205_v5, %v2204_v40  ;;  %v2537_v21 = vsel %vm2141_vm7, %v2442_v4, 0.0  ;;  %vm7100_vm10 = vmmov %vm7094_vm6 }
 0x3f2   :  { %vm7098_vm9 = vcmp.ne.s32.totalorder %v7097_v34, 4294967295  ;;  %v2048_v17 = vsub.f32 %v7099_v1, %v1866_v9  ;;  %v2536_v63 = vadd.f32 %v2535_v28, %v2534_v49  ;;  %v2209_v58 = vsel %vm2141_vm7, %v2111_v43, 0.0  ;;  %v1869_v40 = vpop.xlane.xlu1 %1868  ;;  %v1899_v28 = vpop.xlane.xlu0 %1898 }
 0x3f3   :  { %v2112_v54 = vsel %vm7098_vm9, %v2047_v3, 0.0  ;;  %v2444_v39 = vsel %vm7100_vm10, %v2380_v36, 0.0  ;;  %v2318_v27 = vsub.f32 1.0, %v1866_v9  ;;  %v2327_v42 = vsub.f32 1.0, %v1893_v20  ;;  %vm7103_vm11 = vmmov %vm7098_vm9 }
 0x3f4   :  { %v2208_v35 = vadd.f32 %v2207_v15, %v2206_v8  ;;  %v2539_v6 = vsel %vm2141_vm7, %v2443_v41, 0.0  ;;  %vm7102_vm2 = vcmp.ne.s32.totalorder %v7101_v11, 4294967295  ;;  %v2538_v5 = vadd.f32 %v2537_v21, %v2536_v63 }
 0x3f5   :  { %v2113_v55 = vsel %vm7102_vm2, %v2048_v17, 0.0  ;;  %v2211_v4 = vsel %vm2141_vm7, %v2112_v54, 0.0  ;;  %v2445_v3 = vsel %vm7103_vm11, %v2381_v14, 0.0  ;;  %v2382_v49 = vmul.f32 %v2318_v27, %v2318_v27  ;;  %vm7106_vm6 = vmmov %vm7102_vm2  ;;  %v7107_v54 = vld [vmem:[#allocation91_spill] sm:$0xff] }
 0x3f6   :  { %v2210_v43 = vadd.f32 %v2209_v58, %v2208_v35  ;;  %v2541_v36 = vsel %vm2141_vm7, %v2444_v39, 0.0  ;;  %v2049_v20 = vsub.f32 %v7104_v16, %v1869_v40  ;;  %v2319_v13 = vsub.f32 1.0, %v1869_v40  ;;  %v1872_v35 = vpop.xlane.xlu1 %1871 }
 0x3f7   :  { %v2122_v41 = vsel %vm326_vm4, %v2057_v32, 0.0  ;;  %v2540_v9 = vadd.f32 %v2539_v6, %v2538_v5  ;;  %v2213_v8 = vsel %vm2141_vm7, %v2113_v55, 0.0  ;;  %v2446_v21 = vsel %vm7106_vm6, %v2382_v49, 0.0  ;;  %v7110_v55 = vld [vmem:[#allocation34_spill] sm:$0xff] }
 0x3f8   :  { %v2212_v34 = vadd.f32 %v2211_v4, %v2210_v43  ;;  %v2543_v14 = vsel %vm2141_vm7, %v2445_v3, 0.0  ;;  %vm7108_vm13 = vcmp.ne.s32.totalorder %v7107_v54, 4294967295  ;;  %v2383_v17 = vmul.f32 %v2319_v13, %v2319_v13  ;;  %v7111_v3 = vld [vmem:[#allocation87_spill] sm:$0xff]  ;;  %v7112_v13 = vld [vmem:[#allocation46_spill] sm:$0xff] }
 0x3f9   :  { %v2114_v1 = vsel %vm7108_vm13, %v2049_v20, 0.0  ;;  %v2391_v63 = vmul.f32 %v2327_v42, %v2327_v42  ;;  %v2329_v58 = vsub.f32 1.0, %v1899_v28  ;;  %v2542_v39 = vadd.f32 %v2541_v36, %v2540_v9  ;;  %vm7109_vm9 = vmmov %vm7108_vm13  ;;  %v1905_v36 = vpop.xlane.xlu0 %1904 }
 0x3fa   :  { %v2215_v27 = vsel %vm2141_vm7, %v2114_v1, 0.0  ;;  %v2214_v32 = vadd.f32 %v2213_v8, %v2212_v34  ;;  %v2545_v6 = vsel %vm2141_vm7, %v2446_v21, 0.0  ;;  %v2447_v11 = vsel %vm7109_vm9, %v2383_v17, 0.0  ;;  %v1878_v54 = vpop.xlane.xlu1 %1877  ;;  %v7114_v1 = vld [vmem:[#allocation35_spill] sm:$0xff] }
 0x3fb   :  { %v2050_v5 = vsub.f32 %v7110_v55, %v1872_v35  ;;  %v6295_v4 = vsel %vm2141_vm7, %v2453_v22, 0.0  ;;  %v2059_v49 = vsub.f32 %v7111_v3, %v1899_v28  ;;  %v2544_v40 = vadd.f32 %v2543_v14, %v2542_v39 }
 0x3fc   :  { %v2320_v42 = vsub.f32 1.0, %v1872_v35  ;;  %v6299_v43 = vsel %vm2141_vm7, %v2122_v41, 0.0  ;;  %v2216_v16 = vadd.f32 %v2215_v27, %v2214_v32  ;;  %v2547_v20 = vsel %vm2141_vm7, %v2447_v11, 0.0  ;;  %v7115_v27 = vld [vmem:[#allocation88_spill] sm:$0xff]  ;;  %v7117_v11 = vld [vmem:[#allocation47_spill] sm:$0xff] }
 0x3fd   :  { %vm7113_vm10 = vcmp.ne.s32.totalorder %v7112_v13, 4294967295  ;;  %v2393_v8 = vmul.f32 %v2329_v58, %v2329_v58  ;;  %v2546_v21 = vadd.f32 %v2545_v6, %v2544_v40  ;;  %v2455_v28 = vsel %vm326_vm4, %v2391_v63, 0.0 }
 0x3fe   :  { %v2115_v9 = vsel %vm7113_vm10, %v2050_v5, 0.0  ;;  %v2384_v22 = vmul.f32 %v2320_v42, %v2320_v42  ;;  %v2052_v41 = vsub.f32 %v7114_v1, %v1878_v54  ;;  %v2322_v17 = vsub.f32 1.0, %v1878_v54  ;;  %vm7116_vm2 = vmmov %vm7113_vm10  ;;  %v1884_v42 = vpop.xlane.xlu1 %1883 }
 0x3ff   :  { %v2217_v34 = vsel %vm2141_vm7, %v2115_v9, 0.0  ;;  %v2124_v39 = vsel %vm328_vm3, %v2059_v49, 0.0  ;;  %v2061_v35 = vsub.f32 %v7115_v27, %v1905_v36  ;;  %v2548_v32 = vadd.f32 %v2547_v20, %v2546_v21  ;;  %v1911_v20 = vpop.xlane.xlu0 %1910  ;;  %v7120_v21 = vld [vmem:[#allocation38_spill] sm:$0xff] }
 0x400   :  { %v2218_v14 = vadd.f32 %v2217_v34, %v2216_v16  ;;  %v2448_v58 = vsel %vm7116_vm2, %v2384_v22, 0.0  ;;  %vm7118_vm11 = vcmp.ne.s32.totalorder %v7117_v11, 4294967295  ;;  %v2386_v63 = vmul.f32 %v2322_v17, %v2322_v17 }
 0x401   :  { %v2549_v6 = vsel %vm2141_vm7, %v2448_v58, 0.0  ;;  %v2117_v55 = vsel %vm7118_vm11, %v2052_v41, 0.0  ;;  %v2457_v5 = vsel %vm328_vm3, %v2393_v8, 0.0  ;;  %v2331_v3 = vsub.f32 1.0, %v1905_v36  ;;  %vm7119_vm4 = vmmov %vm7118_vm11 }
 0x402   :  { %v2220_v15 = vadd.f32 %v6209_v38, %v2218_v14  ;;  %v2550_v40 = vadd.f32 %v2549_v6, %v2548_v32  ;;  %v2221_v49 = vsel %vm2141_vm7, %v2117_v55, 0.0  ;;  %v2563_v16 = vsel %vm2141_vm7, %v2455_v28, 0.0  ;;  %v1890_v32 = vpop.xlane.xlu1 %1889 }
 0x403   :  { %v2450_v9 = vsel %vm7119_vm4, %v2386_v63, 0.0  ;;  %v2054_v34 = vsub.f32 %v7120_v21, %v1884_v42  ;;  %v2126_v38 = vsel %vm330_vm1, %v2061_v35, 0.0  ;;  %v2324_v8 = vsub.f32 1.0, %v1884_v42  ;;  %v1917_v58 = vpop.xlane.xlu0 %1916 }
 0x404   :  { %v2222_v13 = vadd.f32 %v2221_v49, %v2220_v15  ;;  %v2552_v53 = vadd.f32 %v6225_v19, %v2550_v40  ;;  %v2553_v36 = vsel %vm2141_vm7, %v2450_v9, 0.0  ;;  %v2235_v22 = vsel %vm2141_vm7, %v2124_v39, 0.0  ;;  %v7122_v39 = vld [vmem:[#allocation40_spill] sm:$0xff]  ;;  %v7123_v15 = vld [vmem:[#allocation89_spill] sm:$0xff]  ;;  %v7124_v49 = vld [vmem:[#allocation98_spill] sm:$0xff] }
 0x405   :  { %v6330_v54 = vsel %vm2141_vm7, %v2457_v5, 0.0  ;;  %v2119_v14 = vsel %vm323_vm15, %v2054_v34, 0.0  ;;  %v2395_v41 = vmul.f32 %v2331_v3, %v2331_v3  ;;  %v2388_v35 = vmul.f32 %v2324_v8, %v2324_v8  ;;  %v7127_v8 = vld [vmem:[#allocation41_spill] sm:$0xff] }
 0x406   :  { %v2224_v1 = vadd.f32 %v6228_v2, %v2222_v13  ;;  %v2554_v17 = vadd.f32 %v2553_v36, %v2552_v53  ;;  %v2225_v27 = vsel %vm2141_vm7, %v2119_v14, 0.0  ;;  %v6337_v19 = vsel %vm2141_vm7, %v2126_v38, 0.0  ;;  %v1896_v53 = vpop.xlane.xlu1 %1895 }
 0x407   :  { %v2056_v11 = vsub.f32 %v7122_v39, %v1890_v32  ;;  %v2326_v55 = vsub.f32 1.0, %v1890_v32  ;;  %v2063_v63 = vsub.f32 %v7123_v15, %v1911_v20  ;;  %v2333_v5 = vsub.f32 1.0, %v1911_v20 }
 0x408   :  { %v2226_v6 = vadd.f32 %v2225_v27, %v2224_v1  ;;  %v2452_v2 = vsel %vm323_vm15, %v2388_v35, 0.0  ;;  %v2556_v3 = vadd.f32 %v6242_v62, %v2554_v17  ;;  %vm7125_vm3 = vcmp.ne.s32.totalorder %v7124_v49, 4294967295 }
 0x409   :  { %v2557_v40 = vsel %vm2141_vm7, %v2452_v2, 0.0  ;;  %v2121_v42 = vsel %vm7125_vm3, %v2056_v11, 0.0  ;;  %v2390_v9 = vmul.f32 %v2326_v55, %v2326_v55  ;;  %v2459_v21 = vsel %vm330_vm1, %v2395_v41, 0.0  ;;  %vm7126_vm15 = vmmov %vm7125_vm3  ;;  %v7128_v41 = vld [vmem:[#allocation92_spill] sm:$0xff] }
 0x40a   :  { %v2228_v13 = vadd.f32 %v6248_v24, %v2226_v6  ;;  %v2335_v34 = vsub.f32 1.0, %v1917_v58  ;;  %v2558_v38 = vadd.f32 %v2557_v40, %v2556_v3  ;;  %v2229_v20 = vsel %vm2141_vm7, %v2121_v42, 0.0  ;;  %v7130_v40 = vld [vmem:[#allocation43_spill] sm:$0xff] }
 0x40b   :  { %v2454_v62 = vsel %vm7126_vm15, %v2390_v9, 0.0  ;;  %v2058_v28 = vsub.f32 %v7127_v8, %v1896_v53  ;;  %v2328_v14 = vsub.f32 1.0, %v1896_v53  ;;  %v2128_v1 = vsel %vm332_vm0, %v2063_v63, 0.0  ;;  %v1902_v63 = vpop.xlane.xlu1 %1901 }
 0x40c   :  { %v2230_v36 = vadd.f32 %v2229_v20, %v2228_v13  ;;  %v2397_v24 = vmul.f32 %v2333_v5, %v2333_v5  ;;  %v2560_v17 = vadd.f32 %v6295_v4, %v2558_v38  ;;  %v2561_v30 = vsel %vm2141_vm7, %v2454_v62, 0.0  ;;  %v1923_v5 = vpop.xlane.xlu0 %1922 }
 0x40d   :  { %v2065_v27 = vsub.f32 %v7128_v41, %v1917_v58  ;;  %v2123_v32 = vsel %vm327_vm8, %v2058_v28, 0.0  ;;  %v2392_v39 = vmul.f32 %v2328_v14, %v2328_v14  ;;  %v2571_v11 = vsel %vm2141_vm7, %v2459_v21, 0.0 }
 0x40e   :  { %v2232_v6 = vadd.f32 %v6299_v43, %v2230_v36  ;;  %v2399_v55 = vmul.f32 %v2335_v34, %v2335_v34  ;;  %v2562_v15 = vadd.f32 %v2561_v30, %v2560_v17  ;;  %v2233_v2 = vsel %vm2141_vm7, %v2123_v32, 0.0 }
 0x40f   :  { %v2456_v4 = vsel %vm327_vm8, %v2392_v39, 0.0  ;;  %v2060_v58 = vsub.f32 %v7130_v40, %v1902_v63  ;;  %v2330_v49 = vsub.f32 1.0, %v1902_v63  ;;  %v2243_v42 = vsel %vm2141_vm7, %v2128_v1, 0.0  ;;  %v1908_v59 = vpop.xlane.xlu1 %1907  ;;  %v7133_v1 = vld [vmem:[#allocation44_spill] sm:$0xff]  ;;  %v7134_v63 = vld [vmem:[#allocation45_spill] sm:$0xff] }
 0x410   :  { %v2234_v3 = vadd.f32 %v2233_v2, %v2232_v6  ;;  %v2461_v43 = vsel %vm332_vm0, %v2397_v24, 0.0  ;;  %v2564_v13 = vadd.f32 %v2563_v16, %v2562_v15  ;;  %v2565_v9 = vsel %vm2141_vm7, %v2456_v4, 0.0  ;;  %v1929_v35 = vpop.xlane.xlu0 %1928 }
 0x411   :  { %v2130_v21 = vsel %vm334_vm12, %v2065_v27, 0.0  ;;  %vm7131_vm1 = vcmp.ne.s32.totalorder %v5729_v12, 4294967295  ;;  %v2394_v20 = vmul.f32 %v2330_v49, %v2330_v49  ;;  %v2463_v53 = vsel %vm334_vm12, %v2399_v55, 0.0 }
 0x412   :  { %v2125_v34 = vsel %vm7131_vm1, %v2060_v58, 0.0  ;;  %v2236_v38 = vadd.f32 %v2235_v22, %v2234_v3  ;;  %v2337_v36 = vsub.f32 1.0, %v1923_v5  ;;  %v2566_v62 = vadd.f32 %v2565_v9, %v2564_v13  ;;  %vm7132_vm8 = vmmov %vm7131_vm1 }
 0x413   :  { %v2237_v8 = vsel %vm2141_vm7, %v2125_v34, 0.0  ;;  %v2067_v16 = vsub.f32 %v5811_v44, %v1923_v5  ;;  %v2458_v14 = vsel %vm7132_vm8, %v2394_v20, 0.0  ;;  %v2062_v24 = vsub.f32 %v7133_v1, %v1908_v59  ;;  %v1914_v15 = vpop.xlane.xlu1 %1913 }
 0x414   :  { %v2238_v28 = vadd.f32 %v2237_v8, %v2236_v38  ;;  %v2575_v17 = vsel %vm2141_vm7, %v2461_v43, 0.0  ;;  %v2568_v22 = vadd.f32 %v6330_v54, %v2566_v62  ;;  %v2569_v7 = vsel %vm2141_vm7, %v2458_v14, 0.0  ;;  %v1935_v38 = vpop.xlane.xlu0 %1934 }
 0x415   :  { %v2332_v30 = vsub.f32 1.0, %v1908_v59  ;;  %v2247_v41 = vsel %vm2141_vm7, %v2130_v21, 0.0  ;;  %v2579_v27 = vsel %vm2141_vm7, %v2463_v53, 0.0  ;;  %v2127_v44 = vsel %vm331_vm14, %v2062_v24, 0.0 }
 0x416   :  { %v2240_v12 = vadd.f32 %v6337_v19, %v2238_v28  ;;  %v2401_v32 = vmul.f32 %v2337_v36, %v2337_v36  ;;  %v2570_v6 = vadd.f32 %v2569_v7, %v2568_v22  ;;  %v2241_v39 = vsel %vm2141_vm7, %v2127_v44, 0.0  ;;  %v7137_v36 = vld [vmem:[#allocation94_spill] sm:$0xff] }
 0x417   :  { %v2396_v55 = vmul.f32 %v2332_v30, %v2332_v30  ;;  %v2132_v54 = vsel %vm336_vm5, %v2067_v16, 0.0  ;;  %v2064_v5 = vsub.f32 %v7134_v63, %v1914_v15  ;;  %v2334_v3 = vsub.f32 1.0, %v1914_v15  ;;  %v1920_v53 = vpop.xlane.xlu1 %1919 }
 0x418   :  { %v2242_v2 = vadd.f32 %v2241_v39, %v2240_v12  ;;  %v2069_v4 = vsub.f32 %v5863_v26, %v1929_v35  ;;  %v2339_v40 = vsub.f32 1.0, %v1929_v35  ;;  %v2572_v19 = vadd.f32 %v2571_v11, %v2570_v6  ;;  %v1941_v44 = vpop.xlane.xlu0 %1940 }
 0x419   :  { %v2460_v58 = vsel %vm331_vm14, %v2396_v55, 0.0  ;;  %vm7135_vm0 = vcmp.ne.s32.totalorder %v5837_v0, 4294967295  ;;  %v2398_v9 = vmul.f32 %v2334_v3, %v2334_v3  ;;  %v2251_v21 = vsel %vm2141_vm7, %v2132_v54, 0.0 }
 0x41a   :  { %v2573_v49 = vsel %vm2141_vm7, %v2460_v58, 0.0  ;;  %v2129_v43 = vsel %vm7135_vm0, %v2064_v5, 0.0  ;;  %v2244_v13 = vadd.f32 %v2243_v42, %v2242_v2  ;;  %v2465_v34 = vsel %vm336_vm5, %v2401_v32, 0.0  ;;  %vm7136_vm14 = vmmov %vm7135_vm0 }
 0x41b   :  { %v2574_v20 = vadd.f32 %v2573_v49, %v2572_v19  ;;  %v2245_v26 = vsel %vm2141_vm7, %v2129_v43, 0.0  ;;  %v2462_v11 = vsel %vm7136_vm14, %v2398_v9, 0.0  ;;  %v2066_v62 = vsub.f32 %v7137_v36, %v1920_v53  ;;  %v1926_v35 = vpop.xlane.xlu1 %1925 }
 0x41c   :  { %v2246_v50 = vadd.f32 %v2245_v26, %v2244_v13  ;;  %v2336_v8 = vsub.f32 1.0, %v1920_v53  ;;  %vm7138_vm12 = vcmp.ne.s32.totalorder %v5940_v46, 4294967295  ;;  %v2403_v59 = vmul.f32 %v2339_v40, %v2339_v40 }
 0x41d   :  { %v2134_v42 = vsel %vm7138_vm12, %v2069_v4, 0.0  ;;  %v2576_v16 = vadd.f32 %v2575_v17, %v2574_v20  ;;  %v2577_v47 = vsel %vm2141_vm7, %v2462_v11, 0.0  ;;  %v2341_v28 = vsub.f32 1.0, %v1935_v38  ;;  %vm7141_vm13 = vmmov %vm7138_vm12 }
 0x41e   :  { %vm7139_vm5 = vcmp.ne.s32.totalorder %v5891_v25, 4294967295  ;;  %v2248_v1 = vadd.f32 %v2247_v41, %v2246_v50  ;;  %v2400_v24 = vmul.f32 %v2336_v8, %v2336_v8  ;;  %v2583_v22 = vsel %vm2141_vm7, %v2465_v34, 0.0 }
 0x41f   :  { %v2131_v14 = vsel %vm7139_vm5, %v2066_v62, 0.0  ;;  %v2071_v0 = vsub.f32 %v5886_v18, %v1935_v38  ;;  %v2578_v7 = vadd.f32 %v2577_v47, %v2576_v16  ;;  %vm7140_vm6 = vmmov %vm7139_vm5  ;;  %v2068_v32 = vsub.f32 %v5818_v23, %v1926_v35  ;;  %v1932_v4 = vpop.xlane.xlu1 %1931 }
 0x420   :  { %v2249_v30 = vsel %vm2141_vm7, %v2131_v14, 0.0  ;;  %v2464_v17 = vsel %vm7140_vm6, %v2400_v24, 0.0  ;;  %v2338_v6 = vsub.f32 1.0, %v1926_v35  ;;  %v2255_v39 = vsel %vm2141_vm7, %v2134_v42, 0.0 }
 0x421   :  { %v2250_v12 = vadd.f32 %v2249_v30, %v2248_v1  ;;  %v2467_v41 = vsel %vm7141_vm13, %v2403_v59, 0.0  ;;  %v2580_v55 = vadd.f32 %v2579_v27, %v2578_v7  ;;  %v2581_v18 = vsel %vm2141_vm7, %v2464_v17, 0.0 }
 0x422   :  { %v2405_v15 = vmul.f32 %v2341_v28, %v2341_v28  ;;  %vm7142_vm9 = vcmp.ne.s32.totalorder %v5946_v33, 4294967295  ;;  %v2402_v63 = vmul.f32 %v2338_v6, %v2338_v6  ;;  %vm7143_vm10 = vcmp.ne.s32.totalorder %v5974_v60, 4294967295 }
 0x423   :  { %v2133_v54 = vsel %vm7142_vm9, %v2068_v32, 0.0  ;;  %v2252_v2 = vadd.f32 %v2251_v21, %v2250_v12  ;;  %v2136_v25 = vsel %vm7143_vm10, %v2071_v0, 0.0  ;;  %v2073_v23 = vsub.f32 %v5922_v10, %v1941_v44  ;;  %vm7144_vm2 = vmmov %vm7142_vm9  ;;  %v1947_v21 = vpop.xlane.xlu0 %1946  ;;  %v1938_v53 = vpop.xlane.xlu1 %1937 }
 0x424   :  { %v2582_v5 = vadd.f32 %v2581_v18, %v2580_v55  ;;  %v2253_v3 = vsel %vm2141_vm7, %v2133_v54, 0.0  ;;  %v2343_v46 = vsub.f32 1.0, %v1941_v44  ;;  %v2466_v27 = vsel %vm7144_vm2, %v2402_v63, 0.0  ;;  %vm7145_vm11 = vmmov %vm7143_vm10 }
 0x425   :  { %v2254_v40 = vadd.f32 %v2253_v3, %v2252_v2  ;;  %v2070_v58 = vsub.f32 %v5870_v56, %v1932_v4  ;;  %v2587_v19 = vsel %vm2141_vm7, %v2467_v41, 0.0  ;;  %v2585_v43 = vsel %vm2141_vm7, %v2466_v27, 0.0  ;;  %v7156_v2 = vld [vmem:[#allocation99_spill] sm:$0xff] }
 0x426   :  { %v2584_v49 = vadd.f32 %v2583_v22, %v2582_v5  ;;  %v2340_v13 = vsub.f32 1.0, %v1932_v4  ;;  %v2259_v9 = vsel %vm2141_vm7, %v2136_v25, 0.0  ;;  %v2469_v10 = vsel %vm7145_vm11, %v2405_v15, 0.0 }
 0x427   :  { %vm7146_vm4 = vcmp.ne.s32.totalorder %v5997_v61, 4294967295  ;;  %v2256_v38 = vadd.f32 %v2255_v39, %v2254_v40  ;;  %vm7147_vm3 = vcmp.ne.s32.totalorder %v6003_v45, 4294967295  ;;  %v2407_v50 = vmul.f32 %v2343_v46, %v2343_v46 }
 0x428   :  { %v2135_v34 = vsel %vm7146_vm4, %v2070_v58, 0.0  ;;  %v2138_v33 = vsel %vm7147_vm3, %v2073_v23, 0.0  ;;  %v2586_v56 = vadd.f32 %v2585_v43, %v2584_v49  ;;  %v2404_v26 = vmul.f32 %v2340_v13, %v2340_v13  ;;  %vm7148_vm15 = vmmov %vm7146_vm4 }
 0x429   :  { %v2257_v20 = vsel %vm2141_vm7, %v2135_v34, 0.0  ;;  %v2072_v36 = vsub.f32 %v5916_v29, %v1938_v53  ;;  %v2342_v62 = vsub.f32 1.0, %v1938_v53  ;;  %v2075_v60 = vsub.f32 %v6029_v52, %v1947_v21  ;;  %v1944_v52 = vpop.xlane.xlu1 %1943  ;;  %vm7151_vm0 = vmmov %vm7147_vm3 }
 0x42a   :  { %v2258_v11 = vadd.f32 %v2257_v20, %v2256_v38  ;;  %v2345_v8 = vsub.f32 1.0, %v1947_v21  ;;  %v2468_v42 = vsel %vm7148_vm15, %v2404_v26, 0.0  ;;  %v2588_v59 = vadd.f32 %v2587_v19, %v2586_v56 }
 0x42b   :  { %v2589_v16 = vsel %vm2141_vm7, %v2468_v42, 0.0  ;;  %vm7149_vm1 = vcmp.ne.s32.totalorder %v6048_v57, 4294967295  ;;  %v2406_v14 = vmul.f32 %v2342_v62, %v2342_v62  ;;  %v2591_v1 = vsel %vm2141_vm7, %v2469_v10, 0.0 }
 0x42c   :  { %v2137_v47 = vsel %vm7149_vm1, %v2072_v36, 0.0  ;;  %v2260_v28 = vadd.f32 %v2259_v9, %v2258_v11  ;;  %v2263_v24 = vsel %vm2141_vm7, %v2138_v33, 0.0  ;;  %v2590_v29 = vadd.f32 %v2589_v16, %v2588_v59  ;;  %vm7150_vm8 = vmmov %vm7149_vm1 }
 0x42d   :  { %v2261_v22 = vsel %vm2141_vm7, %v2137_v47, 0.0  ;;  %v2470_v61 = vsel %vm7150_vm8, %v2406_v14, 0.0  ;;  %v2074_v7 = vsub.f32 %v5968_v48, %v1944_v52  ;;  %v2344_v30 = vsub.f32 1.0, %v1944_v52  ;;  %v7154_v48 = vld [vmem:[#allocation50_spill] sm:$0xff] }
 0x42e   :  { %v2262_v0 = vadd.f32 %v2261_v22, %v2260_v28  ;;  %v2471_v35 = vsel %vm7151_vm0, %v2407_v50, 0.0  ;;  %v2409_v44 = vmul.f32 %v2345_v8, %v2345_v8  ;;  %v2592_v12 = vadd.f32 %v2591_v1, %v2590_v29 }
 0x42f   :  { %v2593_v17 = vsel %vm2141_vm7, %v2470_v61, 0.0  ;;  %vm7152_vm14 = vcmp.ne.s32.totalorder %v6078_v51, 4294967295  ;;  %vm7153_vm12 = vcmp.ne.s32.totalorder %v6090_v31, 4294967295  ;;  %v2408_v41 = vmul.f32 %v2344_v30, %v2344_v30 }
 0x430   :  { %v2140_v32 = vsel %vm7152_vm14, %v2075_v60, 0.0  ;;  %v2139_v6 = vsel %vm7153_vm12, %v2074_v7, 0.0  ;;  %v2264_v39 = vadd.f32 %v2263_v24, %v2262_v0  ;;  %v2594_v57 = vadd.f32 %v2593_v17, %v2592_v12  ;;  %vm7155_vm5 = vmmov %vm7153_vm12 }
 0x431   :  { %v2265_v55 = vsel %vm2141_vm7, %v2139_v6, 0.0  ;;  %v2866_v18 = vadd.f32 %v7154_v48, %v6109_v37  ;;  %v2595_v45 = vsel %vm2141_vm7, %v2471_v35, 0.0  ;;  %v2472_v54 = vsel %vm7155_vm5, %v2408_v41, 0.0  ;;  %vm7157_vm6 = vmmov %vm7152_vm14 }
 0x432   :  { %v2266_v15 = vadd.f32 %v2265_v55, %v2264_v39  ;;  %v2867_v63 = vsel %vm2141_vm7, %v7156_v2, 0.0  ;;  %v2267_v25 = vsel %vm2141_vm7, %v2140_v32, 0.0  ;;  %v2473_v23 = vsel %vm7157_vm6, %v2409_v44, 0.0 }
 0x433   :  { %v2597_v5 = vsel %vm2141_vm7, %v2472_v54, 0.0  ;;  %v2596_v3 = vadd.f32 %v2595_v45, %v2594_v57  ;;  %v2599_v37 = vsel %vm2141_vm7, %v2473_v23, 0.0  ;;  %v2868_v40 = vadd.f32 %v2867_v63, %v2866_v18 }
 0x434   :  { %v2268_v4 = vadd.f32 %v2267_v25, %v2266_v15 }
 0x435   :  { %v2598_v46 = vadd.f32 %v2597_v5, %v2596_v3 }
 0x436   :  { %2269 = vadd.xlane.f32.xlu1 %v2268_v4 }
 0x437   :  { %v2600_v27 = vadd.f32 %v2599_v37, %v2598_v46 }
 0x439   :  { %2601 = vadd.xlane.f32.xlu0 %v2600_v27 }
 0x43a   :  { %2869 = vadd.xlane.f32.xlu1 %v2868_v40 }
 0x4c3   :  { %v2270_v31 = vpop.xlane.xlu1 %2269 }
 0x4c4   :  { %v2271_v58 = vrot.slane %v2270_v31, 4 }
 0x4c6   :  { %v2272_v19 = vadd.f32 %v2271_v58, %v2270_v31  ;;  %v2602_v49 = vpop.xlane.xlu0 %2601 }
 0x4c7   :  { %v2603_v43 = vrot.slane %v2602_v49, 4  ;;  %v2870_v13 = vpop.xlane.xlu1 %2869 }
 0x4c8   :  { %v2273_v51 = vrot.slane %v2272_v19, 2  ;;  %v2871_v9 = vrot.slane %v2870_v13, 4 }
 0x4c9   :  { %v2604_v10 = vadd.f32 %v2603_v43, %v2602_v49 }
 0x4ca   :  { %v2872_v21 = vadd.f32 %v2871_v9, %v2870_v13  ;;  %v2274_v34 = vadd.f32 %v2273_v51, %v2272_v19 }
 0x4cb   :  { %v2605_v38 = vrot.slane %v2604_v10, 2 }
 0x4cc   :  { %v2873_v33 = vrot.slane %v2872_v21, 2  ;;  %v2275_v56 = vrot.slane %v2274_v34, 1 }
 0x4cd   :  { %v2606_v20 = vadd.f32 %v2605_v38, %v2604_v10 }
 0x4ce   :  { %v2874_v26 = vadd.f32 %v2873_v33, %v2872_v21  ;;  %v2276_v53 = vadd.f32 %v2275_v56, %v2274_v34 }
 0x4cf   :  { %v2607_v50 = vrot.slane %v2606_v20, 1 }
 0x4d0   :  { %2962 = vpush %v2276_v53  ;;  %v2875_v11 = vrot.slane %v2874_v26, 1 }
 0x4d1   :  { %v2608_v36 = vadd.f32 %v2607_v50, %v2606_v20 }
 0x4d2   :  { %v2876_v62 = vadd.f32 %v2875_v11, %v2874_v26 }
 0x4d3   :  { %2964 = vpush %v2608_v36 }
 0x4d4   :  { %2966 = vpush %v2876_v62 }
 0x501   :  { %s2963_s1 = spop %2962 }
 0x502   :  { %2280 = sst [smem:[#allocation2]] %s2963_s1 }
 0x504   :  { %s2965_s0 = spop %2964 }
 0x505   :  { %s2967_s9 = spop %2966  ;;  %2612 = sst [smem:[#allocation2 + $0x1]] %s2965_s0 }
 0x506   :  { %2880 = sst [smem:[#allocation2 + $0x2]] %s2967_s9 }
 0x507   :  { %3350 = shalt.err (!%p3347_p4)
}
 0x508   :  { %s3355_s11 = smov [#allocation2]  }
 0x509   :  { %2890 = dma.smem_to_vmem %s3355_s11, 16, %s2888_s8, [#allocation3]  }
 0x50a   :  { %3351 = dma.done.wait [#allocation3], 16  }
 0x50b   :  { %3352 = vsyncadd [#allocation3], 4294967280 }
 0x50c   :  { %2894 = sfence }
 0x50d   :  { %2895 = vsyncpa [#allocation3], 1 }

</bundles_post_ra>
